<compile_context>
chip_gen: v7x
topology: tpu7x:2x2x1
jax: 0.10.0
libtpu: 0.0.40
codegen_flags: <defaults>
</compile_context>

<pallas_src>
import jax
import jax.numpy as jnp
from jax.experimental import pallas as pl
from jax.experimental.pallas import tpu as pltpu


# ----------------------------------------------------------------------------
# CNN_Text conv bank + proj_input + GRU input projections, T sentences / step
# ----------------------------------------------------------------------------
def make_cnn_proj_kernel(T, W, D, Co, Ks):
    def kernel(x_ref, wcat_ref, b3_ref, b4_ref, b5_ref,
               wproj_ref, bproj_ref, wih_ref, bih_ref,
               feat_ref, gi_ref):
        # One wide conv-bank matmul: (T*W, D) x (D, sum(Ks)*Co)
        x2d = x_ref[...].reshape(T * W, D)
        y = jnp.dot(x2d, wcat_ref[...], preferred_element_type=jnp.float32)
        y = y.reshape(T, W, -1)                          # (T, W, 12*Co)

        b_refs = (b3_ref, b4_ref, b5_ref)
        col = 0
        feats = []
        for K, b_ref in zip(Ks, b_refs):
            L = W - K + 1
            acc = jnp.zeros((T, L, Co), jnp.float32)
            for k in range(K):                           # shifted sums
                acc = acc + y[:, k:k + L, col:col + Co]
                col += Co
            acc = jnp.maximum(acc + b_ref[...], 0.0)     # relu(conv + b)
            feats.append(jnp.max(acc, axis=1))           # max-over-time (T, Co)
        feats = jnp.concatenate(feats, axis=1)           # (T, 3*Co)
        feat_ref[...] = feats

        # proj_input Linear + both directions' GRU input projections (hoisted
        # out of the serial recurrence): gi = (feats @ Wproj + b) @ [Wih_f|Wih_b]
        rnn_in = jnp.dot(feats, wproj_ref[...],
                         preferred_element_type=jnp.float32) + bproj_ref[...]
        gi_ref[...] = jnp.dot(rnn_in, wih_ref[...],
                              preferred_element_type=jnp.float32) + bih_ref[...]

    return kernel


def cnn_gru_input_features(emb, params, block_rows=128):
    """emb: (N, W, D) f32. Returns (feats (N, F), gi (N, 6H))."""
    N, W, D = emb.shape
    Co = params["conv_bs"][0].shape[-1]
    Ks = tuple(w.shape[0] for w in params["conv_ws"])
    F = len(Ks) * Co

    # Fused weights (built once, outside the kernel).
    wih_cat = jnp.concatenate([params["wih_f"], params["wih_b"]], axis=1)  # (F, 6H)
    bih_cat = jnp.concatenate([params["bih_f"], params["bih_b"]], axis=1)  # (1, 6H)
    G = wih_cat.shape[1]
    # Stack every (D, Co) conv-kernel slice column-wise -> one wide matmul RHS.
    wcat = jnp.concatenate(
        [w[k] for w in params["conv_ws"] for k in range(w.shape[0])], axis=1)

    T = min(block_rows, ((N + 7) // 8) * 8)
    Npad = ((N + T - 1) // T) * T
    if Npad != N:
        emb = jnp.pad(emb, ((0, Npad - N), (0, 0), (0, 0)))

    kernel = make_cnn_proj_kernel(T, W, D, Co, Ks)

    def const_spec(arr):
        nd = arr.ndim
        return pl.BlockSpec(arr.shape, lambda i, _nd=nd: (0,) * _nd)

    in_specs = [pl.BlockSpec((T, W, D), lambda i: (i, 0, 0)), const_spec(wcat)]
    in_specs += [const_spec(b) for b in params["conv_bs"]]
    in_specs += [const_spec(params["wproj"]), const_spec(params["bproj"]),
                 const_spec(wih_cat), const_spec(bih_cat)]

    feats, gi = pl.pallas_call(
        kernel,
        out_shape=(jax.ShapeDtypeStruct((Npad, F), jnp.float32),
                   jax.ShapeDtypeStruct((Npad, G), jnp.float32)),
        grid=(Npad // T,),
        in_specs=in_specs,
        out_specs=(pl.BlockSpec((T, F), lambda i: (i, 0)),
                   pl.BlockSpec((T, G), lambda i: (i, 0))),
        compiler_params=pltpu.CompilerParams(
            dimension_semantics=("parallel",)),
    )(emb, wcat, *params["conv_bs"], params["wproj"], params["bproj"],
      wih_cat, bih_cat)
    return feats[:N], gi[:N]


# ----------------------------------------------------------------------------
# Bidirectional GRU recurrence: single kernel invocation, fori_loop over S
# ----------------------------------------------------------------------------
def make_gru_kernel(H):
    def kernel(gi_ref, h0_ref, whhf_ref, whhb_ref, bhhf_ref, bhhb_ref, out_ref):
        S = gi_ref.shape[0]
        whh_f = whhf_ref[...]
        whh_b = whhb_ref[...]
        bhh_f = bhhf_ref[...]
        bhh_b = bhhb_ref[...]

        def cell(gi, h_prev, whh, bhh):
            # Single fused (B, H) x (H, 3H) dot per direction per step.
            gh = jnp.dot(h_prev, whh, preferred_element_type=jnp.float32) + bhh
            r = jax.nn.sigmoid(gi[:, :H] + gh[:, :H])
            z = jax.nn.sigmoid(gi[:, H:2 * H] + gh[:, H:2 * H])
            n = jnp.tanh(gi[:, 2 * H:] + r * gh[:, 2 * H:])
            return (1.0 - z) * n + z * h_prev

        def step(s, carry):
            h_f, h_b = carry
            gi = gi_ref[s]                                # (B, 6H), precomputed
            h_f = cell(gi[:, :3 * H], h_f, whh_f, bhh_f)
            h_b = cell(gi[:, 3 * H:], h_b, whh_b, bhh_b)
            out_ref[s] = jnp.concatenate([h_f, h_b], axis=1)   # (B, 2H)
            return (h_f, h_b)

        h0 = h0_ref[...]
        jax.lax.fori_loop(0, S, step, (h0, h0), unroll=S <= 16)

    return kernel


def gru_recurrence(gi_seq, h0, params):
    """gi_seq: (S, B, 6H), h0: (B, H). Returns hcat (S, B, 2H)."""
    S, B, _ = gi_seq.shape
    H = h0.shape[1]
    return pl.pallas_call(
        make_gru_kernel(H),
        out_shape=jax.ShapeDtypeStruct((S, B, 2 * H), jnp.float32),
    )(gi_seq, h0, params["whh_f"], params["whh_b"],
      params["bhh_f"], params["bhh_b"])


# ----------------------------------------------------------------------------
# Full forward
# ----------------------------------------------------------------------------
def toulmin_gru_forward(paragraphs, params):
    """paragraphs: (B, S, W) int32 token ids. Returns (B, S, 5) f32."""
    B, S, W = paragraphs.shape
    N = B * S
    H = params["winit"].shape[1]

    # Embedding gather is glue (plain JAX).
    # TODO(synk): fuse the embedding gather into the CNN kernel (scalar-prefetch
    # token ids + in-kernel gather) to avoid materializing emb in HBM.
    emb = jnp.take(params["embed"], paragraphs.reshape(N, W), axis=0)
    emb = emb.astype(jnp.float32)                         # (N, W, D)

    feats, gi = cnn_gru_input_features(emb, params)       # (N, 300), (N, 6H)
    feats = feats.reshape(B, S, -1)
    gi_seq = jnp.transpose(gi.reshape(B, S, -1), (1, 0, 2))   # (S, B, 6H)

    # init_gru: h0 = init_hidden(sent_feats[:, 0, :]) for both directions.
    h0 = jnp.dot(feats[:, 0, :], params["winit"],
                 precision="highest") + params["binit"]   # (B, H)

    hcat = gru_recurrence(gi_seq, h0, params)             # (S, B, 2H)

    # Classifier hoisted out of the serial path: one parallel matmul.
    preds = jnp.dot(hcat.reshape(S * B, 2 * H), params["wcls"],
                    precision="highest") + params["bcls"]
    return jnp.transpose(preds.reshape(S, B, -1), (1, 0, 2))   # (B, S, 5)


# ----------------------------------------------------------------------------
# Deterministic parameter init (shapes follow the PyTorch module)
# ----------------------------------------------------------------------------
def init_params(key, V, D, H, Co=100, Ks=(3, 4, 5), C=5):
    assert D == 300, "proj_input is Linear(300,300) and GRU input_size=embed_size"
    F = len(Ks) * Co  # 300
    keys = iter(jax.random.split(key, 32))

    def u(shape, scale=0.1):
        return jax.random.uniform(next(keys), shape, jnp.float32, -scale, scale)

    params = {}
    params["embed"] = jax.random.normal(next(keys), (V, D), jnp.float32) * 0.1
    # Conv2d(Ci=1, Co, (K, D)) weight (Co,1,K,D) stored transposed as (K, D, Co)
    params["conv_ws"] = tuple(u((K, D, Co), 0.05) for K in Ks)
    params["conv_bs"] = tuple(u((1, Co), 0.05) for _ in Ks)
    # proj_input: Linear(300, 300) stored as W^T
    params["wproj"] = u((F, F))
    params["bproj"] = jnp.zeros((1, F), jnp.float32)
    # init_hidden: Linear(300, H) stored as W^T
    params["winit"] = u((F, H))
    params["binit"] = jnp.zeros((1, H), jnp.float32)
    # Bidirectional GRU: weight_ih (3H, 300) / weight_hh (3H, H) stored
    # transposed and gate-fused as (300, 3H) / (H, 3H), columns = [r | z | n].
    for d in ("f", "b"):
        params[f"wih_{d}"] = u((F, 3 * H), 0.1)
        params[f"whh_{d}"] = u((H, 3 * H), 0.3)
        params[f"bih_{d}"] = jnp.zeros((1, 3 * H), jnp.float32)
        params[f"bhh_{d}"] = jnp.zeros((1, 3 * H), jnp.float32)
    # classifier: Linear(2H, 5) stored as W^T
    params["wcls"] = u((2 * H, C))
    params["bcls"] = jnp.zeros((1, C), jnp.float32)
    return params


# ----------------------------------------------------------------------------
# Pure-JAX reference for validation
# ----------------------------------------------------------------------------
def reference_forward(paragraphs, params):
    B, S, W = paragraphs.shape
    emb = params["embed"][paragraphs]  # (B, S, W, D)
    H = params["winit"].shape[1]

    hp = lambda a, b: jnp.dot(a, b, precision="highest")

    feats = []
    for w, bias in zip(params["conv_ws"], params["conv_bs"]):
        K, _, Co = w.shape
        L = W - K + 1
        y = jnp.zeros((B, S, L, Co), jnp.float32)
        for k in range(K):
            y = y + jnp.einsum("bswd,dc->bswc", emb[:, :, k:k + L, :], w[k],
                               precision="highest")
        y = jnp.maximum(y + bias[0], 0.0)
        feats.append(jnp.max(y, axis=2))
    sent_feats = jnp.concatenate(feats, axis=-1)  # (B, S, 300)

    def cell(x, h, wih, whh, bih, bhh):
        gi = hp(x, wih) + bih
        gh = hp(h, whh) + bhh
        r = jax.nn.sigmoid(gi[:, :H] + gh[:, :H])
        z = jax.nn.sigmoid(gi[:, H:2 * H] + gh[:, H:2 * H])
        n = jnp.tanh(gi[:, 2 * H:] + r * gh[:, 2 * H:])
        return (1.0 - z) * n + z * h

    h0 = hp(sent_feats[:, 0, :], params["winit"]) + params["binit"]
    hf, hb = h0, h0
    preds = []
    for s in range(S):
        x = hp(sent_feats[:, s, :], params["wproj"]) + params["bproj"]
        hf = cell(x, hf, params["wih_f"], params["whh_f"],
                  params["bih_f"], params["bhh_f"])
        hb = cell(x, hb, params["wih_b"], params["whh_b"],
                  params["bih_b"], params["bhh_b"])
        preds.append(hp(jnp.concatenate([hf, hb], axis=1), params["wcls"])
                     + params["bcls"])
    return jnp.stack(preds, axis=1)  # (B, S, 5)


if __name__ == "__main__":
    V, D, H = 50, 300, 32      # vocab, embed (must be 300), GRU hidden
    B, S, W = 2, 3, 8          # batch, max_sent_seq, max_word_seq

    key = jax.random.PRNGKey(0)
    k_params, k_data = jax.random.split(key)
    params = init_params(k_params, V, D, H)
    paragraphs = jax.random.randint(k_data, (B, S, W), 0, V, dtype=jnp.int32)

    out = jax.jit(toulmin_gru_forward)(paragraphs, params)
    out = jax.block_until_ready(out)
    assert out.shape == (B, S, 5), out.shape

    ref = reference_forward(paragraphs, params)
    if not jnp.allclose(out, ref, rtol=1e-3, atol=1e-3):
        max_err = float(jnp.max(jnp.abs(out - ref)))
        raise AssertionError(f"Pallas output mismatch vs reference, max_err={max_err}")

    print("KERNEL_OK")
</pallas_src>

<mosaic_0001>
module attributes {stable_mosaic.version = 11 : i64} {
  func.func @kernel(%arg0: i32, %arg1: memref<8x8x300xf32, #tpu.memory_space<vmem>>, %arg2: memref<300x1200xf32, #tpu.memory_space<vmem>>, %arg3: memref<1x100xf32, #tpu.memory_space<vmem>>, %arg4: memref<1x100xf32, #tpu.memory_space<vmem>>, %arg5: memref<1x100xf32, #tpu.memory_space<vmem>>, %arg6: memref<300x300xf32, #tpu.memory_space<vmem>>, %arg7: memref<1x300xf32, #tpu.memory_space<vmem>>, %arg8: memref<300x192xf32, #tpu.memory_space<vmem>>, %arg9: memref<1x192xf32, #tpu.memory_space<vmem>>, %arg10: memref<8x300xf32, #tpu.memory_space<vmem>>, %arg11: memref<8x192xf32, #tpu.memory_space<vmem>>) attributes {dimension_semantics = [#tpu.dimension_semantics<parallel>], iteration_bounds = array<i64: 1>, scalar_prefetch = 0 : i64, scratch_operands = 0 : i64, tpu.core_type = #tpu.core_type<tc>, window_params = [{transform_indices = @transform_0, window_bounds = array<i64: 8, 8, 300>}, {pipeline_mode = #tpu.pipeline_mode<synchronous>, transform_indices = @transform_1, window_bounds = array<i64: 300, 1200>}, {pipeline_mode = #tpu.pipeline_mode<synchronous>, transform_indices = @transform_2, window_bounds = array<i64: 1, 100>}, {pipeline_mode = #tpu.pipeline_mode<synchronous>, transform_indices = @transform_3, window_bounds = array<i64: 1, 100>}, {pipeline_mode = #tpu.pipeline_mode<synchronous>, transform_indices = @transform_4, window_bounds = array<i64: 1, 100>}, {pipeline_mode = #tpu.pipeline_mode<synchronous>, transform_indices = @transform_5, window_bounds = array<i64: 300, 300>}, {pipeline_mode = #tpu.pipeline_mode<synchronous>, transform_indices = @transform_6, window_bounds = array<i64: 1, 300>}, {pipeline_mode = #tpu.pipeline_mode<synchronous>, transform_indices = @transform_7, window_bounds = array<i64: 300, 192>}, {pipeline_mode = #tpu.pipeline_mode<synchronous>, transform_indices = @transform_8, window_bounds = array<i64: 1, 192>}, {transform_indices = @transform_9, window_bounds = array<i64: 8, 300>}, {transform_indices = @transform_10, window_bounds = array<i64: 8, 192>}]} {
    %c0 = arith.constant 0 : index
    %c0_0 = arith.constant 0 : index
    %c0_1 = arith.constant 0 : index
    %0 = vector.load %arg1[%c0, %c0_0, %c0_1] : memref<8x8x300xf32, #tpu.memory_space<vmem>>, vector<8x8x300xf32>
    %1 = vector.shape_cast %0 : vector<8x8x300xf32> to vector<64x300xf32>
    %c0_2 = arith.constant 0 : index
    %c0_3 = arith.constant 0 : index
    %2 = vector.load %arg2[%c0_2, %c0_3] : memref<300x1200xf32, #tpu.memory_space<vmem>>, vector<300x1200xf32>
    %cst = arith.constant dense<0.000000e+00> : vector<64x1200xf32>
    %3 = tpu.matmul %1, %2, %cst {dimension_numbers = #tpu.dot_dimension_numbers<[1], [0], [0], [1], [0, 0, 1, 1], [], []>} : vector<64x300xf32>, vector<300x1200xf32>, vector<64x1200xf32> -> vector<64x1200xf32>
    %4 = vector.shape_cast %3 : vector<64x1200xf32> to vector<8x8x1200xf32>
    %cst_4 = arith.constant 0.000000e+00 : f32
    %5 = vector.broadcast %cst_4 : f32 to vector<8x6x100xf32>
    %6 = vector.extract_strided_slice %4 {offsets = [0, 0, 0], sizes = [8, 6, 100], strides = [1, 1, 1]} : vector<8x8x1200xf32> to vector<8x6x100xf32>
    %7 = arith.addf %5, %6 : vector<8x6x100xf32>
    %8 = vector.extract_strided_slice %4 {offsets = [0, 1, 100], sizes = [8, 6, 100], strides = [1, 1, 1]} : vector<8x8x1200xf32> to vector<8x6x100xf32>
    %9 = arith.addf %7, %8 : vector<8x6x100xf32>
    %10 = vector.extract_strided_slice %4 {offsets = [0, 2, 200], sizes = [8, 6, 100], strides = [1, 1, 1]} : vector<8x8x1200xf32> to vector<8x6x100xf32>
    %11 = arith.addf %9, %10 : vector<8x6x100xf32>
    %c0_5 = arith.constant 0 : index
    %c0_6 = arith.constant 0 : index
    %12 = vector.load %arg3[%c0_5, %c0_6] : memref<1x100xf32, #tpu.memory_space<vmem>>, vector<1x100xf32>
    %13 = vector.shape_cast %12 : vector<1x100xf32> to vector<1x1x100xf32>
    %14 = vector.broadcast %13 : vector<1x1x100xf32> to vector<8x6x100xf32>
    %15 = arith.addf %11, %14 : vector<8x6x100xf32>
    %cst_7 = arith.constant 0.000000e+00 : f32
    %16 = vector.broadcast %cst_7 : f32 to vector<8x6x100xf32>
    %17 = arith.maximumf %15, %16 : vector<8x6x100xf32>
    %cst_8 = arith.constant dense<0xFF800000> : vector<8x100xf32>
    %18 = vector.multi_reduction <maximumf>, %17, %cst_8 [1] : vector<8x6x100xf32> to vector<8x100xf32>
    %cst_9 = arith.constant 0.000000e+00 : f32
    %19 = vector.broadcast %cst_9 : f32 to vector<8x5x100xf32>
    %20 = vector.extract_strided_slice %4 {offsets = [0, 0, 300], sizes = [8, 5, 100], strides = [1, 1, 1]} : vector<8x8x1200xf32> to vector<8x5x100xf32>
    %21 = arith.addf %19, %20 : vector<8x5x100xf32>
    %22 = vector.extract_strided_slice %4 {offsets = [0, 1, 400], sizes = [8, 5, 100], strides = [1, 1, 1]} : vector<8x8x1200xf32> to vector<8x5x100xf32>
    %23 = arith.addf %21, %22 : vector<8x5x100xf32>
    %24 = vector.extract_strided_slice %4 {offsets = [0, 2, 500], sizes = [8, 5, 100], strides = [1, 1, 1]} : vector<8x8x1200xf32> to vector<8x5x100xf32>
    %25 = arith.addf %23, %24 : vector<8x5x100xf32>
    %26 = vector.extract_strided_slice %4 {offsets = [0, 3, 600], sizes = [8, 5, 100], strides = [1, 1, 1]} : vector<8x8x1200xf32> to vector<8x5x100xf32>
    %27 = arith.addf %25, %26 : vector<8x5x100xf32>
    %c0_10 = arith.constant 0 : index
    %c0_11 = arith.constant 0 : index
    %28 = vector.load %arg4[%c0_10, %c0_11] : memref<1x100xf32, #tpu.memory_space<vmem>>, vector<1x100xf32>
    %29 = vector.shape_cast %28 : vector<1x100xf32> to vector<1x1x100xf32>
    %30 = vector.broadcast %29 : vector<1x1x100xf32> to vector<8x5x100xf32>
    %31 = arith.addf %27, %30 : vector<8x5x100xf32>
    %cst_12 = arith.constant 0.000000e+00 : f32
    %32 = vector.broadcast %cst_12 : f32 to vector<8x5x100xf32>
    %33 = arith.maximumf %31, %32 : vector<8x5x100xf32>
    %cst_13 = arith.constant dense<0xFF800000> : vector<8x100xf32>
    %34 = vector.multi_reduction <maximumf>, %33, %cst_13 [1] : vector<8x5x100xf32> to vector<8x100xf32>
    %cst_14 = arith.constant 0.000000e+00 : f32
    %35 = vector.broadcast %cst_14 : f32 to vector<8x4x100xf32>
    %36 = vector.extract_strided_slice %4 {offsets = [0, 0, 700], sizes = [8, 4, 100], strides = [1, 1, 1]} : vector<8x8x1200xf32> to vector<8x4x100xf32>
    %37 = arith.addf %35, %36 : vector<8x4x100xf32>
    %38 = vector.extract_strided_slice %4 {offsets = [0, 1, 800], sizes = [8, 4, 100], strides = [1, 1, 1]} : vector<8x8x1200xf32> to vector<8x4x100xf32>
    %39 = arith.addf %37, %38 : vector<8x4x100xf32>
    %40 = vector.extract_strided_slice %4 {offsets = [0, 2, 900], sizes = [8, 4, 100], strides = [1, 1, 1]} : vector<8x8x1200xf32> to vector<8x4x100xf32>
    %41 = arith.addf %39, %40 : vector<8x4x100xf32>
    %42 = vector.extract_strided_slice %4 {offsets = [0, 3, 1000], sizes = [8, 4, 100], strides = [1, 1, 1]} : vector<8x8x1200xf32> to vector<8x4x100xf32>
    %43 = arith.addf %41, %42 : vector<8x4x100xf32>
    %44 = vector.extract_strided_slice %4 {offsets = [0, 4, 1100], sizes = [8, 4, 100], strides = [1, 1, 1]} : vector<8x8x1200xf32> to vector<8x4x100xf32>
    %45 = arith.addf %43, %44 : vector<8x4x100xf32>
    %c0_15 = arith.constant 0 : index
    %c0_16 = arith.constant 0 : index
    %46 = vector.load %arg5[%c0_15, %c0_16] : memref<1x100xf32, #tpu.memory_space<vmem>>, vector<1x100xf32>
    %47 = vector.shape_cast %46 : vector<1x100xf32> to vector<1x1x100xf32>
    %48 = vector.broadcast %47 : vector<1x1x100xf32> to vector<8x4x100xf32>
    %49 = arith.addf %45, %48 : vector<8x4x100xf32>
    %cst_17 = arith.constant 0.000000e+00 : f32
    %50 = vector.broadcast %cst_17 : f32 to vector<8x4x100xf32>
    %51 = arith.maximumf %49, %50 : vector<8x4x100xf32>
    %cst_18 = arith.constant dense<0xFF800000> : vector<8x100xf32>
    %52 = vector.multi_reduction <maximumf>, %51, %cst_18 [1] : vector<8x4x100xf32> to vector<8x100xf32>
    %53 = tpu.concatenate %18, %34, %52 in 1 : vector<8x100xf32>, vector<8x100xf32>, vector<8x100xf32> -> vector<8x300xf32>
    %c0_19 = arith.constant 0 : index
    %c0_20 = arith.constant 0 : index
    %54 = vector.load %arg10[%c0_19, %c0_20] : memref<8x300xf32, #tpu.memory_space<vmem>>, vector<8x300xf32>
    tpu.vector_store %arg10[%c0_19, %c0_20], %53 {strides = array<i32>} : memref<8x300xf32, #tpu.memory_space<vmem>>, vector<8x300xf32>,
    %c0_21 = arith.constant 0 : index
    %c0_22 = arith.constant 0 : index
    %55 = vector.load %arg6[%c0_21, %c0_22] : memref<300x300xf32, #tpu.memory_space<vmem>>, vector<300x300xf32>
    %cst_23 = arith.constant dense<0.000000e+00> : vector<8x300xf32>
    %56 = tpu.matmul %53, %55, %cst_23 {dimension_numbers = #tpu.dot_dimension_numbers<[1], [0], [0], [1], [0, 0, 1, 1], [], []>} : vector<8x300xf32>, vector<300x300xf32>, vector<8x300xf32> -> vector<8x300xf32>
    %c0_24 = arith.constant 0 : index
    %c0_25 = arith.constant 0 : index
    %57 = vector.load %arg7[%c0_24, %c0_25] : memref<1x300xf32, #tpu.memory_space<vmem>>, vector<1x300xf32>
    %58 = vector.broadcast %57 : vector<1x300xf32> to vector<8x300xf32>
    %59 = arith.addf %56, %58 : vector<8x300xf32>
    %c0_26 = arith.constant 0 : index
    %c0_27 = arith.constant 0 : index
    %60 = vector.load %arg8[%c0_26, %c0_27] : memref<300x192xf32, #tpu.memory_space<vmem>>, vector<300x192xf32>
    %cst_28 = arith.constant dense<0.000000e+00> : vector<8x192xf32>
    %61 = tpu.matmul %59, %60, %cst_28 {dimension_numbers = #tpu.dot_dimension_numbers<[1], [0], [0], [1], [0, 0, 1, 1], [], []>} : vector<8x300xf32>, vector<300x192xf32>, vector<8x192xf32> -> vector<8x192xf32>
    %c0_29 = arith.constant 0 : index
    %c0_30 = arith.constant 0 : index
    %62 = vector.load %arg9[%c0_29, %c0_30] : memref<1x192xf32, #tpu.memory_space<vmem>>, vector<1x192xf32>
    %63 = vector.broadcast %62 : vector<1x192xf32> to vector<8x192xf32>
    %64 = arith.addf %61, %63 : vector<8x192xf32>
    %c0_31 = arith.constant 0 : index
    %c0_32 = arith.constant 0 : index
    %65 = vector.load %arg11[%c0_31, %c0_32] : memref<8x192xf32, #tpu.memory_space<vmem>>, vector<8x192xf32>
    tpu.vector_store %arg11[%c0_31, %c0_32], %64 {strides = array<i32>} : memref<8x192xf32, #tpu.memory_space<vmem>>, vector<8x192xf32>,
    return
  }
  func.func @transform_0(%arg0: i32) -> (i32, i32, i32) {
    %c0_i32 = arith.constant 0 : i32
    %c0_i32_0 = arith.constant 0 : i32
    %c0_i32_1 = arith.constant 0 : i32
    return %arg0, %c0_i32, %c0_i32_0 : i32, i32, i32
  }
  func.func @transform_1(%arg0: i32) -> (i32, i32) {
    %c0_i32 = arith.constant 0 : i32
    %c0_i32_0 = arith.constant 0 : i32
    %c0_i32_1 = arith.constant 0 : i32
    return %c0_i32, %c0_i32_0 : i32, i32
  }
  func.func @transform_2(%arg0: i32) -> (i32, i32) {
    %c0_i32 = arith.constant 0 : i32
    %c0_i32_0 = arith.constant 0 : i32
    %c0_i32_1 = arith.constant 0 : i32
    return %c0_i32, %c0_i32_0 : i32, i32
  }
  func.func @transform_3(%arg0: i32) -> (i32, i32) {
    %c0_i32 = arith.constant 0 : i32
    %c0_i32_0 = arith.constant 0 : i32
    %c0_i32_1 = arith.constant 0 : i32
    return %c0_i32, %c0_i32_0 : i32, i32
  }
  func.func @transform_4(%arg0: i32) -> (i32, i32) {
    %c0_i32 = arith.constant 0 : i32
    %c0_i32_0 = arith.constant 0 : i32
    %c0_i32_1 = arith.constant 0 : i32
    return %c0_i32, %c0_i32_0 : i32, i32
  }
  func.func @transform_5(%arg0: i32) -> (i32, i32) {
    %c0_i32 = arith.constant 0 : i32
    %c0_i32_0 = arith.constant 0 : i32
    %c0_i32_1 = arith.constant 0 : i32
    return %c0_i32, %c0_i32_0 : i32, i32
  }
  func.func @transform_6(%arg0: i32) -> (i32, i32) {
    %c0_i32 = arith.constant 0 : i32
    %c0_i32_0 = arith.constant 0 : i32
    %c0_i32_1 = arith.constant 0 : i32
    return %c0_i32, %c0_i32_0 : i32, i32
  }
  func.func @transform_7(%arg0: i32) -> (i32, i32) {
    %c0_i32 = arith.constant 0 : i32
    %c0_i32_0 = arith.constant 0 : i32
    %c0_i32_1 = arith.constant 0 : i32
    return %c0_i32, %c0_i32_0 : i32, i32
  }
  func.func @transform_8(%arg0: i32) -> (i32, i32) {
    %c0_i32 = arith.constant 0 : i32
    %c0_i32_0 = arith.constant 0 : i32
    %c0_i32_1 = arith.constant 0 : i32
    return %c0_i32, %c0_i32_0 : i32, i32
  }
  func.func @transform_9(%arg0: i32) -> (i32, i32) {
    %c0_i32 = arith.constant 0 : i32
    %c0_i32_0 = arith.constant 0 : i32
    return %arg0, %c0_i32 : i32, i32
  }
  func.func @transform_10(%arg0: i32) -> (i32, i32) {
    %c0_i32 = arith.constant 0 : i32
    %c0_i32_0 = arith.constant 0 : i32
    return %arg0, %c0_i32 : i32, i32
  }
}

module attributes {stable_mosaic.version = 11 : i64} {
  func.func @kernel(%arg0: memref<3x2x192xf32, #tpu.memory_space<vmem>>, %arg1: memref<2x32xf32, #tpu.memory_space<vmem>>, %arg2: memref<32x96xf32, #tpu.memory_space<vmem>>, %arg3: memref<32x96xf32, #tpu.memory_space<vmem>>, %arg4: memref<1x96xf32, #tpu.memory_space<vmem>>, %arg5: memref<1x96xf32, #tpu.memory_space<vmem>>, %arg6: memref<3x2x64xf32, #tpu.memory_space<vmem>>) attributes {dimension_semantics = [], scalar_prefetch = 0 : i64, scratch_operands = 0 : i64, tpu.core_type = #tpu.core_type<tc>} {
    %c0 = arith.constant 0 : index
    %c0_0 = arith.constant 0 : index
    %0 = vector.load %arg2[%c0, %c0_0] : memref<32x96xf32, #tpu.memory_space<vmem>>, vector<32x96xf32>
    %c0_1 = arith.constant 0 : index
    %c0_2 = arith.constant 0 : index
    %1 = vector.load %arg3[%c0_1, %c0_2] : memref<32x96xf32, #tpu.memory_space<vmem>>, vector<32x96xf32>
    %c0_3 = arith.constant 0 : index
    %c0_4 = arith.constant 0 : index
    %2 = vector.load %arg4[%c0_3, %c0_4] : memref<1x96xf32, #tpu.memory_space<vmem>>, vector<1x96xf32>
    %c0_5 = arith.constant 0 : index
    %c0_6 = arith.constant 0 : index
    %3 = vector.load %arg5[%c0_5, %c0_6] : memref<1x96xf32, #tpu.memory_space<vmem>>, vector<1x96xf32>
    %c0_7 = arith.constant 0 : index
    %c0_8 = arith.constant 0 : index
    %4 = vector.load %arg1[%c0_7, %c0_8] : memref<2x32xf32, #tpu.memory_space<vmem>>, vector<2x32xf32>
    %c0_i32 = arith.constant 0 : i32
    %5 = arith.index_cast %c0_i32 : i32 to index
    %c0_9 = arith.constant 0 : index
    %c0_10 = arith.constant 0 : index
    %6 = vector.load %arg0[%5, %c0_9, %c0_10] : memref<3x2x192xf32, #tpu.memory_space<vmem>>, vector<1x2x192xf32>
    %7 = vector.shape_cast %6 : vector<1x2x192xf32> to vector<2x192xf32>
    %8 = vector.extract_strided_slice %7 {offsets = [0, 0], sizes = [2, 96], strides = [1, 1]} : vector<2x192xf32> to vector<2x96xf32>
    %cst = arith.constant dense<0.000000e+00> : vector<2x96xf32>
    %9 = tpu.matmul %4, %0, %cst {dimension_numbers = #tpu.dot_dimension_numbers<[1], [0], [0], [1], [0, 0, 1, 1], [], []>} : vector<2x32xf32>, vector<32x96xf32>, vector<2x96xf32> -> vector<2x96xf32>
    %10 = vector.broadcast %2 : vector<1x96xf32> to vector<2x96xf32>
    %11 = arith.addf %9, %10 : vector<2x96xf32>
    %12 = vector.extract_strided_slice %8 {offsets = [0, 0], sizes = [2, 32], strides = [1, 1]} : vector<2x96xf32> to vector<2x32xf32>
    %13 = vector.extract_strided_slice %11 {offsets = [0, 0], sizes = [2, 32], strides = [1, 1]} : vector<2x96xf32> to vector<2x32xf32>
    %14 = arith.addf %12, %13 : vector<2x32xf32>
    %15 = arith.negf %14 : vector<2x32xf32>
    %16 = math.exp %15 : vector<2x32xf32>
    %cst_11 = arith.constant 1.000000e+00 : f32
    %17 = vector.broadcast %cst_11 : f32 to vector<2x32xf32>
    %18 = arith.addf %17, %16 : vector<2x32xf32>
    %19 = arith.divf %17, %18 : vector<2x32xf32>
    %20 = vector.extract_strided_slice %8 {offsets = [0, 32], sizes = [2, 32], strides = [1, 1]} : vector<2x96xf32> to vector<2x32xf32>
    %21 = vector.extract_strided_slice %11 {offsets = [0, 32], sizes = [2, 32], strides = [1, 1]} : vector<2x96xf32> to vector<2x32xf32>
    %22 = arith.addf %20, %21 : vector<2x32xf32>
    %23 = arith.negf %22 : vector<2x32xf32>
    %24 = math.exp %23 : vector<2x32xf32>
    %cst_12 = arith.constant 1.000000e+00 : f32
    %25 = vector.broadcast %cst_12 : f32 to vector<2x32xf32>
    %26 = arith.addf %25, %24 : vector<2x32xf32>
    %27 = arith.divf %25, %26 : vector<2x32xf32>
    %28 = vector.extract_strided_slice %8 {offsets = [0, 64], sizes = [2, 32], strides = [1, 1]} : vector<2x96xf32> to vector<2x32xf32>
    %29 = vector.extract_strided_slice %11 {offsets = [0, 64], sizes = [2, 32], strides = [1, 1]} : vector<2x96xf32> to vector<2x32xf32>
    %30 = arith.mulf %19, %29 : vector<2x32xf32>
    %31 = arith.addf %28, %30 : vector<2x32xf32>
    %32 = math.tanh %31 : vector<2x32xf32>
    %cst_13 = arith.constant 1.000000e+00 : f32
    %33 = vector.broadcast %cst_13 : f32 to vector<2x32xf32>
    %34 = arith.subf %33, %27 : vector<2x32xf32>
    %35 = arith.mulf %34, %32 : vector<2x32xf32>
    %36 = arith.mulf %27, %4 : vector<2x32xf32>
    %37 = arith.addf %35, %36 : vector<2x32xf32>
    %38 = vector.extract_strided_slice %7 {offsets = [0, 96], sizes = [2, 96], strides = [1, 1]} : vector<2x192xf32> to vector<2x96xf32>
    %cst_14 = arith.constant dense<0.000000e+00> : vector<2x96xf32>
    %39 = tpu.matmul %4, %1, %cst_14 {dimension_numbers = #tpu.dot_dimension_numbers<[1], [0], [0], [1], [0, 0, 1, 1], [], []>} : vector<2x32xf32>, vector<32x96xf32>, vector<2x96xf32> -> vector<2x96xf32>
    %40 = vector.broadcast %3 : vector<1x96xf32> to vector<2x96xf32>
    %41 = arith.addf %39, %40 : vector<2x96xf32>
    %42 = vector.extract_strided_slice %38 {offsets = [0, 0], sizes = [2, 32], strides = [1, 1]} : vector<2x96xf32> to vector<2x32xf32>
    %43 = vector.extract_strided_slice %41 {offsets = [0, 0], sizes = [2, 32], strides = [1, 1]} : vector<2x96xf32> to vector<2x32xf32>
    %44 = arith.addf %42, %43 : vector<2x32xf32>
    %45 = arith.negf %44 : vector<2x32xf32>
    %46 = math.exp %45 : vector<2x32xf32>
    %cst_15 = arith.constant 1.000000e+00 : f32
    %47 = vector.broadcast %cst_15 : f32 to vector<2x32xf32>
    %48 = arith.addf %47, %46 : vector<2x32xf32>
    %49 = arith.divf %47, %48 : vector<2x32xf32>
    %50 = vector.extract_strided_slice %38 {offsets = [0, 32], sizes = [2, 32], strides = [1, 1]} : vector<2x96xf32> to vector<2x32xf32>
    %51 = vector.extract_strided_slice %41 {offsets = [0, 32], sizes = [2, 32], strides = [1, 1]} : vector<2x96xf32> to vector<2x32xf32>
    %52 = arith.addf %50, %51 : vector<2x32xf32>
    %53 = arith.negf %52 : vector<2x32xf32>
    %54 = math.exp %53 : vector<2x32xf32>
    %cst_16 = arith.constant 1.000000e+00 : f32
    %55 = vector.broadcast %cst_16 : f32 to vector<2x32xf32>
    %56 = arith.addf %55, %54 : vector<2x32xf32>
    %57 = arith.divf %55, %56 : vector<2x32xf32>
    %58 = vector.extract_strided_slice %38 {offsets = [0, 64], sizes = [2, 32], strides = [1, 1]} : vector<2x96xf32> to vector<2x32xf32>
    %59 = vector.extract_strided_slice %41 {offsets = [0, 64], sizes = [2, 32], strides = [1, 1]} : vector<2x96xf32> to vector<2x32xf32>
    %60 = arith.mulf %49, %59 : vector<2x32xf32>
    %61 = arith.addf %58, %60 : vector<2x32xf32>
    %62 = math.tanh %61 : vector<2x32xf32>
    %cst_17 = arith.constant 1.000000e+00 : f32
    %63 = vector.broadcast %cst_17 : f32 to vector<2x32xf32>
    %64 = arith.subf %63, %57 : vector<2x32xf32>
    %65 = arith.mulf %64, %62 : vector<2x32xf32>
    %66 = arith.mulf %57, %4 : vector<2x32xf32>
    %67 = arith.addf %65, %66 : vector<2x32xf32>
    %68 = tpu.concatenate %37, %67 in 1 : vector<2x32xf32>, vector<2x32xf32> -> vector<2x64xf32>
    %69 = arith.index_cast %c0_i32 : i32 to index
    %c0_18 = arith.constant 0 : index
    %c0_19 = arith.constant 0 : index
    %70 = vector.load %arg6[%69, %c0_18, %c0_19] : memref<3x2x64xf32, #tpu.memory_space<vmem>>, vector<1x2x64xf32>
    %71 = vector.shape_cast %70 : vector<1x2x64xf32> to vector<2x64xf32>
    %72 = vector.shape_cast %68 : vector<2x64xf32> to vector<1x2x64xf32>
    tpu.vector_store %arg6[%69, %c0_18, %c0_19], %72 {strides = array<i32>} : memref<3x2x64xf32, #tpu.memory_space<vmem>>, vector<1x2x64xf32>,
    %c1_i32 = arith.constant 1 : i32
    %73 = arith.index_cast %c1_i32 : i32 to index
    %c0_20 = arith.constant 0 : index
    %c0_21 = arith.constant 0 : index
    %74 = vector.load %arg0[%73, %c0_20, %c0_21] : memref<3x2x192xf32, #tpu.memory_space<vmem>>, vector<1x2x192xf32>
    %75 = vector.shape_cast %74 : vector<1x2x192xf32> to vector<2x192xf32>
    %76 = vector.extract_strided_slice %75 {offsets = [0, 0], sizes = [2, 96], strides = [1, 1]} : vector<2x192xf32> to vector<2x96xf32>
    %cst_22 = arith.constant dense<0.000000e+00> : vector<2x96xf32>
    %77 = tpu.matmul %37, %0, %cst_22 {dimension_numbers = #tpu.dot_dimension_numbers<[1], [0], [0], [1], [0, 0, 1, 1], [], []>} : vector<2x32xf32>, vector<32x96xf32>, vector<2x96xf32> -> vector<2x96xf32>
    %78 = vector.broadcast %2 : vector<1x96xf32> to vector<2x96xf32>
    %79 = arith.addf %77, %78 : vector<2x96xf32>
    %80 = vector.extract_strided_slice %76 {offsets = [0, 0], sizes = [2, 32], strides = [1, 1]} : vector<2x96xf32> to vector<2x32xf32>
    %81 = vector.extract_strided_slice %79 {offsets = [0, 0], sizes = [2, 32], strides = [1, 1]} : vector<2x96xf32> to vector<2x32xf32>
    %82 = arith.addf %80, %81 : vector<2x32xf32>
    %83 = arith.negf %82 : vector<2x32xf32>
    %84 = math.exp %83 : vector<2x32xf32>
    %cst_23 = arith.constant 1.000000e+00 : f32
    %85 = vector.broadcast %cst_23 : f32 to vector<2x32xf32>
    %86 = arith.addf %85, %84 : vector<2x32xf32>
    %87 = arith.divf %85, %86 : vector<2x32xf32>
    %88 = vector.extract_strided_slice %76 {offsets = [0, 32], sizes = [2, 32], strides = [1, 1]} : vector<2x96xf32> to vector<2x32xf32>
    %89 = vector.extract_strided_slice %79 {offsets = [0, 32], sizes = [2, 32], strides = [1, 1]} : vector<2x96xf32> to vector<2x32xf32>
    %90 = arith.addf %88, %89 : vector<2x32xf32>
    %91 = arith.negf %90 : vector<2x32xf32>
    %92 = math.exp %91 : vector<2x32xf32>
    %cst_24 = arith.constant 1.000000e+00 : f32
    %93 = vector.broadcast %cst_24 : f32 to vector<2x32xf32>
    %94 = arith.addf %93, %92 : vector<2x32xf32>
    %95 = arith.divf %93, %94 : vector<2x32xf32>
    %96 = vector.extract_strided_slice %76 {offsets = [0, 64], sizes = [2, 32], strides = [1, 1]} : vector<2x96xf32> to vector<2x32xf32>
    %97 = vector.extract_strided_slice %79 {offsets = [0, 64], sizes = [2, 32], strides = [1, 1]} : vector<2x96xf32> to vector<2x32xf32>
    %98 = arith.mulf %87, %97 : vector<2x32xf32>
    %99 = arith.addf %96, %98 : vector<2x32xf32>
    %100 = math.tanh %99 : vector<2x32xf32>
    %cst_25 = arith.constant 1.000000e+00 : f32
    %101 = vector.broadcast %cst_25 : f32 to vector<2x32xf32>
    %102 = arith.subf %101, %95 : vector<2x32xf32>
    %103 = arith.mulf %102, %100 : vector<2x32xf32>
    %104 = arith.mulf %95, %37 : vector<2x32xf32>
    %105 = arith.addf %103, %104 : vector<2x32xf32>
    %106 = vector.extract_strided_slice %75 {offsets = [0, 96], sizes = [2, 96], strides = [1, 1]} : vector<2x192xf32> to vector<2x96xf32>
    %cst_26 = arith.constant dense<0.000000e+00> : vector<2x96xf32>
    %107 = tpu.matmul %67, %1, %cst_26 {dimension_numbers = #tpu.dot_dimension_numbers<[1], [0], [0], [1], [0, 0, 1, 1], [], []>} : vector<2x32xf32>, vector<32x96xf32>, vector<2x96xf32> -> vector<2x96xf32>
    %108 = vector.broadcast %3 : vector<1x96xf32> to vector<2x96xf32>
    %109 = arith.addf %107, %108 : vector<2x96xf32>
    %110 = vector.extract_strided_slice %106 {offsets = [0, 0], sizes = [2, 32], strides = [1, 1]} : vector<2x96xf32> to vector<2x32xf32>
    %111 = vector.extract_strided_slice %109 {offsets = [0, 0], sizes = [2, 32], strides = [1, 1]} : vector<2x96xf32> to vector<2x32xf32>
    %112 = arith.addf %110, %111 : vector<2x32xf32>
    %113 = arith.negf %112 : vector<2x32xf32>
    %114 = math.exp %113 : vector<2x32xf32>
    %cst_27 = arith.constant 1.000000e+00 : f32
    %115 = vector.broadcast %cst_27 : f32 to vector<2x32xf32>
    %116 = arith.addf %115, %114 : vector<2x32xf32>
    %117 = arith.divf %115, %116 : vector<2x32xf32>
    %118 = vector.extract_strided_slice %106 {offsets = [0, 32], sizes = [2, 32], strides = [1, 1]} : vector<2x96xf32> to vector<2x32xf32>
    %119 = vector.extract_strided_slice %109 {offsets = [0, 32], sizes = [2, 32], strides = [1, 1]} : vector<2x96xf32> to vector<2x32xf32>
    %120 = arith.addf %118, %119 : vector<2x32xf32>
    %121 = arith.negf %120 : vector<2x32xf32>
    %122 = math.exp %121 : vector<2x32xf32>
    %cst_28 = arith.constant 1.000000e+00 : f32
    %123 = vector.broadcast %cst_28 : f32 to vector<2x32xf32>
    %124 = arith.addf %123, %122 : vector<2x32xf32>
    %125 = arith.divf %123, %124 : vector<2x32xf32>
    %126 = vector.extract_strided_slice %106 {offsets = [0, 64], sizes = [2, 32], strides = [1, 1]} : vector<2x96xf32> to vector<2x32xf32>
    %127 = vector.extract_strided_slice %109 {offsets = [0, 64], sizes = [2, 32], strides = [1, 1]} : vector<2x96xf32> to vector<2x32xf32>
    %128 = arith.mulf %117, %127 : vector<2x32xf32>
    %129 = arith.addf %126, %128 : vector<2x32xf32>
    %130 = math.tanh %129 : vector<2x32xf32>
    %cst_29 = arith.constant 1.000000e+00 : f32
    %131 = vector.broadcast %cst_29 : f32 to vector<2x32xf32>
    %132 = arith.subf %131, %125 : vector<2x32xf32>
    %133 = arith.mulf %132, %130 : vector<2x32xf32>
    %134 = arith.mulf %125, %67 : vector<2x32xf32>
    %135 = arith.addf %133, %134 : vector<2x32xf32>
    %136 = tpu.concatenate %105, %135 in 1 : vector<2x32xf32>, vector<2x32xf32> -> vector<2x64xf32>
    %137 = arith.index_cast %c1_i32 : i32 to index
    %c0_30 = arith.constant 0 : index
    %c0_31 = arith.constant 0 : index
    %138 = vector.load %arg6[%137, %c0_30, %c0_31] : memref<3x2x64xf32, #tpu.memory_space<vmem>>, vector<1x2x64xf32>
    %139 = vector.shape_cast %138 : vector<1x2x64xf32> to vector<2x64xf32>
    %140 = vector.shape_cast %136 : vector<2x64xf32> to vector<1x2x64xf32>
    tpu.vector_store %arg6[%137, %c0_30, %c0_31], %140 {strides = array<i32>} : memref<3x2x64xf32, #tpu.memory_space<vmem>>, vector<1x2x64xf32>,
    %c2_i32 = arith.constant 2 : i32
    %141 = arith.index_cast %c2_i32 : i32 to index
    %c0_32 = arith.constant 0 : index
    %c0_33 = arith.constant 0 : index
    %142 = vector.load %arg0[%141, %c0_32, %c0_33] : memref<3x2x192xf32, #tpu.memory_space<vmem>>, vector<1x2x192xf32>
    %143 = vector.shape_cast %142 : vector<1x2x192xf32> to vector<2x192xf32>
    %144 = vector.extract_strided_slice %143 {offsets = [0, 0], sizes = [2, 96], strides = [1, 1]} : vector<2x192xf32> to vector<2x96xf32>
    %cst_34 = arith.constant dense<0.000000e+00> : vector<2x96xf32>
    %145 = tpu.matmul %105, %0, %cst_34 {dimension_numbers = #tpu.dot_dimension_numbers<[1], [0], [0], [1], [0, 0, 1, 1], [], []>} : vector<2x32xf32>, vector<32x96xf32>, vector<2x96xf32> -> vector<2x96xf32>
    %146 = vector.broadcast %2 : vector<1x96xf32> to vector<2x96xf32>
    %147 = arith.addf %145, %146 : vector<2x96xf32>
    %148 = vector.extract_strided_slice %144 {offsets = [0, 0], sizes = [2, 32], strides = [1, 1]} : vector<2x96xf32> to vector<2x32xf32>
    %149 = vector.extract_strided_slice %147 {offsets = [0, 0], sizes = [2, 32], strides = [1, 1]} : vector<2x96xf32> to vector<2x32xf32>
    %150 = arith.addf %148, %149 : vector<2x32xf32>
    %151 = arith.negf %150 : vector<2x32xf32>
    %152 = math.exp %151 : vector<2x32xf32>
    %cst_35 = arith.constant 1.000000e+00 : f32
    %153 = vector.broadcast %cst_35 : f32 to vector<2x32xf32>
    %154 = arith.addf %153, %152 : vector<2x32xf32>
    %155 = arith.divf %153, %154 : vector<2x32xf32>
    %156 = vector.extract_strided_slice %144 {offsets = [0, 32], sizes = [2, 32], strides = [1, 1]} : vector<2x96xf32> to vector<2x32xf32>
    %157 = vector.extract_strided_slice %147 {offsets = [0, 32], sizes = [2, 32], strides = [1, 1]} : vector<2x96xf32> to vector<2x32xf32>
    %158 = arith.addf %156, %157 : vector<2x32xf32>
    %159 = arith.negf %158 : vector<2x32xf32>
    %160 = math.exp %159 : vector<2x32xf32>
    %cst_36 = arith.constant 1.000000e+00 : f32
    %161 = vector.broadcast %cst_36 : f32 to vector<2x32xf32>
    %162 = arith.addf %161, %160 : vector<2x32xf32>
    %163 = arith.divf %161, %162 : vector<2x32xf32>
    %164 = vector.extract_strided_slice %144 {offsets = [0, 64], sizes = [2, 32], strides = [1, 1]} : vector<2x96xf32> to vector<2x32xf32>
    %165 = vector.extract_strided_slice %147 {offsets = [0, 64], sizes = [2, 32], strides = [1, 1]} : vector<2x96xf32> to vector<2x32xf32>
    %166 = arith.mulf %155, %165 : vector<2x32xf32>
    %167 = arith.addf %164, %166 : vector<2x32xf32>
    %168 = math.tanh %167 : vector<2x32xf32>
    %cst_37 = arith.constant 1.000000e+00 : f32
    %169 = vector.broadcast %cst_37 : f32 to vector<2x32xf32>
    %170 = arith.subf %169, %163 : vector<2x32xf32>
    %171 = arith.mulf %170, %168 : vector<2x32xf32>
    %172 = arith.mulf %163, %105 : vector<2x32xf32>
    %173 = arith.addf %171, %172 : vector<2x32xf32>
    %174 = vector.extract_strided_slice %143 {offsets = [0, 96], sizes = [2, 96], strides = [1, 1]} : vector<2x192xf32> to vector<2x96xf32>
    %cst_38 = arith.constant dense<0.000000e+00> : vector<2x96xf32>
    %175 = tpu.matmul %135, %1, %cst_38 {dimension_numbers = #tpu.dot_dimension_numbers<[1], [0], [0], [1], [0, 0, 1, 1], [], []>} : vector<2x32xf32>, vector<32x96xf32>, vector<2x96xf32> -> vector<2x96xf32>
    %176 = vector.broadcast %3 : vector<1x96xf32> to vector<2x96xf32>
    %177 = arith.addf %175, %176 : vector<2x96xf32>
    %178 = vector.extract_strided_slice %174 {offsets = [0, 0], sizes = [2, 32], strides = [1, 1]} : vector<2x96xf32> to vector<2x32xf32>
    %179 = vector.extract_strided_slice %177 {offsets = [0, 0], sizes = [2, 32], strides = [1, 1]} : vector<2x96xf32> to vector<2x32xf32>
    %180 = arith.addf %178, %179 : vector<2x32xf32>
    %181 = arith.negf %180 : vector<2x32xf32>
    %182 = math.exp %181 : vector<2x32xf32>
    %cst_39 = arith.constant 1.000000e+00 : f32
    %183 = vector.broadcast %cst_39 : f32 to vector<2x32xf32>
    %184 = arith.addf %183, %182 : vector<2x32xf32>
    %185 = arith.divf %183, %184 : vector<2x32xf32>
    %186 = vector.extract_strided_slice %174 {offsets = [0, 32], sizes = [2, 32], strides = [1, 1]} : vector<2x96xf32> to vector<2x32xf32>
    %187 = vector.extract_strided_slice %177 {offsets = [0, 32], sizes = [2, 32], strides = [1, 1]} : vector<2x96xf32> to vector<2x32xf32>
    %188 = arith.addf %186, %187 : vector<2x32xf32>
    %189 = arith.negf %188 : vector<2x32xf32>
    %190 = math.exp %189 : vector<2x32xf32>
    %cst_40 = arith.constant 1.000000e+00 : f32
    %191 = vector.broadcast %cst_40 : f32 to vector<2x32xf32>
    %192 = arith.addf %191, %190 : vector<2x32xf32>
    %193 = arith.divf %191, %192 : vector<2x32xf32>
    %194 = vector.extract_strided_slice %174 {offsets = [0, 64], sizes = [2, 32], strides = [1, 1]} : vector<2x96xf32> to vector<2x32xf32>
    %195 = vector.extract_strided_slice %177 {offsets = [0, 64], sizes = [2, 32], strides = [1, 1]} : vector<2x96xf32> to vector<2x32xf32>
    %196 = arith.mulf %185, %195 : vector<2x32xf32>
    %197 = arith.addf %194, %196 : vector<2x32xf32>
    %198 = math.tanh %197 : vector<2x32xf32>
    %cst_41 = arith.constant 1.000000e+00 : f32
    %199 = vector.broadcast %cst_41 : f32 to vector<2x32xf32>
    %200 = arith.subf %199, %193 : vector<2x32xf32>
    %201 = arith.mulf %200, %198 : vector<2x32xf32>
    %202 = arith.mulf %193, %135 : vector<2x32xf32>
    %203 = arith.addf %201, %202 : vector<2x32xf32>
    %204 = tpu.concatenate %173, %203 in 1 : vector<2x32xf32>, vector<2x32xf32> -> vector<2x64xf32>
    %205 = arith.index_cast %c2_i32 : i32 to index
    %c0_42 = arith.constant 0 : index
    %c0_43 = arith.constant 0 : index
    %206 = vector.load %arg6[%205, %c0_42, %c0_43] : memref<3x2x64xf32, #tpu.memory_space<vmem>>, vector<1x2x64xf32>
    %207 = vector.shape_cast %206 : vector<1x2x64xf32> to vector<2x64xf32>
    %208 = vector.shape_cast %204 : vector<2x64xf32> to vector<1x2x64xf32>
    tpu.vector_store %arg6[%205, %c0_42, %c0_43], %208 {strides = array<i32>} : memref<3x2x64xf32, #tpu.memory_space<vmem>>, vector<1x2x64xf32>,
    %c3_i32 = arith.constant 3 : i32
    return
  }
}

</mosaic_0001>

<bundles_post_ra>
// kernel: toulmin_gru_forward.3
= control target key start
LH: loop header
LB: loop body
LE: loop exit
PB: predicated region body
PF: predicated region fallthrough
CT: control target
= control target key end

     0   :  { %v1017_v0 = vmov 0.0|0.0   ;;  %vm1018_vm0 = vmmov 0   ;;  %v1019_v4 = vmov 0.0   ;;  %vm41_vm1 = vcmask 261120   ;;  %s1022_s18 = smov 96   ;;  %s1023_s19 = smov 32   ;;  %s1251_s2 = inlined_call_operand.vmem [shape: f32[32,96], index: 2, kind: input, shape index: {}]   ;;  %s1252_s1 = inlined_call_operand.vmem [shape: f32[2,32], index: 1, kind: input, shape index: {}]   ;;  %s1253_s3 = inlined_call_operand.vmem [shape: f32[32,96], index: 3, kind: input, shape index: {}]   ;;  %s1254_s4 = inlined_call_operand.vmem [shape: f32[1,96], index: 4, kind: input, shape index: {}]   ;;  %s1255_s0 = inlined_call_operand.vmem [shape: f32[3,2,192], index: 0, kind: input, shape index: {}]   ;;  %s1256_s5 = inlined_call_operand.vmem [shape: f32[1,96], index: 5, kind: input, shape index: {}]   ;;  %s1257_s6 = inlined_call_operand.vmem [shape: f32[3,2,64], index: 6, kind: output, shape index: {}]  }
   0x1   :  { %926 = vmatprep.subr.bf16.mxu0 %v1017_v0  ;;  %v23_v1 = vld [vmem:[%s1251_s2] sm:$0xff]  ;;  %v24_v2 = vld [vmem:[%s1251_s2 + $0x8] sm:$0xff]  ;;  %v25_v3 = vld [vmem:[%s1251_s2 + $0x10] sm:$0xff]  ;;  %868 = vmatprep.mubr.msk.f32.mxu0 %vm1018_vm0, %v1019_v4  ;;  %v1020_v9 = vmov 1983009808   ;;  %v126_v11 = vlaneseq  ;;  %vm303_vm2 = vcmask 517120  }
   0x2   :  { %v1071_v5 = vpack.c.bf16 %v24_v2, %v23_v1  ;;  %v26_v6 = vld [vmem:[%s1251_s2 + $0x18] sm:$0xff]  ;;  %932 = vmatprep.subr.bf16.mxu1 %v1017_v0  ;;  %879 = vmatprep.mubr.msk.f32.mxu1 %vm1018_vm0, %v1019_v4  ;;  %v1087_v8 = vld [vmem:[%s1252_s1] sm:$0x3]  ;;  %v124_v10 = vunpack.c.l.s4 %v1020_v9  ;;  %v28_v15 = vld [vmem:[%s1253_s3 + $0x8] sm:$0xff] }
   0x3   :  { %v1080_v7 = vpack.c.bf16 %v26_v6, %v25_v3  ;;  %v127_v13 = vshrl.u32 %v126_v11, 7  ;;  %v27_v14 = vld [vmem:[%s1253_s3] sm:$0xff]  ;;  %v29_v16 = vld [vmem:[%s1253_s3 + $0x10] sm:$0xff]  ;;  %v30_v18 = vld [vmem:[%s1253_s3 + $0x18] sm:$0xff]  ;;  %s1021_s3 = smov 64  }
   0x4   :  { %928 = vmatpush3.bf16.msra.mxu0 %v1071_v5  ;;  %v125_v12 = vunpack.c.0.s8 %v124_v10  ;;  %v1107_v17 = vpack.c.bf16 %v28_v15, %v27_v14  ;;  %v1115_v19 = vld [vmem:[%s1254_s4] ss:$0 sm:$0xff]  ;;  %v1118_v20 = vpack.c.bf16 %v30_v18, %v29_v16  ;;  %v816_v16 = vld [vmem:[%s1255_s0 + $0x4] sm:$0xf] }
   0x5   :  { %929 = vmatprep.subr.bf16.mxu0 %v1017_v0  ;;  %v34_v26 = vld [vmem:[%s1255_s0] sm:$0xf] }
   0x6   :  { %934 = vmatpush3.bf16.msra.mxu1 %v1107_v17  ;;  %v1120_v21 = vsub.s32 %v125_v12, %v127_v13  ;;  %v1143_v38 = vld [vmem:[%s1256_s5] ss:$0 sm:$0xff]  ;;  %v253_v59 = vrot.slane %v34_v26, 2 }
   0x7   :  { %935 = vmatprep.subr.bf16.mxu1 %v1017_v0 }
   0x8   :  { %931 = vmatpush3.bf16.msra.mxu0 %v1080_v7  ;;  %v152_v40 = vrot.slane %v1087_v8, %v1120_v21 }
   0x9   :  { %938 = vmatprep.subr.bf16.mxu0 %v1017_v0 }
   0xa   :  { %937 = vmatpush3.bf16.msra.mxu1 %v1118_v20 }
   0xb   :  { %869 = vmatmul.mubr.msk.f32.vlgmr.msra.gmra.mrb[0].mxu0 %vm41_vm1, %v1087_v8  ;;  %944 = vmatprep.subr.bf16.mxu1 %v1017_v0 }
   0xc   :  { %940 = vmatpush3.bf16.msra.mxu0 %v1071_v5  ;;  %890 = vmatprep.mubr.msk.f32.mxu0 %vm1018_vm0, %v1019_v4 }
   0xd   :  { %941 = vmatprep.subr.bf16.mxu0 %v1017_v0  ;;  %880 = vmatmul.mubr.msk.f32.vlgmr.msra.gmra.mrb[0].mxu1 %vm41_vm1, %v1087_v8 }
   0xe   :  { %946 = vmatpush3.bf16.msra.mxu1 %v1107_v17  ;;  %901 = vmatprep.mubr.msk.f32.mxu1 %vm1018_vm0, %v1019_v4 }
   0xf   :  { %947 = vmatprep.subr.bf16.mxu1 %v1017_v0 }
  0x10   :  { %943 = vmatpush3.bf16.msra.mxu0 %v1080_v7 }
  0x11   :  { %950 = vmatprep.subr.bf16.mxu0 %v1017_v0 }
  0x12   :  { %949 = vmatpush3.bf16.msra.mxu1 %v1118_v20 }
  0x13   :  { %956 = vmatprep.subr.bf16.mxu1 %v1017_v0 }
  0xde   :  { %v111_v22 = vpop.f32.mrb[0].mxu0 }
  0xdf   :  { %v112_v23 = vadd.f32 %v1115_v19, %v111_v22  ;;  %v870_v24 = vpop.f32.mrb[1].mxu0 }
  0xe0   :  { %v230_v34 = vpop.f32.mrb[0].mxu1 }
  0xe1   :  { %v129_v25 = vrot.slane %v112_v23, %v1120_v21  ;;  %v115_v27 = vadd.f32 %v112_v23, %v34_v26  ;;  %v881_v35 = vpop.f32.mrb[1].mxu1  ;;  %v231_v41 = vadd.f32 %v1143_v38, %v230_v34 }
  0xe3   :  { %130 = vrot.lane.b32.xlu0 %v129_v25, %s1021_s3  ;;  %v811_v28 = vmul.f32 -1.442695, %v115_v27  ;;  %v241_v42 = vrot.slane %v231_v41, %v1120_v21 }
  0xe5   :  { %969 = vpow2.f32 %v811_v28 }
  0xef   :  { %v970_v29 = vpop.eup %969 }
  0xf0   :  { %v119_v30 = vadd.f32 1.0, %v970_v29 }
  0xf2   :  { %971 = vrcp.f32 %v119_v30 }
  0xfc   :  { %v972_v31 = vpop.eup %971 }
  0xfd   :  { %v140_v44 = vsub.f32 1.0, %v972_v31 }
 0x155   :  { %v131_v32 = vpop.permute.xlu0 %130 }
 0x156   :  { %v133_v33 = vmul.f32 %v972_v31, %v131_v32 }
 0x158   :  { %135 = vrot.lane.b32.xlu0 %v133_v33, %s1021_s3 }
 0x1ca   :  { %v136_v36 = vpop.permute.xlu0 %135 }
 0x1cb   :  { %v138_v37 = vadd.f32 %v136_v36, %v34_v26 }
 0x1cd   :  { %973 = vtanh.f32 %v138_v37 }
 0x1d7   :  { %v974_v39 = vpop.eup %973 }
 0x1d8   :  { %142 = vrot.lane.b32.xlu1 %v974_v39, %s1022_s18 }
 0x1dc   :  { %153 = vrot.lane.b32.xlu1 %v152_v40, %s1023_s19 }
 0x1e0   :  { %242 = vrot.lane.b32.xlu1 %v241_v42, %s1022_s18 }
 0x1e4   :  { %266 = vrot.lane.b32.xlu1 %v34_v26, %s1022_s18 }
 0x24a   :  { %v143_v43 = vpop.permute.xlu1 %142 }
 0x24b   :  { %v145_v46 = vmul.f32 %v143_v43, %v140_v44 }
 0x24e   :  { %v154_v45 = vpop.permute.xlu1 %153 }
 0x24f   :  { %v156_v47 = vmul.f32 %v972_v31, %v154_v45 }
 0x251   :  { %v1153_v48 = vadd.f32 %v156_v47, %v145_v46  ;;  %v503_v46 = vrot.slane %v816_v16, 2 }
 0x252   :  { %v243_v50 = vpop.permute.xlu1 %242 }
 0x253   :  { %v287_v49 = vrot.slane %v1153_v48, %v1120_v21  ;;  %v245_v51 = vadd.f32 %v243_v50, %v34_v26  ;;  %v255_v60 = vadd.f32 %v253_v59, %v243_v50 }
 0x255   :  { %288 = vrot.lane.b32.xlu0 %v287_v49, %s1022_s18  ;;  %v814_v52 = vmul.f32 -1.442695, %v245_v51  ;;  %v815_v61 = vmul.f32 -1.442695, %v255_v60 }
 0x256   :  { %v267_v1 = vpop.permute.xlu1 %266 }
 0x257   :  { %975 = vpow2.f32 %v814_v52  ;;  %v268_v2 = vrot.slane %v267_v1, 2 }
 0x259   :  { %262 = vrot.lane.b32.xlu0 %v241_v42, %s1023_s19 }
 0x261   :  { %v976_v53 = vpop.eup %975 }
 0x262   :  { %v249_v54 = vadd.f32 1.0, %v976_v53 }
 0x264   :  { %977 = vrcp.f32 %v249_v54 }
 0x265   :  { %979 = vpow2.f32 %v815_v61 }
 0x26e   :  { %v978_v56 = vpop.eup %977 }
 0x26f   :  { %v980_v62 = vpop.eup %979 }
 0x270   :  { %v259_v63 = vadd.f32 1.0, %v980_v62 }
 0x272   :  { %981 = vrcp.f32 %v259_v63 }
 0x27c   :  { %v982_v6 = vpop.eup %981 }
 0x27d   :  { %v276_v9 = vsub.f32 1.0, %v982_v6  ;;  %v278_v10 = vmul.f32 %v982_v6, %v1087_v8 }
 0x2c7   :  { %v1159_v55 = vpop.permute.xlu0 %288 }
 0x2c8   :  { %891 = vmatmul.mubr.msk.f32.vlgmr.msra.gmra.mrb[2].mxu0 %vm41_vm1, %v1159_v55 }
 0x2c9   :  { %952 = vmatpush3.bf16.msra.mxu0 %v1071_v5  ;;  %912 = vmatprep.mubr.msk.f32.mxu0 %vm1018_vm0, %v1019_v4 }
 0x2ca   :  { %953 = vmatprep.subr.bf16.mxu0 %v1017_v0 }
 0x2cb   :  { %v263_v57 = vpop.permute.xlu0 %262 }
 0x2cc   :  { %v265_v58 = vmul.f32 %v978_v56, %v263_v57 }
 0x2cd   :  { %955 = vmatpush3.bf16.msra.mxu0 %v1080_v7 }
 0x2ce   :  { %271 = vrot.lane.b32.xlu0 %v265_v58, %s1023_s19 }
 0x340   :  { %v272_v3 = vpop.permute.xlu0 %271 }
 0x341   :  { %v274_v5 = vadd.f32 %v272_v3, %v268_v2 }
 0x343   :  { %983 = vtanh.f32 %v274_v5 }
 0x34d   :  { %v984_v11 = vpop.eup %983 }
 0x34e   :  { %v277_v7 = vmul.f32 %v984_v11, %v276_v9  ;;  %v823_v11 = vld [vmem:[%s1255_s0 + $0x8] sm:$0xf] }
 0x350   :  { %v1170_v12 = vadd.f32 %v278_v10, %v277_v7 }
 0x352   :  { %902 = vmatmul.mubr.msk.f32.vlgmr.msra.gmra.mrb[2].mxu1 %vm41_vm1, %v1170_v12 }
 0x353   :  { %958 = vmatpush3.bf16.msra.mxu1 %v1107_v17  ;;  %923 = vmatprep.mubr.msk.f32.mxu1 %vm1018_vm0, %v1019_v4 }
 0x354   :  { %959 = vmatprep.subr.bf16.mxu1 %v1017_v0 }
 0x357   :  { %961 = vmatpush3.bf16.msra.mxu1 %v1118_v20 }
 0x39b   :  { %v375_v13 = vpop.f32.mrb[2].mxu0 }
 0x39c   :  { %v376_v14 = vadd.f32 %v1115_v19, %v375_v13  ;;  %v892_v8 = vpop.f32.mrb[3].mxu0 }
 0x39e   :  { %v393_v15 = vrot.slane %v376_v14, %v1120_v21  ;;  %v379_v17 = vadd.f32 %v816_v16, %v376_v14 }
 0x3a0   :  { %394 = vrot.lane.b32.xlu1 %v393_v15, %s1021_s3  ;;  %v818_v18 = vmul.f32 -1.442695, %v379_v17 }
 0x3a2   :  { %985 = vpow2.f32 %v818_v18 }
 0x3ac   :  { %v986_v4 = vpop.eup %985 }
 0x3ad   :  { %v383_v22 = vadd.f32 1.0, %v986_v4 }
 0x3af   :  { %987 = vrcp.f32 %v383_v22 }
 0x3b9   :  { %v988_v0 = vpop.eup %987 }
 0x3ba   :  { %v404_v36 = vsub.f32 1.0, %v988_v0  ;;  %v410_v39 = vmul.f32 %v988_v0, %v1153_v48 }
 0x412   :  { %v395_v20 = vpop.permute.xlu1 %394 }
 0x413   :  { %v397_v23 = vmul.f32 %v988_v0, %v395_v20 }
 0x415   :  { %399 = vrot.lane.b32.xlu0 %v397_v23, %s1021_s3 }
 0x425   :  { %v480_v24 = vpop.f32.mrb[2].mxu1 }
 0x426   :  { %v481_v25 = vadd.f32 %v1143_v38, %v480_v24  ;;  %v903_v26 = vpop.f32.mrb[3].mxu1  ;;  %v298_v24 = vrot.slane %v1170_v12, %v1120_v21 }
 0x428   :  { %v491_v27 = vrot.slane %v481_v25, %v1120_v21 }
 0x42a   :  { %492 = vrot.lane.b32.xlu1 %v491_v27, %s1022_s18 }
 0x42e   :  { %512 = vrot.lane.b32.xlu1 %v491_v27, %s1023_s19 }
 0x432   :  { %516 = vrot.lane.b32.xlu1 %v816_v16, %s1022_s18 }
 0x487   :  { %v400_v28 = vpop.permute.xlu0 %399 }
 0x488   :  { %v402_v29 = vadd.f32 %v816_v16, %v400_v28 }
 0x48a   :  { %989 = vtanh.f32 %v402_v29  ;;  %v753_v29 = vrot.slane %v823_v11, 2 }
 0x494   :  { %v990_v30 = vpop.eup %989 }
 0x495   :  { %406 = vrot.lane.b32.xlu0 %v990_v30, %s1022_s18 }
 0x49c   :  { %v493_v31 = vpop.permute.xlu1 %492 }
 0x49d   :  { %v495_v32 = vadd.f32 %v816_v16, %v493_v31  ;;  %v505_v47 = vadd.f32 %v503_v46, %v493_v31 }
 0x49f   :  { %v820_v33 = vmul.f32 -1.442695, %v495_v32  ;;  %v821_v49 = vmul.f32 -1.442695, %v505_v47 }
 0x4a0   :  { %v513_v44 = vpop.permute.xlu1 %512 }
 0x4a1   :  { %991 = vpow2.f32 %v820_v33 }
 0x4a4   :  { %v517_v51 = vpop.permute.xlu1 %516 }
 0x4a5   :  { %v518_v53 = vrot.slane %v517_v51, 2 }
 0x4ab   :  { %v992_v34 = vpop.eup %991 }
 0x4ac   :  { %v499_v35 = vadd.f32 1.0, %v992_v34 }
 0x4ae   :  { %993 = vrcp.f32 %v499_v35 }
 0x4af   :  { %995 = vpow2.f32 %v821_v49 }
 0x4b8   :  { %v994_v43 = vpop.eup %993 }
 0x4b9   :  { %v515_v45 = vmul.f32 %v994_v43, %v513_v44  ;;  %v996_v50 = vpop.eup %995 }
 0x4ba   :  { %v509_v52 = vadd.f32 1.0, %v996_v50 }
 0x4bc   :  { %997 = vrcp.f32 %v509_v52 }
 0x4c6   :  { %v998_v57 = vpop.eup %997 }
 0x4c7   :  { %v526_v58 = vsub.f32 1.0, %v998_v57  ;;  %v528_v61 = vmul.f32 %v998_v57, %v1170_v12 }
 0x507   :  { %v407_v37 = vpop.permute.xlu0 %406 }
 0x508   :  { %v409_v40 = vmul.f32 %v407_v37, %v404_v36 }
 0x50a   :  { %v1193_v41 = vadd.f32 %v410_v39, %v409_v40 }
 0x50c   :  { %v537_v42 = vrot.slane %v1193_v41, %v1120_v21 }
 0x50e   :  { %538 = vrot.lane.b32.xlu0 %v537_v42, %s1022_s18 }
 0x512   :  { %521 = vrot.lane.b32.xlu0 %v515_v45, %s1023_s19 }
 0x580   :  { %v1199_v48 = vpop.permute.xlu0 %538 }
 0x581   :  { %913 = vmatmul.mubr.msk.f32.vlgmr.msra.gmra.mrb[4].mxu0 %vm41_vm1, %v1199_v48 }
 0x584   :  { %v522_v54 = vpop.permute.xlu0 %521 }
 0x585   :  { %v524_v56 = vadd.f32 %v522_v54, %v518_v53 }
 0x587   :  { %999 = vtanh.f32 %v524_v56 }
 0x591   :  { %v1000_v59 = vpop.eup %999 }
 0x592   :  { %v527_v60 = vmul.f32 %v1000_v59, %v526_v58 }
 0x594   :  { %v1204_v62 = vadd.f32 %v528_v61, %v527_v60 }
 0x596   :  { %924 = vmatmul.mubr.msk.f32.vlgmr.msra.gmra.mrb[4].mxu1 %vm41_vm1, %v1204_v62  ;;  %v548_v28 = vrot.slane %v1204_v62, %v1120_v21 }
 0x654   :  { %v625_v63 = vpop.f32.mrb[4].mxu0 }
 0x655   :  { %v626_v1 = vadd.f32 %v1115_v19, %v625_v63  ;;  %v914_v2 = vpop.f32.mrb[5].mxu0 }
 0x657   :  { %v643_v3 = vrot.slane %v626_v1, %v1120_v21  ;;  %v629_v19 = vadd.f32 %v823_v11, %v626_v1 }
 0x659   :  { %644 = vrot.lane.b32.xlu1 %v643_v3, %s1021_s3  ;;  %v825_v7 = vmul.f32 -1.442695, %v629_v19 }
 0x65b   :  { %1001 = vpow2.f32 %v825_v7 }
 0x665   :  { %v1002_v13 = vpop.eup %1001 }
 0x666   :  { %v633_v14 = vadd.f32 1.0, %v1002_v13 }
 0x668   :  { %1003 = vrcp.f32 %v633_v14 }
 0x669   :  { %v730_v5 = vpop.f32.mrb[4].mxu1 }
 0x66a   :  { %v731_v6 = vadd.f32 %v1143_v38, %v730_v5  ;;  %v925_v9 = vpop.f32.mrb[5].mxu1 }
 0x66c   :  { %v741_v10 = vrot.slane %v731_v6, %v1120_v21 }
 0x66e   :  { %762 = vrot.lane.b32.xlu1 %v741_v10, %s1023_s19  ;;  %742 = vrot.lane.b32.xlu0 %v741_v10, %s1022_s18 }
 0x672   :  { %766 = vrot.lane.b32.xlu1 %v823_v11, %s1022_s18  ;;  %v1004_v38 = vpop.eup %1003 }
 0x673   :  { %v654_v49 = vsub.f32 1.0, %v1004_v38 }
 0x6cb   :  { %v645_v8 = vpop.permute.xlu1 %644 }
 0x6cc   :  { %v647_v15 = vmul.f32 %v1004_v38, %v645_v8 }
 0x6ce   :  { %649 = vrot.lane.b32.xlu0 %v647_v15, %s1021_s3 }
 0x6e0   :  { %v743_v16 = vpop.permute.xlu0 %742  ;;  %v763_v20 = vpop.permute.xlu1 %762 }
 0x6e1   :  { %v745_v17 = vadd.f32 %v823_v11, %v743_v16  ;;  %v755_v30 = vadd.f32 %v753_v29, %v743_v16 }
 0x6e3   :  { %v827_v18 = vmul.f32 -1.442695, %v745_v17  ;;  %v828_v31 = vmul.f32 -1.442695, %v755_v30 }
 0x6e4   :  { %v767_v33 = vpop.permute.xlu1 %766 }
 0x6e5   :  { %1005 = vpow2.f32 %v827_v18  ;;  %v768_v34 = vrot.slane %v767_v33, 2 }
 0x6ef   :  { %v1006_v4 = vpop.eup %1005 }
 0x6f0   :  { %v749_v22 = vadd.f32 1.0, %v1006_v4 }
 0x6f2   :  { %1007 = vrcp.f32 %v749_v22 }
 0x6fc   :  { %v1008_v0 = vpop.eup %1007 }
 0x6fd   :  { %v765_v23 = vmul.f32 %v1008_v0, %v763_v20 }
 0x6ff   :  { %771 = vrot.lane.b32.xlu0 %v765_v23, %s1023_s19 }
 0x703   :  { %299 = vrot.lane.b32.xlu0 %v298_v24, %s1023_s19 }
 0x740   :  { %v650_v25 = vpop.permute.xlu0 %649 }
 0x741   :  { %v652_v26 = vadd.f32 %v823_v11, %v650_v25 }
 0x743   :  { %1009 = vtanh.f32 %v652_v26 }
 0x744   :  { %1011 = vpow2.f32 %v828_v31 }
 0x74d   :  { %v1010_v27 = vpop.eup %1009 }
 0x74e   :  { %656 = vrot.lane.b32.xlu1 %v1010_v27, %s1022_s18  ;;  %v1012_v32 = vpop.eup %1011 }
 0x74f   :  { %v759_v12 = vadd.f32 1.0, %v1012_v32 }
 0x751   :  { %1013 = vrcp.f32 %v759_v12 }
 0x752   :  { %549 = vrot.lane.b32.xlu1 %v548_v28, %s1023_s19 }
 0x75b   :  { %v1014_v40 = vpop.eup %1013 }
 0x75c   :  { %v776_v42 = vsub.f32 1.0, %v1014_v40  ;;  %v778_v45 = vmul.f32 %v1014_v40, %v1204_v62 }
 0x771   :  { %v772_v35 = vpop.permute.xlu0 %771 }
 0x772   :  { %v774_v36 = vadd.f32 %v772_v35, %v768_v34 }
 0x774   :  { %1015 = vtanh.f32 %v774_v36 }
 0x775   :  { %v300_v37 = vpop.permute.xlu0 %299 }
 0x776   :  { %v302_v39 = vsel %vm41_vm1, %v1159_v55, %v300_v37  ;;  %v660_v55 = vmul.f32 %v1004_v38, %v1193_v41 }
 0x777   :  { %304 = vst.msk [vmem:[%s1257_s6] sm:$0x3] %vm303_vm2, %v302_v39 }
 0x77e   :  { %v1016_v43 = vpop.eup %1015 }
 0x77f   :  { %v777_v44 = vmul.f32 %v1016_v43, %v776_v42 }
 0x781   :  { %v779_v46 = vadd.f32 %v778_v45, %v777_v44 }
 0x783   :  { %v798_v47 = vrot.slane %v779_v46, %v1120_v21 }
 0x785   :  { %799 = vrot.lane.b32.xlu1 %v798_v47, %s1023_s19 }
 0x7c0   :  { %v657_v50 = vpop.permute.xlu1 %656 }
 0x7c1   :  { %v659_v51 = vmul.f32 %v657_v50, %v654_v49 }
 0x7c3   :  { %v661_v52 = vadd.f32 %v660_v55, %v659_v51 }
 0x7c4   :  { %v550_v53 = vpop.permute.xlu1 %549 }
 0x7c5   :  { %v552_v54 = vsel %vm41_vm1, %v1199_v48, %v550_v53  ;;  %v787_v56 = vrot.slane %v661_v52, %v1120_v21 }
 0x7c6   :  { %822 = vst.msk [vmem:[%s1257_s6 + $0x2] sm:$0x3] %vm303_vm2, %v552_v54 }
 0x7c7   :  { %788 = vrot.lane.b32.xlu0 %v787_v56, %s1022_s18 }
 0x7f7   :  { %v800_v57 = vpop.permute.xlu1 %799 }
 0x839   :  { %v789_v58 = vpop.permute.xlu0 %788 }
 0x83a   :  { %v802_v59 = vsel %vm41_vm1, %v789_v58, %v800_v57 }
 0x83b   :  { %829 = vst.msk [vmem:[%s1257_s6 + $0x4] sm:$0x3] %vm303_vm2, %v802_v59 }

// kernel: toulmin_gru_forward.2
= control target key start
LH: loop header
LB: loop body
LE: loop exit
PB: predicated region body
PF: predicated region fallthrough
CT: control target
= control target key end

     0   :  { %v7692_v3 = vmov 0.0   ;;  %vm463_vm0 = vcmask 1043456   ;;  %vm4426_vm1 = vmmov 1   ;;  %v7729_v30 = vmov 0  ;;  %s4427_s23 = smov 44   ;;  %s4428_s30 = smov 60   ;;  %s7681_s1 = inlined_call_operand.vmem [shape: f32[300,1200], index: 1, kind: input, shape index: {}]   ;;  %s7682_s0 = inlined_call_operand.vmem [shape: f32[8,8,300], index: 0, kind: input, shape index: {}]   ;;  %s7683_s3 = inlined_call_operand.vmem [shape: f32[1,100], index: 3, kind: input, shape index: {}]   ;;  %s7684_s4 = inlined_call_operand.vmem [shape: f32[1,100], index: 4, kind: input, shape index: {}]   ;;  %s7685_s5 = inlined_call_operand.vmem [shape: f32[300,300], index: 5, kind: input, shape index: {}]   ;;  %s7686_s2 = inlined_call_operand.vmem [shape: f32[1,100], index: 2, kind: input, shape index: {}]   ;;  %s7687_s7 = inlined_call_operand.vmem [shape: f32[300,192], index: 7, kind: input, shape index: {}]   ;;  %s7688_s9 = inlined_call_operand.vmem [shape: f32[8,300], index: 9, kind: output, shape index: {0}]   ;;  %s7689_s6 = inlined_call_operand.vmem [shape: f32[1,300], index: 6, kind: input, shape index: {}]   ;;  %s7690_s8 = inlined_call_operand.vmem [shape: f32[1,192], index: 8, kind: input, shape index: {}]   ;;  %s7691_s10 = inlined_call_operand.vmem [shape: f32[8,192], index: 10, kind: output, shape index: {1}]  }
   0x1   :  { %v59_v0 = vld [vmem:[%s7681_s1 + $0x8] sm:$0xff]  ;;  %v69_v1 = vld [vmem:[%s7681_s1 + $0x58] sm:$0xff]  ;;  %671 = vmatprep.mubr.f32.mxu1 %v7692_v3  ;;  %v58_v6 = vld [vmem:[%s7681_s1] sm:$0xff]  ;;  %vm438_vm3 = vcmask 359424   ;;  %s4432_s11 = smov 112   ;;  %vm1777_vm4 = vcmask 457728  }
   0x2   :  { %v379_v2 = vld [vmem:[%s7681_s1 + $0xa08] sm:$0xff]  ;;  %v3715_v4 = vpack.c.bf16 %v69_v1, %v59_v0  ;;  %v389_v5 = vld [vmem:[%s7681_s1 + $0xa58] sm:$0xff]  ;;  %v68_v7 = vld [vmem:[%s7681_s1 + $0x50] sm:$0xff]  ;;  %vm2106_vm5 = vcmask 687104   ;;  %vm2196_vm6 = vcmask 126976   ;;  %vm2188_vm7 = vcmask 1044832  }
   0x3   :  { %v3779_v8 = vpack.c.bf16 %v389_v5, %v379_v2  ;;  %v3717_v9 = vpack.c.bf16 %v68_v7, %v58_v6  ;;  %v378_v10 = vld [vmem:[%s7681_s1 + $0xa00] sm:$0xff]  ;;  %v388_v11 = vld [vmem:[%s7681_s1 + $0xa50] sm:$0xff]  ;;  %v79_v12 = vld [vmem:[%s7681_s1 + $0xa8] sm:$0xff]  ;;  %vm2826_vm8 = vcmask 1041409   ;;  %vm2828_vm9 = vcmask 1042434   ;;  %s4433_s18 = smov 12  }
   0x4   :  { %3716 = vmatprep.subr.bf16.mxu0 %v3715_v4  ;;  %v3781_v13 = vpack.c.bf16 %v388_v11, %v378_v10  ;;  %v89_v14 = vld [vmem:[%s7681_s1 + $0xf8] sm:$0xff]  ;;  %v399_v15 = vld [vmem:[%s7681_s1 + $0xaa8] sm:$0xff]  ;;  %v78_v19 = vld [vmem:[%s7681_s1 + $0xa0] sm:$0xff]  ;;  %vm2830_vm10 = vcmask 1043459   ;;  %vm2832_vm11 = vcmask 1044484   ;;  %vm1696_vm12 = vcmask 228352  }
   0x5   :  { %v409_v16 = vld [vmem:[%s7681_s1 + $0xaf8] sm:$0xff]  ;;  %3780 = vmatprep.subr.bf16.mxu1 %v3779_v8  ;;  %3718 = vmatpush1.bf16.msra.mxu0 %v3717_v9  ;;  %v3719_v17 = vpack.c.bf16 %v89_v14, %v79_v12  ;;  %v88_v20 = vld [vmem:[%s7681_s1 + $0xf0] sm:$0xff]  ;;  %v398_v21 = vld [vmem:[%s7681_s1 + $0xaa0] sm:$0xff]  ;;  %vm2834_vm13 = vcmask 1045509   ;;  %vm2836_vm14 = vcmask 1046534   ;;  %vm2838_vm15 = vcmask 1047559  }
   0x6   :  { %v3783_v18 = vpack.c.bf16 %v409_v16, %v399_v15  ;;  %3782 = vmatpush1.bf16.msra.mxu1 %v3781_v13  ;;  %v3721_v22 = vpack.c.bf16 %v88_v20, %v78_v19  ;;  %v408_v23 = vld [vmem:[%s7681_s1 + $0xaf0] sm:$0xff]  ;;  %v99_v24 = vld [vmem:[%s7681_s1 + $0x148] sm:$0xff]  ;;  %v109_v25 = vld [vmem:[%s7681_s1 + $0x198] sm:$0xff] }
   0x7   :  { %3720 = vmatprep.subr.bf16.mxu0 %v3719_v17  ;;  %v3785_v26 = vpack.c.bf16 %v408_v23, %v398_v21  ;;  %v3723_v27 = vpack.c.bf16 %v109_v25, %v99_v24  ;;  %v419_v28 = vld [vmem:[%s7681_s1 + $0xb48] sm:$0xff]  ;;  %v429_v29 = vld [vmem:[%s7681_s1 + $0xb98] sm:$0xf]  ;;  %vm4553_vm2 = vmpackc.low %vm463_vm0, %vm4426_vm1  ;;  %vm2712_vm0 = vcmask 257024   ;;  %vm2622_vm1 = vcmask 916480  }
   0x8   :  { %3784 = vmatprep.subr.bf16.mxu1 %v3783_v18  ;;  %v7730_v30 = vsel %vm4553_vm2, 4294967295, %v7729_v30  ;;  %v3787_v31 = vpack.c.bf16 %v429_v29, %v419_v28  ;;  %v98_v32 = vld [vmem:[%s7681_s1 + $0x140] sm:$0xff]  ;;  %v108_v33 = vld [vmem:[%s7681_s1 + $0x190] sm:$0xff]  ;;  %v119_v37 = vld [vmem:[%s7681_s1 + $0x1e8] sm:$0xff] }
   0x9   :  { %7731 = vst [vmem:[#allocation2_spill] sm:$0xff] %v7730_v30  ;;  %v418_v34 = vld [vmem:[%s7681_s1 + $0xb40] sm:$0xff]  ;;  %3722 = vmatpush1.bf16.msra.mxu0 %v3721_v22  ;;  %v3725_v35 = vpack.c.bf16 %v108_v33, %v98_v32  ;;  %v428_v36 = vld [vmem:[%s7681_s1 + $0xb90] sm:$0xf]  ;;  %v129_v38 = vld [vmem:[%s7681_s1 + $0x238] sm:$0xff] }
   0xa   :  { %3786 = vmatpush1.bf16.msra.mxu1 %v3785_v26  ;;  %3724 = vmatprep.subr.bf16.mxu0 %v3723_v27  ;;  %v3790_v39 = vpack.c.bf16 %v428_v36, %v418_v34  ;;  %v3727_v40 = vpack.c.bf16 %v129_v38, %v119_v37  ;;  %v61_v41 = vld [vmem:[%s7681_s1 + $0x18] sm:$0xff]  ;;  %v71_v42 = vld [vmem:[%s7681_s1 + $0x68] sm:$0xff]  ;;  %v118_v44 = vld [vmem:[%s7681_s1 + $0x1e0] sm:$0xff] }
   0xb   :  { %3789 = vmatprep.subr.msk.bf16.mxu1 %vm4553_vm2, %v3787_v31  ;;  %v3793_v43 = vpack.c.bf16 %v71_v42, %v61_v41  ;;  %v128_v45 = vld [vmem:[%s7681_s1 + $0x230] sm:$0xff]  ;;  %v70_v47 = vld [vmem:[%s7681_s1 + $0x60] sm:$0xff]  ;;  %v139_v48 = vld [vmem:[%s7681_s1 + $0x288] sm:$0xff] }
   0xc   :  { %v60_v46 = vld [vmem:[%s7681_s1 + $0x10] sm:$0xff]  ;;  %v149_v49 = vld [vmem:[%s7681_s1 + $0x2d8] sm:$0xff]  ;;  %v3729_v51 = vpack.c.bf16 %v128_v45, %v118_v44  ;;  %v91_v53 = vld [vmem:[%s7681_s1 + $0x108] sm:$0xff] }
   0xd   :  { %3726 = vmatpush1.bf16.msra.mxu0 %v3725_v35  ;;  %v4604_v50 = vld [vmem:[%s7682_s0 + $0x10] sm:$0xff]  ;;  %v81_v52 = vld [vmem:[%s7681_s1 + $0xb8] sm:$0xff]  ;;  %v3795_v54 = vpack.c.bf16 %v70_v47, %v60_v46  ;;  %v3731_v55 = vpack.c.bf16 %v149_v49, %v139_v48  ;;  %v138_v56 = vld [vmem:[%s7681_s1 + $0x280] sm:$0xff] }
   0xe   :  { %3792 = vmatpush1.bf16.msk.msra.mxu1 %vm4553_vm2, %v3790_v39  ;;  %3728 = vmatprep.subr.bf16.mxu0 %v3727_v40  ;;  %v148_v57 = vld [vmem:[%s7681_s1 + $0x2d0] sm:$0xff]  ;;  %v3797_v59 = vpack.c.bf16 %v91_v53, %v81_v52  ;;  %v90_v60 = vld [vmem:[%s7681_s1 + $0x100] sm:$0xff]  ;;  %v159_v61 = vld [vmem:[%s7681_s1 + $0x328] sm:$0xff] }
   0xf   :  { %v80_v58 = vld [vmem:[%s7681_s1 + $0xb0] sm:$0xff]  ;;  %3794 = vmatprep.subr.bf16.mxu1 %v3793_v43  ;;  %v169_v62 = vld [vmem:[%s7681_s1 + $0x378] sm:$0xff]  ;;  %v111_v0 = vld [vmem:[%s7681_s1 + $0x1a8] sm:$0xff]  ;;  %v3733_v1 = vpack.c.bf16 %v148_v57, %v138_v56 }
  0x10   :  { %v101_v63 = vld [vmem:[%s7681_s1 + $0x158] sm:$0xff]  ;;  %v3799_v2 = vpack.c.bf16 %v90_v60, %v80_v58  ;;  %v3735_v4 = vpack.c.bf16 %v169_v62, %v159_v61  ;;  %v158_v5 = vld [vmem:[%s7681_s1 + $0x320] sm:$0xff]  ;;  %v168_v6 = vld [vmem:[%s7681_s1 + $0x370] sm:$0xff] }
  0x11   :  { %3599 = vmatmul.mubr.msk.f32.vlgmr.msra.gmra.mrb[0].mxu1 %vm438_vm3, %v4604_v50  ;;  %3730 = vmatpush1.bf16.msra.mxu0 %v3729_v51  ;;  %v100_v7 = vld [vmem:[%s7681_s1 + $0x150] sm:$0xff]  ;;  %v3801_v8 = vpack.c.bf16 %v111_v0, %v101_v63  ;;  %v110_v9 = vld [vmem:[%s7681_s1 + $0x1a0] sm:$0xff]  ;;  %v179_v10 = vld [vmem:[%s7681_s1 + $0x3c8] sm:$0xff]  ;;  %v3737_v14 = vpack.c.bf16 %v168_v6, %v158_v5 }
  0x12   :  { %3796 = vmatpush1.bf16.msra.mxu1 %v3795_v54  ;;  %3732 = vmatprep.subr.bf16.mxu0 %v3731_v55  ;;  %v189_v11 = vld [vmem:[%s7681_s1 + $0x418] sm:$0xff]  ;;  %v131_v13 = vld [vmem:[%s7681_s1 + $0x248] sm:$0xff]  ;;  %v3803_v15 = vpack.c.bf16 %v110_v9, %v100_v7  ;;  %v178_v17 = vld [vmem:[%s7681_s1 + $0x3c0] sm:$0xff] }
  0x13   :  { %3798 = vmatprep.subr.bf16.mxu1 %v3797_v59  ;;  %677 = vmatprep.mubr.f32.mxu1 %v7692_v3  ;;  %v121_v12 = vld [vmem:[%s7681_s1 + $0x1f8] sm:$0xff]  ;;  %v3739_v16 = vpack.c.bf16 %v189_v11, %v179_v10  ;;  %v188_v18 = vld [vmem:[%s7681_s1 + $0x410] sm:$0xff]  ;;  %v130_v21 = vld [vmem:[%s7681_s1 + $0x240] sm:$0xff] }
  0x14   :  { %v120_v19 = vld [vmem:[%s7681_s1 + $0x1f0] sm:$0xff]  ;;  %v3805_v20 = vpack.c.bf16 %v131_v13, %v121_v12  ;;  %v199_v22 = vld [vmem:[%s7681_s1 + $0x468] sm:$0xff]  ;;  %v209_v23 = vld [vmem:[%s7681_s1 + $0x4b8] sm:$0xff]  ;;  %v3741_v26 = vpack.c.bf16 %v188_v18, %v178_v17 }
  0x15   :  { %3734 = vmatpush1.bf16.msra.mxu0 %v3733_v1  ;;  %v141_v24 = vld [vmem:[%s7681_s1 + $0x298] sm:$0xff]  ;;  %v151_v25 = vld [vmem:[%s7681_s1 + $0x2e8] sm:$0xff]  ;;  %v3807_v27 = vpack.c.bf16 %v130_v21, %v120_v19  ;;  %v3743_v28 = vpack.c.bf16 %v209_v23, %v199_v22  ;;  %v198_v29 = vld [vmem:[%s7681_s1 + $0x460] sm:$0xff] }
  0x16   :  { %3800 = vmatpush1.bf16.msra.mxu1 %v3799_v2  ;;  %3736 = vmatprep.subr.bf16.mxu0 %v3735_v4  ;;  %v208_v31 = vld [vmem:[%s7681_s1 + $0x4b0] sm:$0xff]  ;;  %v3809_v33 = vpack.c.bf16 %v151_v25, %v141_v24  ;;  %v150_v34 = vld [vmem:[%s7681_s1 + $0x2e0] sm:$0xff]  ;;  %v219_v35 = vld [vmem:[%s7681_s1 + $0x508] sm:$0xff] }
  0x17   :  { %3802 = vmatprep.subr.bf16.mxu1 %v3801_v8  ;;  %v140_v32 = vld [vmem:[%s7681_s1 + $0x290] sm:$0xff]  ;;  %v229_v36 = vld [vmem:[%s7681_s1 + $0x558] sm:$0xff]  ;;  %v171_v38 = vld [vmem:[%s7681_s1 + $0x388] sm:$0xff]  ;;  %v3745_v39 = vpack.c.bf16 %v208_v31, %v198_v29 }
  0x18   :  { %v161_v37 = vld [vmem:[%s7681_s1 + $0x338] sm:$0xff]  ;;  %v3811_v40 = vpack.c.bf16 %v150_v34, %v140_v32  ;;  %v3747_v41 = vpack.c.bf16 %v229_v36, %v219_v35  ;;  %v218_v42 = vld [vmem:[%s7681_s1 + $0x500] sm:$0xff]  ;;  %v228_v43 = vld [vmem:[%s7681_s1 + $0x550] sm:$0xff] }
  0x19   :  { %3738 = vmatpush1.bf16.msra.mxu0 %v3737_v14  ;;  %v160_v44 = vld [vmem:[%s7681_s1 + $0x330] sm:$0xff]  ;;  %v3813_v45 = vpack.c.bf16 %v171_v38, %v161_v37  ;;  %v170_v46 = vld [vmem:[%s7681_s1 + $0x380] sm:$0xff]  ;;  %v239_v47 = vld [vmem:[%s7681_s1 + $0x5a8] sm:$0xff]  ;;  %v3749_v52 = vpack.c.bf16 %v228_v43, %v218_v42 }
  0x1a   :  { %3804 = vmatpush1.bf16.msra.mxu1 %v3803_v15  ;;  %3740 = vmatprep.subr.bf16.mxu0 %v3739_v16  ;;  %v249_v48 = vld [vmem:[%s7681_s1 + $0x5f8] sm:$0xff]  ;;  %v191_v51 = vld [vmem:[%s7681_s1 + $0x428] sm:$0xff]  ;;  %v3815_v54 = vpack.c.bf16 %v170_v46, %v160_v44  ;;  %v238_v56 = vld [vmem:[%s7681_s1 + $0x5a0] sm:$0xff] }
  0x1b   :  { %3806 = vmatprep.subr.bf16.mxu1 %v3805_v20  ;;  %v181_v49 = vld [vmem:[%s7681_s1 + $0x3d8] sm:$0xff]  ;;  %v4740_v53 = vld [vmem:[%s7682_s0 + $0x28] sm:$0xff]  ;;  %v3751_v55 = vpack.c.bf16 %v249_v48, %v239_v47  ;;  %v248_v57 = vld [vmem:[%s7681_s1 + $0x5f0] sm:$0xff] }
  0x1c   :  { %v180_v58 = vld [vmem:[%s7681_s1 + $0x3d0] sm:$0xff]  ;;  %v3817_v59 = vpack.c.bf16 %v191_v51, %v181_v49  ;;  %v190_v60 = vld [vmem:[%s7681_s1 + $0x420] sm:$0xff]  ;;  %v259_v61 = vld [vmem:[%s7681_s1 + $0x648] sm:$0xff]  ;;  %3600 = vmatmul.mubr.msk.f32.gmra.mrb[2].mxu1 %vm438_vm3, %v4740_v53  ;;  %v3753_v2 = vpack.c.bf16 %v248_v57, %v238_v56 }
  0x1d   :  { %3742 = vmatpush1.bf16.msra.mxu0 %v3741_v26  ;;  %v269_v62 = vld [vmem:[%s7681_s1 + $0x698] sm:$0xff]  ;;  %v211_v0 = vld [vmem:[%s7681_s1 + $0x4c8] sm:$0xff]  ;;  %683 = vmatprep.mubr.f32.mxu1 %v7692_v3  ;;  %v4772_v1 = vld [vmem:[%s7682_s0 + $0x40] sm:$0xff]  ;;  %v3819_v4 = vpack.c.bf16 %v190_v60, %v180_v58 }
  0x1e   :  { %3808 = vmatpush1.bf16.msra.mxu1 %v3807_v27  ;;  %3744 = vmatprep.subr.bf16.mxu0 %v3743_v28  ;;  %v201_v63 = vld [vmem:[%s7681_s1 + $0x478] sm:$0xff]  ;;  %v3755_v5 = vpack.c.bf16 %v269_v62, %v259_v61  ;;  %v258_v6 = vld [vmem:[%s7681_s1 + $0x640] sm:$0xff]  ;;  %v268_v7 = vld [vmem:[%s7681_s1 + $0x690] sm:$0xff] }
  0x1f   :  { %3810 = vmatprep.subr.bf16.mxu1 %v3809_v33  ;;  %v200_v8 = vld [vmem:[%s7681_s1 + $0x470] sm:$0xff]  ;;  %v3821_v9 = vpack.c.bf16 %v211_v0, %v201_v63  ;;  %v210_v10 = vld [vmem:[%s7681_s1 + $0x4c0] sm:$0xff]  ;;  %v279_v11 = vld [vmem:[%s7681_s1 + $0x6e8] sm:$0xff]  ;;  %v3757_v16 = vpack.c.bf16 %v268_v7, %v258_v6 }
  0x20   :  { %v289_v12 = vld [vmem:[%s7681_s1 + $0x738] sm:$0xff]  ;;  %3601 = vmatmul.mubr.msk.f32.gmra.mrb[4].mxu1 %vm438_vm3, %v4772_v1  ;;  %v231_v14 = vld [vmem:[%s7681_s1 + $0x568] sm:$0xff]  ;;  %v3823_v17 = vpack.c.bf16 %v210_v10, %v200_v8  ;;  %v278_v19 = vld [vmem:[%s7681_s1 + $0x6e0] sm:$0xff] }
  0x21   :  { %3746 = vmatpush1.bf16.msra.mxu0 %v3745_v39  ;;  %v221_v13 = vld [vmem:[%s7681_s1 + $0x518] sm:$0xff]  ;;  %689 = vmatprep.mubr.f32.mxu1 %v7692_v3  ;;  %v3759_v18 = vpack.c.bf16 %v289_v12, %v279_v11  ;;  %v288_v20 = vld [vmem:[%s7681_s1 + $0x730] sm:$0xff]  ;;  %v230_v23 = vld [vmem:[%s7681_s1 + $0x560] sm:$0xff] }
  0x22   :  { %3812 = vmatpush1.bf16.msra.mxu1 %v3811_v40  ;;  %3748 = vmatprep.subr.bf16.mxu0 %v3747_v41  ;;  %v4804_v15 = vld [vmem:[%s7682_s0 + $0x58] sm:$0xff]  ;;  %v220_v21 = vld [vmem:[%s7681_s1 + $0x510] sm:$0xff]  ;;  %v3825_v22 = vpack.c.bf16 %v231_v14, %v221_v13  ;;  %v299_v24 = vld [vmem:[%s7681_s1 + $0x788] sm:$0xff]  ;;  %v3761_v29 = vpack.c.bf16 %v288_v20, %v278_v19 }
  0x23   :  { %3814 = vmatprep.subr.bf16.mxu1 %v3813_v45  ;;  %v309_v25 = vld [vmem:[%s7681_s1 + $0x7d8] sm:$0xff]  ;;  %v251_v27 = vld [vmem:[%s7681_s1 + $0x608] sm:$0xff]  ;;  %v4836_v28 = vld [vmem:[%s7682_s0 + $0x70] sm:$0xff]  ;;  %v3827_v32 = vpack.c.bf16 %v230_v23, %v220_v21 }
  0x24   :  { %3602 = vmatmul.mubr.msk.f32.gmra.mrb[6].mxu1 %vm438_vm3, %v4804_v15  ;;  %v241_v26 = vld [vmem:[%s7681_s1 + $0x5b8] sm:$0xff]  ;;  %v4841_v31 = vld [vmem:[%s7682_s0 + $0x8] sm:$0xff]  ;;  %v3763_v33 = vpack.c.bf16 %v309_v25, %v299_v24  ;;  %v298_v34 = vld [vmem:[%s7681_s1 + $0x780] sm:$0xff] }
  0x25   :  { %3750 = vmatpush1.bf16.msra.mxu0 %v3749_v52  ;;  %695 = vmatprep.mubr.f32.mxu1 %v7692_v3  ;;  %v308_v35 = vld [vmem:[%s7681_s1 + $0x7d0] sm:$0xff]  ;;  %v3829_v37 = vpack.c.bf16 %v251_v27, %v241_v26  ;;  %v250_v38 = vld [vmem:[%s7681_s1 + $0x600] sm:$0xff]  ;;  %v319_v39 = vld [vmem:[%s7681_s1 + $0x828] sm:$0xff] }
  0x26   :  { %3816 = vmatpush1.bf16.msra.mxu1 %v3815_v54  ;;  %3752 = vmatprep.subr.bf16.mxu0 %v3751_v55  ;;  %v240_v36 = vld [vmem:[%s7681_s1 + $0x5b0] sm:$0xff]  ;;  %v329_v40 = vld [vmem:[%s7681_s1 + $0x878] sm:$0xff]  ;;  %v271_v42 = vld [vmem:[%s7681_s1 + $0x6a8] sm:$0xff]  ;;  %v3765_v44 = vpack.c.bf16 %v308_v35, %v298_v34 }
  0x27   :  { %3818 = vmatprep.subr.bf16.mxu1 %v3817_v59  ;;  %v261_v41 = vld [vmem:[%s7681_s1 + $0x658] sm:$0xff]  ;;  %558 = vmatprep.mubr.f32.mxu0 %v4841_v31  ;;  %v4874_v43 = vld [vmem:[%s7682_s0 + $0x88] sm:$0xff]  ;;  %v3831_v45 = vpack.c.bf16 %v250_v38, %v240_v36  ;;  %v3767_v46 = vpack.c.bf16 %v329_v40, %v319_v39  ;;  %v318_v47 = vld [vmem:[%s7681_s1 + $0x820] sm:$0xff] }
  0x28   :  { %3603 = vmatmul.mubr.msk.f32.gmra.mrb[8].mxu1 %vm438_vm3, %v4836_v28  ;;  %v328_v48 = vld [vmem:[%s7681_s1 + $0x870] sm:$0xff]  ;;  %v3833_v51 = vpack.c.bf16 %v271_v42, %v261_v41  ;;  %v270_v52 = vld [vmem:[%s7681_s1 + $0x6a0] sm:$0xff]  ;;  %v339_v54 = vld [vmem:[%s7681_s1 + $0x8c8] sm:$0xff] }
  0x29   :  { %3754 = vmatpush1.bf16.msra.mxu0 %v3753_v2  ;;  %701 = vmatprep.mubr.f32.mxu1 %v7692_v3  ;;  %v260_v49 = vld [vmem:[%s7681_s1 + $0x650] sm:$0xff]  ;;  %v349_v55 = vld [vmem:[%s7681_s1 + $0x918] sm:$0xff]  ;;  %v291_v57 = vld [vmem:[%s7681_s1 + $0x748] sm:$0xff]  ;;  %v3769_v59 = vpack.c.bf16 %v328_v48, %v318_v47 }
  0x2a   :  { %3820 = vmatpush1.bf16.msra.mxu1 %v3819_v4  ;;  %3756 = vmatprep.subr.bf16.mxu0 %v3755_v5  ;;  %v281_v56 = vld [vmem:[%s7681_s1 + $0x6f8] sm:$0xff]  ;;  %v4906_v58 = vld [vmem:[%s7682_s0 + $0xa0] sm:$0xff]  ;;  %v3835_v60 = vpack.c.bf16 %v270_v52, %v260_v49  ;;  %v3771_v61 = vpack.c.bf16 %v349_v55, %v339_v54  ;;  %v348_v63 = vld [vmem:[%s7681_s1 + $0x910] sm:$0xff] }
  0x2b   :  { %3822 = vmatprep.subr.bf16.mxu1 %v3821_v9  ;;  %v338_v62 = vld [vmem:[%s7681_s1 + $0x8c0] sm:$0xff]  ;;  %v280_v0 = vld [vmem:[%s7681_s1 + $0x6f0] sm:$0xff]  ;;  %v3837_v2 = vpack.c.bf16 %v291_v57, %v281_v56  ;;  %v359_v5 = vld [vmem:[%s7681_s1 + $0x968] sm:$0xff] }
  0x2c   :  { %3604 = vmatmul.mubr.msk.f32.gmra.mrb[10].mxu1 %vm438_vm3, %v4874_v43  ;;  %v290_v4 = vld [vmem:[%s7681_s1 + $0x740] sm:$0xff]  ;;  %v369_v6 = vld [vmem:[%s7681_s1 + $0x9b8] sm:$0xff]  ;;  %v311_v8 = vld [vmem:[%s7681_s1 + $0x7e8] sm:$0xff]  ;;  %v3773_v10 = vpack.c.bf16 %v348_v63, %v338_v62 }
  0x2d   :  { %3758 = vmatpush1.bf16.msra.mxu0 %v3757_v16  ;;  %707 = vmatprep.mubr.f32.mxu1 %v7692_v3  ;;  %v301_v7 = vld [vmem:[%s7681_s1 + $0x798] sm:$0xff]  ;;  %v3839_v11 = vpack.c.bf16 %v290_v4, %v280_v0  ;;  %v3775_v12 = vpack.c.bf16 %v369_v6, %v359_v5  ;;  %v358_v13 = vld [vmem:[%s7681_s1 + $0x960] sm:$0xff]  ;;  %v368_v14 = vld [vmem:[%s7681_s1 + $0x9b0] sm:$0xff] }
  0x2e   :  { %3824 = vmatpush1.bf16.msra.mxu1 %v3823_v17  ;;  %3760 = vmatprep.subr.bf16.mxu0 %v3759_v18  ;;  %v4938_v9 = vld [vmem:[%s7682_s0 + $0xb8] sm:$0xff]  ;;  %v300_v16 = vld [vmem:[%s7681_s1 + $0x790] sm:$0xff]  ;;  %v3841_v17 = vpack.c.bf16 %v311_v8, %v301_v7  ;;  %v310_v18 = vld [vmem:[%s7681_s1 + $0x7e0] sm:$0xff]  ;;  %v3777_v23 = vpack.c.bf16 %v368_v14, %v358_v13 }
  0x2f   :  { %3826 = vmatprep.subr.bf16.mxu1 %v3825_v22  ;;  %v63_v19 = vld [vmem:[%s7681_s1 + $0x28] sm:$0xff]  ;;  %v73_v20 = vld [vmem:[%s7681_s1 + $0x78] sm:$0xff]  ;;  %v3843_v24 = vpack.c.bf16 %v310_v18, %v300_v16  ;;  %v320_v26 = vld [vmem:[%s7681_s1 + $0x830] sm:$0xff] }
  0x30   :  { %3605 = vmatmul.mubr.msk.f32.gmra.mrb[12].mxu1 %vm438_vm3, %v4906_v58  ;;  %v321_v21 = vld [vmem:[%s7681_s1 + $0x838] sm:$0xff]  ;;  %v331_v22 = vld [vmem:[%s7681_s1 + $0x888] sm:$0xff]  ;;  %v3871_v25 = vpack.c.bf16 %v73_v20, %v63_v19  ;;  %v62_v27 = vld [vmem:[%s7681_s1 + $0x20] sm:$0xff] }
  0x31   :  { %3762 = vmatpush1.bf16.msra.mxu0 %v3761_v29  ;;  %713 = vmatprep.mubr.f32.mxu1 %v7692_v3  ;;  %v72_v29 = vld [vmem:[%s7681_s1 + $0x70] sm:$0xff]  ;;  %v83_v34 = vld [vmem:[%s7681_s1 + $0xc8] sm:$0xff]  ;;  %v93_v35 = vld [vmem:[%s7681_s1 + $0x118] sm:$0xff] }
  0x32   :  { %3828 = vmatpush1.bf16.msra.mxu1 %v3827_v32  ;;  %3764 = vmatprep.subr.bf16.mxu0 %v3763_v33  ;;  %v3845_v32 = vpack.c.bf16 %v331_v22, %v321_v21  ;;  %v330_v33 = vld [vmem:[%s7681_s1 + $0x880] sm:$0xff]  ;;  %v341_v36 = vld [vmem:[%s7681_s1 + $0x8d8] sm:$0xff]  ;;  %v3873_v39 = vpack.c.bf16 %v72_v29, %v62_v27  ;;  %v3875_v42 = vpack.c.bf16 %v93_v35, %v83_v34  ;;  %v103_v49 = vld [vmem:[%s7681_s1 + $0x168] sm:$0xff] }
  0x33   :  { %3830 = vmatprep.subr.bf16.mxu1 %v3829_v37  ;;  %v351_v37 = vld [vmem:[%s7681_s1 + $0x928] sm:$0xff]  ;;  %v4994_v38 = vld [vmem:[%s7682_s0] sm:$0xff]  ;;  %v3847_v41 = vpack.c.bf16 %v330_v33, %v320_v26  ;;  %v361_v52 = vld [vmem:[%s7681_s1 + $0x978] sm:$0xff] }
  0x34   :  { %3606 = vmatmul.mubr.msk.f32.gmra.mrb[14].mxu1 %vm438_vm3, %v4938_v9  ;;  %v4999_v40 = vld [vmem:[%s7682_s0 + $0x20] sm:$0xff]  ;;  %v3849_v47 = vpack.c.bf16 %v351_v37, %v341_v36  ;;  %v371_v54 = vld [vmem:[%s7681_s1 + $0x9c8] sm:$0xff]  ;;  %v5030_v55 = vld [vmem:[%s7682_s0 + $0x18] sm:$0xff] }
  0x35   :  { %3766 = vmatpush1.bf16.msra.mxu0 %v3765_v44  ;;  %784 = vmatprep.mubr.f32.mxu1 %v4841_v31  ;;  %v340_v44 = vld [vmem:[%s7681_s1 + $0x8d0] sm:$0xff]  ;;  %v350_v48 = vld [vmem:[%s7681_s1 + $0x920] sm:$0xff]  ;;  %v5035_v57 = vld [vmem:[%s7682_s0 + $0x38] sm:$0xff]  ;;  %v3853_v0 = vpack.c.bf16 %v371_v54, %v361_v52 }
  0x36   :  { %3832 = vmatpush1.bf16.msra.mxu1 %v3831_v45  ;;  %3768 = vmatprep.subr.bf16.mxu0 %v3767_v46  ;;  %v82_v45 = vld [vmem:[%s7681_s1 + $0xc0] sm:$0xff]  ;;  %v92_v46 = vld [vmem:[%s7681_s1 + $0x110] sm:$0xff]  ;;  %v123_v4 = vld [vmem:[%s7681_s1 + $0x208] sm:$0xff] }
  0x37   :  { %3834 = vmatprep.subr.bf16.mxu1 %v3833_v51  ;;  %v113_v51 = vld [vmem:[%s7681_s1 + $0x1b8] sm:$0xff]  ;;  %v3877_v56 = vpack.c.bf16 %v92_v46, %v82_v45  ;;  %v102_v62 = vld [vmem:[%s7681_s1 + $0x160] sm:$0xff]  ;;  %v112_v63 = vld [vmem:[%s7681_s1 + $0x1b0] sm:$0xff] }
  0x38   :  { %v133_v5 = vld [vmem:[%s7681_s1 + $0x258] sm:$0xff]  ;;  %v391_v7 = vld [vmem:[%s7681_s1 + $0xa68] sm:$0xff]  ;;  %v5066_v8 = vld [vmem:[%s7682_s0 + $0x30] sm:$0xff] }
  0x39   :  { %3770 = vmatpush1.bf16.msra.mxu0 %v3769_v59  ;;  %v3851_v59 = vpack.c.bf16 %v350_v48, %v340_v44  ;;  %v381_v6 = vld [vmem:[%s7681_s1 + $0xa18] sm:$0xff]  ;;  %v3883_v13 = vpack.c.bf16 %v133_v5, %v123_v4  ;;  %v122_v14 = vld [vmem:[%s7681_s1 + $0x200] sm:$0xff]  ;;  %v132_v16 = vld [vmem:[%s7681_s1 + $0x250] sm:$0xff] }
  0x3a   :  { %3836 = vmatpush1.bf16.msra.mxu1 %v3835_v60  ;;  %3772 = vmatprep.subr.bf16.mxu0 %v3771_v61  ;;  %v3879_v60 = vpack.c.bf16 %v113_v51, %v103_v49  ;;  %v360_v61 = vld [vmem:[%s7681_s1 + $0x970] sm:$0xff]  ;;  %v390_v19 = vld [vmem:[%s7681_s1 + $0xa60] sm:$0xff]  ;;  %v143_v20 = vld [vmem:[%s7681_s1 + $0x2a8] sm:$0xff] }
  0x3b   :  { %3838 = vmatprep.subr.bf16.mxu1 %v3837_v2  ;;  %v370_v2 = vld [vmem:[%s7681_s1 + $0x9c0] sm:$0xff]  ;;  %v380_v18 = vld [vmem:[%s7681_s1 + $0xa10] sm:$0xff]  ;;  %v153_v21 = vld [vmem:[%s7681_s1 + $0x2f8] sm:$0xff] }
  0x3c   :  { %v5096_v22 = vld [vmem:[%s7682_s0 + $0x48] sm:$0xff]  ;;  %v3859_v26 = vpack.c.bf16 %v390_v19, %v380_v18  ;;  %v142_v27 = vld [vmem:[%s7681_s1 + $0x2a0] sm:$0xff]  ;;  %v152_v29 = vld [vmem:[%s7681_s1 + $0x2f0] sm:$0xff]  ;;  %v3887_v33 = vpack.c.bf16 %v153_v21, %v143_v20 }
  0x3d   :  { %3774 = vmatpush1.bf16.msra.mxu0 %v3773_v10  ;;  %v3881_v10 = vpack.c.bf16 %v112_v63, %v102_v62  ;;  %v163_v34 = vld [vmem:[%s7681_s1 + $0x348] sm:$0xff]  ;;  %v173_v35 = vld [vmem:[%s7681_s1 + $0x398] sm:$0xff]  ;;  %v400_v37 = vld [vmem:[%s7681_s1 + $0xab0] sm:$0xff] }
  0x3e   :  { %3840 = vmatpush1.bf16.msra.mxu1 %v3839_v11  ;;  %3776 = vmatprep.subr.bf16.mxu0 %v3775_v12  ;;  %v3855_v11 = vpack.c.bf16 %v370_v2, %v360_v61  ;;  %v5071_v12 = vld [vmem:[%s7682_s0 + $0x50] sm:$0xff]  ;;  %v421_v44 = vld [vmem:[%s7681_s1 + $0xb58] sm:$0xff]  ;;  %v431_v45 = vld [vmem:[%s7681_s1 + $0xba8] sm:$0xf]  ;;  %v3891_v49 = vpack.c.bf16 %v173_v35, %v163_v34 }
  0x3f   :  { %3842 = vmatprep.subr.bf16.mxu1 %v3841_v17  ;;  %v3857_v17 = vpack.c.bf16 %v391_v7, %v381_v6  ;;  %v162_v46 = vld [vmem:[%s7681_s1 + $0x340] sm:$0xff]  ;;  %v183_v52 = vld [vmem:[%s7681_s1 + $0x3e8] sm:$0xff]  ;;  %v193_v54 = vld [vmem:[%s7681_s1 + $0x438] sm:$0xff] }
  0x40   :  { %v5151_v48 = vld [vmem:[%s7682_s0 + $0x80] sm:$0xff]  ;;  %v5170_v61 = vld [vmem:[%s7682_s0 + $0x78] sm:$0xff]  ;;  %v192_v4 = vld [vmem:[%s7681_s1 + $0x430] sm:$0xff]  ;;  %v3895_v6 = vpack.c.bf16 %v193_v54, %v183_v52 }
  0x41   :  { %3778 = vmatpush1.bf16.msra.mxu0 %v3777_v23  ;;  %v3885_v23 = vpack.c.bf16 %v132_v16, %v122_v14  ;;  %v65_v63 = vld [vmem:[%s7681_s1 + $0x38] sm:$0xff]  ;;  %v182_v2 = vld [vmem:[%s7681_s1 + $0x3e0] sm:$0xff]  ;;  %v5204_v14 = vld [vmem:[%s7682_s0 + $0x90] sm:$0xff] }
  0x42   :  { %3844 = vmatpush1.bf16.msra.mxu1 %v3843_v24  ;;  %3872 = vmatprep.subr.bf16.mxu0 %v3871_v25  ;;  %v401_v24 = vld [vmem:[%s7681_s1 + $0xab8] sm:$0xff]  ;;  %v411_v25 = vld [vmem:[%s7681_s1 + $0xb08] sm:$0xff]  ;;  %v3897_v16 = vpack.c.bf16 %v192_v4, %v182_v2  ;;  %v212_v18 = vld [vmem:[%s7681_s1 + $0x4d0] sm:$0xff] }
  0x43   :  { %3846 = vmatprep.subr.bf16.mxu1 %v3845_v32  ;;  %v5113_v32 = vld [vmem:[%s7682_s0 + $0x68] sm:$0xff]  ;;  %v3861_v36 = vpack.c.bf16 %v411_v25, %v401_v24  ;;  %v5189_v5 = vld [vmem:[%s7682_s0 + $0x98] sm:$0xff]  ;;  %v5217_v19 = vld [vmem:[%s7682_s0 + $0xb0] sm:$0xff] }
  0x44   :  { %559 = vmatmul.mubr.f32.vlgmr.msra.gmra.mrb[0].mxu0 %v4994_v38  ;;  %v223_v21 = vld [vmem:[%s7681_s1 + $0x528] sm:$0xff]  ;;  %v253_v34 = vld [vmem:[%s7681_s1 + $0x618] sm:$0xff] }
  0x45   :  { %3874 = vmatpush1.bf16.msra.mxu0 %v3873_v39  ;;  %564 = vmatprep.mubr.f32.mxu0 %v4999_v40  ;;  %v410_v39 = vld [vmem:[%s7681_s1 + $0xb00] sm:$0xff]  ;;  %v5232_v24 = vld [vmem:[%s7682_s0 + $0xa8] sm:$0xff]  ;;  %v293_v52 = vld [vmem:[%s7681_s1 + $0x758] sm:$0xff] }
  0x46   :  { %3848 = vmatpush1.bf16.msra.mxu1 %v3847_v41  ;;  %3876 = vmatprep.subr.bf16.mxu0 %v3875_v42  ;;  %v5132_v41 = vld [vmem:[%s7682_s0 + $0x60] sm:$0xff]  ;;  %v3889_v42 = vpack.c.bf16 %v152_v29, %v142_v27  ;;  %v3863_v51 = vpack.c.bf16 %v410_v39, %v400_v37  ;;  %v232_v29 = vld [vmem:[%s7681_s1 + $0x570] sm:$0xff]  ;;  %v95_v2 = vld [vmem:[%s7681_s1 + $0x128] sm:$0xff] }
  0x47   :  { %3850 = vmatprep.subr.bf16.mxu1 %v3849_v47  ;;  %v172_v47 = vld [vmem:[%s7681_s1 + $0x390] sm:$0xff]  ;;  %v222_v27 = vld [vmem:[%s7681_s1 + $0x520] sm:$0xff]  ;;  %v303_v4 = vld [vmem:[%s7681_s1 + $0x7a8] sm:$0xff] }
  0x48   :  { %565 = vmatmul.mubr.f32.gmra.mrb[2].mxu0 %v5030_v55  ;;  %v3893_v62 = vpack.c.bf16 %v172_v47, %v162_v46  ;;  %v3905_v35 = vpack.c.bf16 %v232_v29, %v222_v27  ;;  %v242_v37 = vld [vmem:[%s7681_s1 + $0x5c0] sm:$0xff]  ;;  %v252_v39 = vld [vmem:[%s7681_s1 + $0x610] sm:$0xff] }
  0x49   :  { %3878 = vmatpush1.bf16.msra.mxu0 %v3877_v56  ;;  %570 = vmatprep.mubr.f32.mxu0 %v5035_v57  ;;  %v3865_v56 = vpack.c.bf16 %v431_v45, %v421_v44  ;;  %v273_v44 = vld [vmem:[%s7681_s1 + $0x6b8] sm:$0xff]  ;;  %v3909_v45 = vpack.c.bf16 %v252_v39, %v242_v37  ;;  %v262_v47 = vld [vmem:[%s7681_s1 + $0x660] sm:$0xff] }
  0x4a   :  { %3852 = vmatpush1.bf16.msra.mxu1 %v3851_v59  ;;  %3880 = vmatprep.subr.bf16.mxu0 %v3879_v60  ;;  %v420_v59 = vld [vmem:[%s7681_s1 + $0xb50] sm:$0xff]  ;;  %v430_v60 = vld [vmem:[%s7681_s1 + $0xba0] sm:$0xf]  ;;  %v125_v39 = vld [vmem:[%s7681_s1 + $0x218] sm:$0xff] }
  0x4b   :  { %3854 = vmatprep.subr.bf16.mxu1 %v3853_v0  ;;  %v75_v0 = vld [vmem:[%s7681_s1 + $0x88] sm:$0xff]  ;;  %v3868_v7 = vpack.c.bf16 %v430_v60, %v420_v59  ;;  %v282_v59 = vld [vmem:[%s7681_s1 + $0x700] sm:$0xff]  ;;  %v292_v60 = vld [vmem:[%s7681_s1 + $0x750] sm:$0xff] }
  0x4c   :  { %571 = vmatmul.mubr.f32.gmra.mrb[4].mxu0 %v5066_v8  ;;  %v114_v37 = vld [vmem:[%s7681_s1 + $0x1c0] sm:$0xff] }
  0x4d   :  { %3882 = vmatpush1.bf16.msra.mxu0 %v3881_v10  ;;  %576 = vmatprep.mubr.f32.mxu0 %v5071_v12  ;;  %v203_v10 = vld [vmem:[%s7681_s1 + $0x488] sm:$0xff] }
  0x4e   :  { %3856 = vmatpush1.bf16.msra.mxu1 %v3855_v11  ;;  %3884 = vmatprep.subr.bf16.mxu0 %v3883_v13  ;;  %v213_v11 = vld [vmem:[%s7681_s1 + $0x4d8] sm:$0xff]  ;;  %v3949_v13 = vpack.c.bf16 %v75_v0, %v65_v63  ;;  %v74_v63 = vld [vmem:[%s7681_s1 + $0x80] sm:$0xff] }
  0x4f   :  { %3858 = vmatprep.subr.bf16.mxu1 %v3857_v17  ;;  %v202_v17 = vld [vmem:[%s7681_s1 + $0x480] sm:$0xff]  ;;  %v3899_v20 = vpack.c.bf16 %v213_v11, %v203_v10  ;;  %v85_v0 = vld [vmem:[%s7681_s1 + $0xd8] sm:$0xff] }
  0x50   :  { %577 = vmatmul.mubr.f32.gmra.mrb[6].mxu0 %v5096_v22  ;;  %v3901_v25 = vpack.c.bf16 %v212_v18, %v202_v17  ;;  %v302_v11 = vld [vmem:[%s7681_s1 + $0x7a0] sm:$0xff]  ;;  %v84_v18 = vld [vmem:[%s7681_s1 + $0xd0] sm:$0xff] }
  0x51   :  { %785 = vmatmul.mubr.f32.vlgmr.msra.gmra.mrb[16].mxu1 %v4994_v38  ;;  %3886 = vmatpush1.bf16.msra.mxu0 %v3885_v23  ;;  %v233_v23 = vld [vmem:[%s7681_s1 + $0x578] sm:$0xff] }
  0x52   :  { %3860 = vmatpush1.bf16.msra.mxu1 %v3859_v26  ;;  %582 = vmatprep.mubr.f32.mxu0 %v5113_v32  ;;  %v3903_v26 = vpack.c.bf16 %v233_v23, %v223_v21  ;;  %v105_v21 = vld [vmem:[%s7681_s1 + $0x178] sm:$0xff]  ;;  %v115_v23 = vld [vmem:[%s7681_s1 + $0x1c8] sm:$0xff] }
  0x53   :  { %790 = vmatprep.mubr.f32.mxu1 %v4999_v40  ;;  %3888 = vmatprep.subr.bf16.mxu0 %v3887_v33  ;;  %v243_v33 = vld [vmem:[%s7681_s1 + $0x5c8] sm:$0xff] }
  0x54   :  { %583 = vmatmul.mubr.f32.gmra.mrb[8].mxu0 %v5132_v41  ;;  %3862 = vmatprep.subr.bf16.mxu1 %v3861_v36  ;;  %v3907_v36 = vpack.c.bf16 %v253_v34, %v243_v33  ;;  %v322_v33 = vld [vmem:[%s7681_s1 + $0x840] sm:$0xff]  ;;  %v332_v34 = vld [vmem:[%s7681_s1 + $0x890] sm:$0xff] }
  0x55   :  { %791 = vmatmul.mubr.f32.gmra.mrb[18].mxu1 %v5030_v55  ;;  %3890 = vmatpush1.bf16.msra.mxu0 %v3889_v42  ;;  %v263_v42 = vld [vmem:[%s7681_s1 + $0x668] sm:$0xff] }
  0x56   :  { %588 = vmatprep.mubr.f32.mxu0 %v5151_v48  ;;  %796 = vmatprep.mubr.f32.mxu1 %v5035_v57  ;;  %v3911_v46 = vpack.c.bf16 %v273_v44, %v263_v42  ;;  %v135_v42 = vld [vmem:[%s7681_s1 + $0x268] sm:$0xff] }
  0x57   :  { %3892 = vmatprep.subr.bf16.mxu0 %v3891_v49  ;;  %3864 = vmatpush1.bf16.msra.mxu1 %v3863_v51  ;;  %v272_v49 = vld [vmem:[%s7681_s1 + $0x6b0] sm:$0xff]  ;;  %v283_v51 = vld [vmem:[%s7681_s1 + $0x708] sm:$0xff] }
  0x58   :  { %589 = vmatmul.mubr.f32.gmra.mrb[10].mxu0 %v5170_v61  ;;  %3867 = vmatprep.subr.msk.bf16.mxu1 %vm4553_vm2, %v3865_v56  ;;  %v3913_v54 = vpack.c.bf16 %v272_v49, %v262_v47  ;;  %v3915_v56 = vpack.c.bf16 %v293_v52, %v283_v51  ;;  %v343_v44 = vld [vmem:[%s7681_s1 + $0x8e8] sm:$0xff]  ;;  %v342_v49 = vld [vmem:[%s7681_s1 + $0x8e0] sm:$0xff]  ;;  %v352_v51 = vld [vmem:[%s7681_s1 + $0x930] sm:$0xff]  ;;  %v3961_v52 = vpack.c.bf16 %v135_v42, %v125_v39 }
  0x59   :  { %797 = vmatmul.mubr.f32.gmra.mrb[20].mxu1 %v5066_v8  ;;  %3894 = vmatpush1.bf16.msra.mxu0 %v3893_v62  ;;  %v64_v62 = vld [vmem:[%s7681_s1 + $0x30] sm:$0xff]  ;;  %v194_v42 = vld [vmem:[%s7681_s1 + $0x440] sm:$0xff] }
  0x5a   :  { %594 = vmatprep.mubr.f32.mxu0 %v5189_v5  ;;  %802 = vmatprep.mubr.f32.mxu1 %v5071_v12  ;;  %v3951_v10 = vpack.c.bf16 %v74_v63, %v64_v62  ;;  %v363_v62 = vld [vmem:[%s7681_s1 + $0x988] sm:$0xff]  ;;  %v373_v63 = vld [vmem:[%s7681_s1 + $0x9d8] sm:$0xff] }
  0x5b   :  { %3896 = vmatprep.subr.bf16.mxu0 %v3895_v6  ;;  %3870 = vmatpush1.bf16.msk.msra.mxu1 %vm4553_vm2, %v3868_v7  ;;  %v313_v6 = vld [vmem:[%s7681_s1 + $0x7f8] sm:$0xff]  ;;  %v3917_v7 = vpack.c.bf16 %v292_v60, %v282_v59  ;;  %v155_v60 = vld [vmem:[%s7681_s1 + $0x308] sm:$0xff] }
  0x5c   :  { %595 = vmatmul.mubr.f32.gmra.mrb[12].mxu0 %v5204_v14  ;;  %3950 = vmatprep.subr.bf16.mxu1 %v3949_v13  ;;  %v312_v13 = vld [vmem:[%s7681_s1 + $0x7f0] sm:$0xff]  ;;  %v3919_v17 = vpack.c.bf16 %v313_v6, %v303_v4  ;;  %v145_v59 = vld [vmem:[%s7681_s1 + $0x2b8] sm:$0xff]  ;;  %v362_v4 = vld [vmem:[%s7681_s1 + $0x980] sm:$0xff] }
  0x5d   :  { %803 = vmatmul.mubr.f32.gmra.mrb[22].mxu1 %v5096_v22  ;;  %3898 = vmatpush1.bf16.msra.mxu0 %v3897_v16  ;;  %v3953_v16 = vpack.c.bf16 %v95_v2, %v85_v0  ;;  %v3921_v27 = vpack.c.bf16 %v312_v13, %v302_v11  ;;  %v3929_v0 = vpack.c.bf16 %v352_v51, %v342_v49  ;;  %v372_v6 = vld [vmem:[%s7681_s1 + $0x9d0] sm:$0xff]  ;;  %v154_v11 = vld [vmem:[%s7681_s1 + $0x300] sm:$0xff]  ;;  %v165_v13 = vld [vmem:[%s7681_s1 + $0x358] sm:$0xff] }
  0x5e   :  { %600 = vmatprep.mubr.f32.mxu0 %v5217_v19  ;;  %808 = vmatprep.mubr.f32.mxu1 %v5113_v32  ;;  %v412_v49 = vld [vmem:[%s7681_s1 + $0xb10] sm:$0xff]  ;;  %v423_v51 = vld [vmem:[%s7681_s1 + $0xb68] sm:$0xff] }
  0x5f   :  { %3900 = vmatprep.subr.bf16.mxu0 %v3899_v20  ;;  %v94_v20 = vld [vmem:[%s7681_s1 + $0x120] sm:$0xff] }
  0x60   :  { %601 = vmatmul.mubr.f32.gmra.mrb[14].mxu0 %v5232_v24  ;;  %v3955_v29 = vpack.c.bf16 %v94_v20, %v84_v18  ;;  %v393_v18 = vld [vmem:[%s7681_s1 + $0xa78] sm:$0xff]  ;;  %v3933_v20 = vpack.c.bf16 %v372_v6, %v362_v4  ;;  %v67_v4 = vld [vmem:[%s7681_s1 + $0x48] sm:$0xff] }
  0x61   :  { %809 = vmatmul.mubr.f32.gmra.mrb[24].mxu1 %v5132_v41  ;;  %3902 = vmatpush1.bf16.msra.mxu0 %v3901_v25  ;;  %v323_v25 = vld [vmem:[%s7681_s1 + $0x848] sm:$0xff]  ;;  %v77_v6 = vld [vmem:[%s7681_s1 + $0x98] sm:$0xff] }
  0x62   :  { %814 = vmatprep.mubr.f32.mxu1 %v5151_v48  ;;  %3904 = vmatprep.subr.bf16.mxu0 %v3903_v26  ;;  %v333_v26 = vld [vmem:[%s7681_s1 + $0x898] sm:$0xff] }
  0x63   :  { %1010 = vmatprep.mubr.f32.mxu0 %v4841_v31 }
  0x65   :  { %815 = vmatmul.mubr.f32.gmra.mrb[26].mxu1 %v5170_v61  ;;  %3906 = vmatpush1.bf16.msra.mxu0 %v3905_v35  ;;  %v3957_v35 = vpack.c.bf16 %v115_v23, %v105_v21 }
  0x66   :  { %820 = vmatprep.mubr.f32.mxu1 %v5189_v5  ;;  %3908 = vmatprep.subr.bf16.mxu0 %v3907_v36  ;;  %v3923_v36 = vpack.c.bf16 %v333_v26, %v323_v25  ;;  %v164_v25 = vld [vmem:[%s7681_s1 + $0x350] sm:$0xff]  ;;  %v174_v26 = vld [vmem:[%s7681_s1 + $0x3a0] sm:$0xff] }
  0x69   :  { %821 = vmatmul.mubr.f32.gmra.mrb[28].mxu1 %v5204_v14  ;;  %3910 = vmatpush1.bf16.msra.mxu0 %v3909_v45  ;;  %v353_v45 = vld [vmem:[%s7681_s1 + $0x938] sm:$0xff] }
  0x6a   :  { %826 = vmatprep.mubr.f32.mxu1 %v5217_v19  ;;  %3912 = vmatprep.subr.bf16.mxu0 %v3911_v46  ;;  %v3925_v46 = vpack.c.bf16 %v332_v34, %v322_v33  ;;  %v185_v33 = vld [vmem:[%s7681_s1 + $0x3f8] sm:$0xff]  ;;  %v195_v34 = vld [vmem:[%s7681_s1 + $0x448] sm:$0xff] }
  0x6b   :  { %v3973_v39 = vpack.c.bf16 %v195_v34, %v185_v33  ;;  %v295_v33 = vld [vmem:[%s7681_s1 + $0x768] sm:$0xff] }
  0x6d   :  { %827 = vmatmul.mubr.f32.gmra.mrb[30].mxu1 %v5232_v24  ;;  %3914 = vmatpush1.bf16.msra.mxu0 %v3913_v54  ;;  %v3927_v54 = vpack.c.bf16 %v353_v45, %v343_v44  ;;  %v205_v44 = vld [vmem:[%s7681_s1 + $0x498] sm:$0xff]  ;;  %v215_v45 = vld [vmem:[%s7681_s1 + $0x4e8] sm:$0xff] }
  0x6e   :  { %897 = vmatprep.mubr.f32.mxu1 %v7692_v3  ;;  %3916 = vmatprep.subr.bf16.mxu0 %v3915_v56  ;;  %v134_v56 = vld [vmem:[%s7681_s1 + $0x260] sm:$0xff] }
  0x71   :  { %3609 = vmatmul.mubr.msk.f32.vlgmr.msra.gmra.mrb[16].mxu1 %vm438_vm3, %v4604_v50  ;;  %3918 = vmatpush1.bf16.msra.mxu0 %v3917_v7  ;;  %v104_v50 = vld [vmem:[%s7681_s1 + $0x170] sm:$0xff]  ;;  %v3965_v7 = vpack.c.bf16 %v155_v60, %v145_v59  ;;  %v225_v59 = vld [vmem:[%s7681_s1 + $0x538] sm:$0xff] }
  0x72   :  { %3952 = vmatpush1.bf16.msra.mxu1 %v3951_v10  ;;  %903 = vmatprep.mubr.f32.mxu1 %v7692_v3  ;;  %v3959_v47 = vpack.c.bf16 %v114_v37, %v104_v50  ;;  %v3931_v10 = vpack.c.bf16 %v373_v63, %v363_v62  ;;  %v3971_v50 = vpack.c.bf16 %v174_v26, %v164_v25  ;;  %v235_v62 = vld [vmem:[%s7681_s1 + $0x588] sm:$0xff] }
  0x73   :  { %3954 = vmatprep.subr.bf16.mxu1 %v3953_v16  ;;  %3920 = vmatprep.subr.bf16.mxu0 %v3919_v17  ;;  %v175_v16 = vld [vmem:[%s7681_s1 + $0x3a8] sm:$0xff] }
  0x74   :  { %v383_v17 = vld [vmem:[%s7681_s1 + $0xa28] sm:$0xff]  ;;  %v3969_v23 = vpack.c.bf16 %v175_v16, %v165_v13  ;;  %v245_v13 = vld [vmem:[%s7681_s1 + $0x5d8] sm:$0xff] }
  0x75   :  { %3610 = vmatmul.mubr.msk.f32.gmra.mrb[18].mxu1 %vm438_vm3, %v4740_v53  ;;  %3922 = vmatpush1.bf16.msra.mxu0 %v3921_v27  ;;  %v124_v53 = vld [vmem:[%s7681_s1 + $0x210] sm:$0xff]  ;;  %v3935_v27 = vpack.c.bf16 %v393_v18, %v383_v17  ;;  %v255_v16 = vld [vmem:[%s7681_s1 + $0x628] sm:$0xff]  ;;  %v4027_v17 = vpack.c.bf16 %v77_v6, %v67_v4 }
  0x76   :  { %3956 = vmatpush1.bf16.msra.mxu1 %v3955_v29  ;;  %909 = vmatprep.mubr.f32.mxu1 %v7692_v3  ;;  %v3963_v2 = vpack.c.bf16 %v134_v56, %v124_v53  ;;  %v392_v29 = vld [vmem:[%s7681_s1 + $0xa70] sm:$0xff]  ;;  %v3977_v53 = vpack.c.bf16 %v215_v45, %v205_v44  ;;  %v214_v56 = vld [vmem:[%s7681_s1 + $0x4e0] sm:$0xff] }
  0x77   :  { %3958 = vmatprep.subr.bf16.mxu1 %v3957_v35  ;;  %3924 = vmatprep.subr.bf16.mxu0 %v3923_v36  ;;  %v403_v35 = vld [vmem:[%s7681_s1 + $0xac8] sm:$0xff]  ;;  %v413_v36 = vld [vmem:[%s7681_s1 + $0xb18] sm:$0xff]  ;;  %v3649_v44 = vld [vmem:[%s7684_s4] ss:$0 sm:$0xff] }
  0x78   :  { %2669 = vrot.lane.b32.xlu1 %v3649_v44, %s4428_s30  ;;  %s4430_s30 = smov 56  }
  0x79   :  { %3611 = vmatmul.mubr.msk.f32.gmra.mrb[20].mxu1 %vm438_vm3, %v4772_v1  ;;  %3926 = vmatpush1.bf16.msra.mxu0 %v3925_v46  ;;  %v144_v1 = vld [vmem:[%s7681_s1 + $0x2b0] sm:$0xff]  ;;  %v3939_v46 = vpack.c.bf16 %v413_v36, %v403_v35 }
  0x7a   :  { %3960 = vmatpush1.bf16.msra.mxu1 %v3959_v47  ;;  %915 = vmatprep.mubr.f32.mxu1 %v7692_v3  ;;  %v3967_v21 = vpack.c.bf16 %v154_v11, %v144_v1  ;;  %v402_v47 = vld [vmem:[%s7681_s1 + $0xac0] sm:$0xff]  ;;  %v284_v36 = vld [vmem:[%s7681_s1 + $0x710] sm:$0xff] }
  0x7b   :  { %3962 = vmatprep.subr.bf16.mxu1 %v3961_v52  ;;  %3928 = vmatprep.subr.bf16.mxu0 %v3927_v54  ;;  %v433_v52 = vld [vmem:[%s7681_s1 + $0xbb8] sm:$0xf]  ;;  %v3941_v60 = vpack.c.bf16 %v412_v49, %v402_v47  ;;  %v234_v1 = vld [vmem:[%s7681_s1 + $0x580] sm:$0xff] }
  0x7c   :  { %v3943_v63 = vpack.c.bf16 %v433_v52, %v423_v51  ;;  %v314_v47 = vld [vmem:[%s7681_s1 + $0x800] sm:$0xff]  ;;  %v325_v49 = vld [vmem:[%s7681_s1 + $0x858] sm:$0xff]  ;;  %v335_v51 = vld [vmem:[%s7681_s1 + $0x8a8] sm:$0xff] }
  0x7d   :  { %3612 = vmatmul.mubr.msk.f32.gmra.mrb[22].mxu1 %vm438_vm3, %v4804_v15  ;;  %3930 = vmatpush1.bf16.msra.mxu0 %v3929_v0  ;;  %v382_v15 = vld [vmem:[%s7681_s1 + $0xa20] sm:$0xff] }
  0x7e   :  { %3964 = vmatpush1.bf16.msra.mxu1 %v3963_v2  ;;  %921 = vmatprep.mubr.f32.mxu1 %v7692_v3  ;;  %v3937_v37 = vpack.c.bf16 %v392_v29, %v382_v15  ;;  %v422_v0 = vld [vmem:[%s7681_s1 + $0xb60] sm:$0xff]  ;;  %v432_v2 = vld [vmem:[%s7681_s1 + $0xbb0] sm:$0xf]  ;;  %v285_v29 = vld [vmem:[%s7681_s1 + $0x718] sm:$0xff] }
  0x7f   :  { %3966 = vmatprep.subr.bf16.mxu1 %v3965_v7  ;;  %3932 = vmatprep.subr.bf16.mxu0 %v3931_v10  ;;  %v3981_v10 = vpack.c.bf16 %v235_v62, %v225_v59  ;;  %v3946_v11 = vpack.c.bf16 %v432_v2, %v422_v0  ;;  %v274_v15 = vld [vmem:[%s7681_s1 + $0x6c0] sm:$0xff]  ;;  %v3993_v35 = vpack.c.bf16 %v295_v33, %v285_v29  ;;  %v97_v62 = vld [vmem:[%s7681_s1 + $0x138] sm:$0xff]  ;;  %v355_v0 = vld [vmem:[%s7681_s1 + $0x948] sm:$0xff] }
  0x80   :  { %v334_v59 = vld [vmem:[%s7681_s1 + $0x8a0] sm:$0xff]  ;;  %v127_v29 = vld [vmem:[%s7681_s1 + $0x228] sm:$0xff]  ;;  %v137_v33 = vld [vmem:[%s7681_s1 + $0x278] sm:$0xff] }
  0x81   :  { %3613 = vmatmul.mubr.msk.f32.gmra.mrb[24].mxu1 %vm438_vm3, %v4836_v28  ;;  %3934 = vmatpush1.bf16.msra.mxu0 %v3933_v20  ;;  %v184_v28 = vld [vmem:[%s7681_s1 + $0x3f0] sm:$0xff]  ;;  %v3985_v20 = vpack.c.bf16 %v255_v16, %v245_v13  ;;  %v107_v13 = vld [vmem:[%s7681_s1 + $0x188] sm:$0xff]  ;;  %v117_v16 = vld [vmem:[%s7681_s1 + $0x1d8] sm:$0xff] }
  0x82   :  { %3968 = vmatpush1.bf16.msra.mxu1 %v3967_v21  ;;  %927 = vmatprep.mubr.f32.mxu1 %v7692_v3  ;;  %v3975_v54 = vpack.c.bf16 %v194_v42, %v184_v28  ;;  %v244_v21 = vld [vmem:[%s7681_s1 + $0x5d0] sm:$0xff]  ;;  %v3648_v28 = vld [vmem:[%s7683_s3] ss:$0 sm:$0xff]  ;;  %s4431_s3 = smov 84  }
  0x83   :  { %3970 = vmatprep.subr.bf16.mxu1 %v3969_v23  ;;  %3936 = vmatprep.subr.bf16.mxu0 %v3935_v27  ;;  %v254_v23 = vld [vmem:[%s7681_s1 + $0x620] sm:$0xff]  ;;  %v264_v27 = vld [vmem:[%s7681_s1 + $0x670] sm:$0xff] }
  0x84   :  { %1011 = vmatmul.mubr.f32.vlgmr.msra.gmra.mrb[16].mxu0 %v4994_v38  ;;  %v3987_v25 = vpack.c.bf16 %v254_v23, %v244_v21  ;;  %v3991_v34 = vpack.c.bf16 %v274_v15, %v264_v27  ;;  %2153 = vrot.lane.b32.xlu0 %v3648_v28, %s4427_s23  ;;  %v374_v15 = vld [vmem:[%s7681_s1 + $0x9e0] sm:$0xff] }
  0x85   :  { %3614 = vmatmul.mubr.msk.f32.gmra.mrb[26].mxu1 %vm438_vm3, %v4874_v43  ;;  %1016 = vmatprep.mubr.f32.mxu0 %v4999_v40  ;;  %v204_v43 = vld [vmem:[%s7681_s1 + $0x490] sm:$0xff]  ;;  %v126_v28 = vld [vmem:[%s7681_s1 + $0x220] sm:$0xff] }
  0x86   :  { %3972 = vmatpush1.bf16.msra.mxu1 %v3971_v50  ;;  %933 = vmatprep.mubr.f32.mxu1 %v7692_v3  ;;  %v3979_v7 = vpack.c.bf16 %v214_v56, %v204_v43  ;;  %v294_v50 = vld [vmem:[%s7681_s1 + $0x760] sm:$0xff]  ;;  %v76_v43 = vld [vmem:[%s7681_s1 + $0x90] sm:$0xff]  ;;  %v4001_v56 = vpack.c.bf16 %v335_v51, %v325_v49  ;;  %v147_v49 = vld [vmem:[%s7681_s1 + $0x2c8] sm:$0xff] }
  0x87   :  { %3938 = vmatpush1.bf16.msra.mxu0 %v3937_v37  ;;  %3974 = vmatprep.subr.bf16.mxu1 %v3973_v39  ;;  %v305_v37 = vld [vmem:[%s7681_s1 + $0x7b8] sm:$0xff]  ;;  %v315_v39 = vld [vmem:[%s7681_s1 + $0x808] sm:$0xff]  ;;  %v3995_v42 = vpack.c.bf16 %v294_v50, %v284_v36 }
  0x88   :  { %1017 = vmatmul.mubr.f32.gmra.mrb[18].mxu0 %v5030_v55  ;;  %3940 = vmatprep.subr.bf16.mxu0 %v3939_v46  ;;  %v3997_v45 = vpack.c.bf16 %v315_v39, %v305_v37  ;;  %v304_v46 = vld [vmem:[%s7681_s1 + $0x7b0] sm:$0xff]  ;;  %v395_v36 = vld [vmem:[%s7681_s1 + $0xa88] sm:$0xff]  ;;  %v4039_v39 = vpack.c.bf16 %v137_v33, %v127_v29  ;;  %v157_v51 = vld [vmem:[%s7681_s1 + $0x318] sm:$0xff] }
  0x89   :  { %3615 = vmatmul.mubr.msk.f32.gmra.mrb[28].mxu1 %vm438_vm3, %v4906_v58  ;;  %1022 = vmatprep.mubr.f32.mxu0 %v5035_v57  ;;  %v224_v58 = vld [vmem:[%s7681_s1 + $0x530] sm:$0xff]  ;;  %v3999_v52 = vpack.c.bf16 %v314_v47, %v304_v46  ;;  %v394_v46 = vld [vmem:[%s7681_s1 + $0xa80] sm:$0xff] }
  0x8a   :  { %3976 = vmatpush1.bf16.msra.mxu1 %v3975_v54  ;;  %939 = vmatprep.mubr.f32.mxu1 %v7692_v3  ;;  %v3983_v18 = vpack.c.bf16 %v234_v1, %v224_v58  ;;  %v324_v54 = vld [vmem:[%s7681_s1 + $0x850] sm:$0xff]  ;;  %v5687_v47 = vld [vmem:[%s7682_s0 + $0x40] sm:$0xff] }
  0x8b   :  { %3978 = vmatprep.subr.bf16.mxu1 %v3977_v53  ;;  %3942 = vmatpush1.bf16.msra.mxu0 %v3941_v60  ;;  %v66_v53 = vld [vmem:[%s7681_s1 + $0x40] sm:$0xff]  ;;  %v87_v60 = vld [vmem:[%s7681_s1 + $0xe8] sm:$0xff]  ;;  %v4003_v4 = vpack.c.bf16 %v334_v59, %v324_v54  ;;  %v96_v58 = vld [vmem:[%s7681_s1 + $0x130] sm:$0xff] }
  0x8c   :  { %1023 = vmatmul.mubr.f32.gmra.mrb[20].mxu0 %v5066_v8  ;;  %3945 = vmatprep.subr.msk.bf16.mxu0 %vm4553_vm2, %v3943_v63  ;;  %v345_v63 = vld [vmem:[%s7681_s1 + $0x8f8] sm:$0xff]  ;;  %v4029_v2 = vpack.c.bf16 %v76_v43, %v66_v53  ;;  %v4031_v6 = vpack.c.bf16 %v97_v62, %v87_v60  ;;  %v415_v53 = vld [vmem:[%s7681_s1 + $0xb28] sm:$0xff]  ;;  %v156_v59 = vld [vmem:[%s7681_s1 + $0x310] sm:$0xff]  ;;  %v4043_v60 = vpack.c.bf16 %v157_v51, %v147_v49 }
  0x8d   :  { %3616 = vmatmul.mubr.msk.f32.gmra.mrb[30].mxu1 %vm438_vm3, %v4938_v9  ;;  %1028 = vmatprep.mubr.f32.mxu0 %v5071_v12  ;;  %v265_v9 = vld [vmem:[%s7681_s1 + $0x678] sm:$0xff]  ;;  %v4005_v1 = vpack.c.bf16 %v355_v0, %v345_v63  ;;  %v167_v62 = vld [vmem:[%s7681_s1 + $0x368] sm:$0xff]  ;;  %v206_v33 = vld [vmem:[%s7681_s1 + $0x4a0] sm:$0xff] }
  0x8e   :  { %3980 = vmatpush1.bf16.msra.mxu1 %v3979_v7  ;;  %1236 = vmatprep.mubr.f32.mxu1 %v4841_v31  ;;  %v275_v31 = vld [vmem:[%s7681_s1 + $0x6c8] sm:$0xff]  ;;  %v344_v7 = vld [vmem:[%s7681_s1 + $0x8f0] sm:$0xff]  ;;  %v405_v54 = vld [vmem:[%s7681_s1 + $0xad8] sm:$0xff] }
  0x8f   :  { %3982 = vmatprep.subr.bf16.mxu1 %v3981_v10  ;;  %3948 = vmatpush1.bf16.msk.msra.mxu0 %vm4553_vm2, %v3946_v11  ;;  %v3989_v26 = vpack.c.bf16 %v275_v31, %v265_v9  ;;  %v86_v10 = vld [vmem:[%s7681_s1 + $0xe0] sm:$0xff]  ;;  %v4035_v9 = vpack.c.bf16 %v117_v16, %v107_v13  ;;  %v364_v31 = vld [vmem:[%s7681_s1 + $0x990] sm:$0xff]  ;;  %v5716_v63 = vld [vmem:[%s7682_s0 + $0x58] sm:$0xff] }
  0x90   :  { %1029 = vmatmul.mubr.f32.gmra.mrb[22].mxu0 %v5096_v22  ;;  %4028 = vmatprep.subr.bf16.mxu0 %v4027_v17  ;;  %v354_v11 = vld [vmem:[%s7681_s1 + $0x940] sm:$0xff]  ;;  %v5629_v17 = vld [vmem:[%s7682_s0 + $0x10] sm:$0xff]  ;;  %v4033_v21 = vpack.c.bf16 %v96_v58, %v86_v10  ;;  %v4011_v37 = vpack.c.bf16 %v374_v15, %v364_v31  ;;  %v177_v0 = vld [vmem:[%s7681_s1 + $0x3b8] sm:$0xff] }
  0x91   :  { %1034 = vmatprep.mubr.f32.mxu0 %v5113_v32  ;;  %v4007_v23 = vpack.c.bf16 %v354_v11, %v344_v7  ;;  %v425_v10 = vld [vmem:[%s7681_s1 + $0xb78] sm:$0xff]  ;;  %v435_v58 = vld [vmem:[%s7681_s1 + $0xbc8] sm:$0xf]  ;;  %v4047_v11 = vpack.c.bf16 %v177_v0, %v167_v62  ;;  %v186_v31 = vld [vmem:[%s7681_s1 + $0x400] sm:$0xff] }
  0x92   :  { %3984 = vmatpush1.bf16.msra.mxu1 %v3983_v18  ;;  %v365_v18 = vld [vmem:[%s7681_s1 + $0x998] sm:$0xff]  ;;  %v187_v16 = vld [vmem:[%s7681_s1 + $0x408] sm:$0xff]  ;;  %v246_v49 = vld [vmem:[%s7681_s1 + $0x5e0] sm:$0xff] }
  0x93   :  { %3986 = vmatprep.subr.bf16.mxu1 %v3985_v20  ;;  %v375_v20 = vld [vmem:[%s7681_s1 + $0x9e8] sm:$0xff]  ;;  %v217_v15 = vld [vmem:[%s7681_s1 + $0x4f8] sm:$0xff]  ;;  %v256_v51 = vld [vmem:[%s7681_s1 + $0x630] sm:$0xff] }
  0x94   :  { %1035 = vmatmul.mubr.f32.gmra.mrb[24].mxu0 %v5132_v41  ;;  %v4009_v27 = vpack.c.bf16 %v375_v20, %v365_v18  ;;  %v197_v18 = vld [vmem:[%s7681_s1 + $0x458] sm:$0xff]  ;;  %v4021_v20 = vpack.c.bf16 %v435_v58, %v425_v10  ;;  %v286_v62 = vld [vmem:[%s7681_s1 + $0x720] sm:$0xff]  ;;  %v296_v0 = vld [vmem:[%s7681_s1 + $0x770] sm:$0xff] }
  0x95   :  { %1040 = vmatprep.mubr.f32.mxu0 %v5151_v48  ;;  %v327_v10 = vld [vmem:[%s7681_s1 + $0x868] sm:$0xff]  ;;  %v337_v58 = vld [vmem:[%s7681_s1 + $0x8b8] sm:$0xff] }
  0x96   :  { %3988 = vmatpush1.bf16.msra.mxu1 %v3987_v25  ;;  %v106_v25 = vld [vmem:[%s7681_s1 + $0x180] sm:$0xff] }
  0x97   :  { %3990 = vmatprep.subr.bf16.mxu1 %v3989_v26  ;;  %v116_v26 = vld [vmem:[%s7681_s1 + $0x1d0] sm:$0xff] }
  0x98   :  { %1041 = vmatmul.mubr.f32.gmra.mrb[26].mxu0 %v5170_v61  ;;  %v4037_v50 = vpack.c.bf16 %v116_v26, %v106_v25  ;;  %v196_v25 = vld [vmem:[%s7681_s1 + $0x450] sm:$0xff]  ;;  %v4051_v26 = vpack.c.bf16 %v197_v18, %v187_v16  ;;  %v347_v16 = vld [vmem:[%s7681_s1 + $0x908] sm:$0xff]  ;;  %v357_v18 = vld [vmem:[%s7681_s1 + $0x958] sm:$0xff] }
  0x99   :  { %1046 = vmatprep.mubr.f32.mxu0 %v5189_v5  ;;  %v4053_v29 = vpack.c.bf16 %v196_v25, %v186_v31  ;;  %v367_v31 = vld [vmem:[%s7681_s1 + $0x9a8] sm:$0xff]  ;;  %v377_v25 = vld [vmem:[%s7681_s1 + $0x9f8] sm:$0xff] }
  0x9a   :  { %3992 = vmatpush1.bf16.msra.mxu1 %v3991_v34  ;;  %v5661_v34 = vld [vmem:[%s7682_s0 + $0x28] sm:$0xff] }
  0x9b   :  { %3994 = vmatprep.subr.bf16.mxu1 %v3993_v35  ;;  %v385_v35 = vld [vmem:[%s7681_s1 + $0xa38] sm:$0xff] }
  0x9c   :  { %1047 = vmatmul.mubr.f32.gmra.mrb[28].mxu0 %v5204_v14  ;;  %v4013_v44 = vpack.c.bf16 %v395_v36, %v385_v35  ;;  %v216_v35 = vld [vmem:[%s7681_s1 + $0x4f0] sm:$0xff] }
  0x9d   :  { %1052 = vmatprep.mubr.f32.mxu0 %v5217_v19 }
  0x9e   :  { %3996 = vmatpush1.bf16.msra.mxu1 %v3995_v42  ;;  %v136_v42 = vld [vmem:[%s7681_s1 + $0x270] sm:$0xff] }
  0x9f   :  { %3998 = vmatprep.subr.bf16.mxu1 %v3997_v45  ;;  %v384_v45 = vld [vmem:[%s7681_s1 + $0xa30] sm:$0xff] }
  0xa0   :  { %1053 = vmatmul.mubr.f32.gmra.mrb[30].mxu0 %v5232_v24  ;;  %v4015_v43 = vpack.c.bf16 %v394_v46, %v384_v45 }
  0xa1   :  { %1123 = vmatprep.mubr.f32.mxu0 %v7692_v3 }
  0xa2   :  { %4000 = vmatpush1.bf16.msra.mxu1 %v3999_v52  ;;  %v4041_v52 = vpack.c.bf16 %v136_v42, %v126_v28  ;;  %v226_v28 = vld [vmem:[%s7681_s1 + $0x540] sm:$0xff]  ;;  %v236_v42 = vld [vmem:[%s7681_s1 + $0x590] sm:$0xff] }
  0xa3   :  { %4002 = vmatprep.subr.bf16.mxu1 %v4001_v56  ;;  %v146_v56 = vld [vmem:[%s7681_s1 + $0x2c0] sm:$0xff]  ;;  %v4061_v45 = vpack.c.bf16 %v236_v42, %v226_v28 }
  0xa4   :  { %3619 = vmatmul.mubr.msk.f32.vlgmr.msra.gmra.mrb[16].mxu0 %vm438_vm3, %v5629_v17  ;;  %v4045_v7 = vpack.c.bf16 %v156_v59, %v146_v56  ;;  %v276_v56 = vld [vmem:[%s7681_s1 + $0x6d0] sm:$0xff]  ;;  %v287_v59 = vld [vmem:[%s7681_s1 + $0x728] sm:$0xff] }
  0xa5   :  { %4030 = vmatpush1.bf16.msra.mxu0 %v4029_v2  ;;  %1129 = vmatprep.mubr.f32.mxu0 %v7692_v3  ;;  %v4017_v2 = vpack.c.bf16 %v415_v53, %v405_v54  ;;  %v4065_v54 = vpack.c.bf16 %v256_v51, %v246_v49  ;;  %v427_v49 = vld [vmem:[%s7681_s1 + $0xb88] sm:$0xff]  ;;  %v437_v51 = vld [vmem:[%s7681_s1 + $0xbd8] sm:$0xf] }
  0xa6   :  { %4004 = vmatpush1.bf16.msra.mxu1 %v4003_v4  ;;  %4032 = vmatprep.subr.bf16.mxu0 %v4031_v6  ;;  %v404_v4 = vld [vmem:[%s7681_s1 + $0xad0] sm:$0xff]  ;;  %v414_v6 = vld [vmem:[%s7681_s1 + $0xb20] sm:$0xff] }
  0xa7   :  { %4006 = vmatprep.subr.bf16.mxu1 %v4005_v1  ;;  %v166_v1 = vld [vmem:[%s7681_s1 + $0x360] sm:$0xff]  ;;  %v4019_v13 = vpack.c.bf16 %v414_v6, %v404_v4 }
  0xa8   :  { %3620 = vmatmul.mubr.msk.f32.gmra.mrb[18].mxu0 %vm438_vm3, %v5661_v34  ;;  %v306_v6 = vld [vmem:[%s7681_s1 + $0x7c0] sm:$0xff] }
  0xa9   :  { %4034 = vmatpush1.bf16.msra.mxu0 %v4033_v21  ;;  %1135 = vmatprep.mubr.f32.mxu0 %v7692_v3  ;;  %v424_v21 = vld [vmem:[%s7681_s1 + $0xb70] sm:$0xff] }
  0xaa   :  { %4008 = vmatpush1.bf16.msra.mxu1 %v4007_v23  ;;  %4036 = vmatprep.subr.bf16.mxu0 %v4035_v9  ;;  %v434_v23 = vld [vmem:[%s7681_s1 + $0xbc0] sm:$0xf] }
  0xab   :  { %4010 = vmatprep.subr.bf16.mxu1 %v4009_v27  ;;  %v4024_v27 = vpack.c.bf16 %v434_v23, %v424_v21  ;;  %v4083_v21 = vpack.c.bf16 %v357_v18, %v347_v16  ;;  %v346_v23 = vld [vmem:[%s7681_s1 + $0x900] sm:$0xff] }
  0xac   :  { %3621 = vmatmul.mubr.msk.f32.gmra.mrb[20].mxu0 %vm438_vm3, %v5687_v47 }
  0xad   :  { %4038 = vmatpush1.bf16.msra.mxu0 %v4037_v50  ;;  %1141 = vmatprep.mubr.f32.mxu0 %v7692_v3  ;;  %v5807_v50 = vld [vmem:[%s7682_s0 + $0xa0] sm:$0xff] }
  0xae   :  { %4012 = vmatpush1.bf16.msra.mxu1 %v4011_v37  ;;  %4040 = vmatprep.subr.bf16.mxu0 %v4039_v39  ;;  %v4057_v37 = vpack.c.bf16 %v216_v35, %v206_v33  ;;  %v397_v33 = vld [vmem:[%s7681_s1 + $0xa98] sm:$0xff] }
  0xaf   :  { %4014 = vmatprep.subr.bf16.mxu1 %v4013_v44  ;;  %v5829_v44 = vld [vmem:[%s7682_s0 + $0xb8] sm:$0xff] }
  0xb0   :  { %3622 = vmatmul.mubr.msk.f32.gmra.mrb[22].mxu0 %vm438_vm3, %v5716_v63 }
  0xb1   :  { %1237 = vmatmul.mubr.f32.vlgmr.msra.gmra.mrb[32].mxu1 %v4994_v38  ;;  %4042 = vmatpush1.bf16.msra.mxu0 %v4041_v52  ;;  %v176_v38 = vld [vmem:[%s7681_s1 + $0x3b0] sm:$0xff]  ;;  %v267_v52 = vld [vmem:[%s7681_s1 + $0x688] sm:$0xff] }
  0xb2   :  { %4016 = vmatpush1.bf16.msra.mxu1 %v4015_v43  ;;  %1242 = vmatprep.mubr.f32.mxu1 %v4999_v40  ;;  %v5750_v40 = vld [vmem:[%s7682_s0 + $0x70] sm:$0xff]  ;;  %v4049_v9 = vpack.c.bf16 %v176_v38, %v166_v1  ;;  %v266_v43 = vld [vmem:[%s7681_s1 + $0x680] sm:$0xff]  ;;  %v4079_v38 = vpack.c.bf16 %v337_v58, %v327_v10 }
  0xb3   :  { %1147 = vmatprep.mubr.f32.mxu0 %v7692_v3  ;;  %4044 = vmatprep.subr.bf16.mxu0 %v4043_v60 }
  0xb4   :  { %3623 = vmatmul.mubr.msk.f32.gmra.mrb[24].mxu0 %vm438_vm3, %v5750_v40  ;;  %4018 = vmatprep.subr.bf16.mxu1 %v4017_v2  ;;  %v307_v2 = vld [vmem:[%s7681_s1 + $0x7c8] sm:$0xff] }
  0xb5   :  { %1243 = vmatmul.mubr.f32.gmra.mrb[34].mxu1 %v5030_v55  ;;  %4046 = vmatpush1.bf16.msra.mxu0 %v4045_v7  ;;  %v5775_v55 = vld [vmem:[%s7682_s0 + $0x88] sm:$0xff]  ;;  %v316_v7 = vld [vmem:[%s7681_s1 + $0x810] sm:$0xff] }
  0xb6   :  { %1248 = vmatprep.mubr.f32.mxu1 %v5035_v57  ;;  %1153 = vmatprep.mubr.f32.mxu0 %v7692_v3  ;;  %v207_v57 = vld [vmem:[%s7681_s1 + $0x4a8] sm:$0xff]  ;;  %v4077_v1 = vpack.c.bf16 %v316_v7, %v306_v6  ;;  %v4421_v6 = vld [vmem:[%s7682_s0 + $0x78] sm:$0xff] }
  0xb7   :  { %4048 = vmatprep.subr.bf16.mxu0 %v4047_v11  ;;  %4020 = vmatpush1.bf16.msra.mxu1 %v4019_v13  ;;  %v4055_v36 = vpack.c.bf16 %v217_v15, %v207_v57  ;;  %v326_v11 = vld [vmem:[%s7681_s1 + $0x860] sm:$0xff]  ;;  %v336_v13 = vld [vmem:[%s7681_s1 + $0x8b0] sm:$0xff]  ;;  %v4422_v7 = vld [vmem:[%s7682_s0 + $0x98] sm:$0xff] }
  0xb8   :  { %3624 = vmatmul.mubr.msk.f32.gmra.mrb[26].mxu0 %vm438_vm3, %v5775_v55  ;;  %4023 = vmatprep.subr.msk.bf16.mxu1 %vm4553_vm2, %v4021_v20  ;;  %v4081_v20 = vpack.c.bf16 %v336_v13, %v326_v11  ;;  %v366_v57 = vld [vmem:[%s7681_s1 + $0x9a0] sm:$0xff]  ;;  %v376_v15 = vld [vmem:[%s7681_s1 + $0x9f0] sm:$0xff] }
  0xb9   :  { %1249 = vmatmul.mubr.f32.gmra.mrb[36].mxu1 %v5066_v8  ;;  %4050 = vmatpush1.bf16.msra.mxu0 %v4049_v9  ;;  %v227_v8 = vld [vmem:[%s7681_s1 + $0x548] sm:$0xff]  ;;  %v356_v9 = vld [vmem:[%s7681_s1 + $0x950] sm:$0xff]  ;;  %v4089_v35 = vpack.c.bf16 %v376_v15, %v366_v57 }
  0xba   :  { %1254 = vmatprep.mubr.f32.mxu1 %v5071_v12  ;;  %1159 = vmatprep.mubr.f32.mxu0 %v7692_v3  ;;  %v237_v12 = vld [vmem:[%s7681_s1 + $0x598] sm:$0xff] }
  0xbb   :  { %4052 = vmatprep.subr.bf16.mxu0 %v4051_v26  ;;  %4026 = vmatpush1.bf16.msk.msra.mxu1 %vm4553_vm2, %v4024_v27  ;;  %v4059_v39 = vpack.c.bf16 %v237_v12, %v227_v8  ;;  %v4085_v26 = vpack.c.bf16 %v356_v9, %v346_v23  ;;  %v4087_v27 = vpack.c.bf16 %v377_v25, %v367_v31  ;;  %v386_v8 = vld [vmem:[%s7681_s1 + $0xa40] sm:$0xff]  ;;  %v396_v12 = vld [vmem:[%s7681_s1 + $0xa90] sm:$0xff] }
  0xbc   :  { %3625 = vmatmul.mubr.msk.f32.gmra.mrb[28].mxu0 %vm438_vm3, %v5807_v50  ;;  %v4093_v28 = vpack.c.bf16 %v396_v12, %v386_v8 }
  0xbd   :  { %1255 = vmatmul.mubr.f32.gmra.mrb[38].mxu1 %v5096_v22  ;;  %4054 = vmatpush1.bf16.msra.mxu0 %v4053_v29  ;;  %v247_v22 = vld [vmem:[%s7681_s1 + $0x5e8] sm:$0xff] }
  0xbe   :  { %1260 = vmatprep.mubr.f32.mxu1 %v5113_v32  ;;  %1165 = vmatprep.mubr.f32.mxu0 %v7692_v3  ;;  %v257_v32 = vld [vmem:[%s7681_s1 + $0x638] sm:$0xff]  ;;  %v387_v29 = vld [vmem:[%s7681_s1 + $0xa48] sm:$0xff] }
  0xbf   :  { %4056 = vmatprep.subr.bf16.mxu0 %v4055_v36  ;;  %v4063_v46 = vpack.c.bf16 %v257_v32, %v247_v22  ;;  %v4091_v36 = vpack.c.bf16 %v397_v33, %v387_v29  ;;  %v406_v22 = vld [vmem:[%s7681_s1 + $0xae0] sm:$0xff]  ;;  %v416_v32 = vld [vmem:[%s7681_s1 + $0xb30] sm:$0xff] }
  0xc0   :  { %3626 = vmatmul.mubr.msk.f32.gmra.mrb[30].mxu0 %vm438_vm3, %v5829_v44 }
  0xc1   :  { %1261 = vmatmul.mubr.f32.gmra.mrb[40].mxu1 %v5132_v41  ;;  %4058 = vmatpush1.bf16.msra.mxu0 %v4057_v37  ;;  %v277_v41 = vld [vmem:[%s7681_s1 + $0x6d8] sm:$0xff]  ;;  %v407_v37 = vld [vmem:[%s7681_s1 + $0xae8] sm:$0xff] }
  0xc2   :  { %1266 = vmatprep.mubr.f32.mxu1 %v5151_v48  ;;  %4060 = vmatprep.subr.bf16.mxu0 %v4059_v39  ;;  %v4410_v48 = vld [vmem:[%s7682_s0 + $0x8] sm:$0xff]  ;;  %v4067_v53 = vpack.c.bf16 %v277_v41, %v267_v52  ;;  %v417_v39 = vld [vmem:[%s7681_s1 + $0xb38] sm:$0xff]  ;;  %v4412_v41 = vld [vmem:[%s7682_s0 + $0x20] sm:$0xff] }
  0xc3   :  { %1462 = vmatprep.mubr.f32.mxu0 %v4410_v48  ;;  %v4095_v42 = vpack.c.bf16 %v417_v39, %v407_v37  ;;  %v4097_v48 = vpack.c.bf16 %v416_v32, %v406_v22 }
  0xc5   :  { %1267 = vmatmul.mubr.f32.gmra.mrb[42].mxu1 %v5170_v61  ;;  %4062 = vmatpush1.bf16.msra.mxu0 %v4061_v45  ;;  %v297_v61 = vld [vmem:[%s7681_s1 + $0x778] sm:$0xff] }
  0xc6   :  { %1272 = vmatprep.mubr.f32.mxu1 %v5189_v5  ;;  %4064 = vmatprep.subr.bf16.mxu0 %v4063_v46  ;;  %v4069_v5 = vpack.c.bf16 %v276_v56, %v266_v43  ;;  %v4071_v60 = vpack.c.bf16 %v297_v61, %v287_v59  ;;  %v4411_v46 = vld [vmem:[%s7682_s0] sm:$0xff]  ;;  %v436_v43 = vld [vmem:[%s7681_s1 + $0xbd0] sm:$0xf]  ;;  %v4413_v56 = vld [vmem:[%s7682_s0 + $0x18] sm:$0xff] }
  0xc7   :  { %v4414_v59 = vld [vmem:[%s7682_s0 + $0x38] sm:$0xff] }
  0xc9   :  { %1273 = vmatmul.mubr.f32.gmra.mrb[44].mxu1 %v5204_v14  ;;  %4066 = vmatpush1.bf16.msra.mxu0 %v4065_v54  ;;  %v317_v14 = vld [vmem:[%s7681_s1 + $0x818] sm:$0xff]  ;;  %v4099_v54 = vpack.c.bf16 %v437_v51, %v427_v49 }
  0xca   :  { %1278 = vmatprep.mubr.f32.mxu1 %v5217_v19  ;;  %4068 = vmatprep.subr.bf16.mxu0 %v4067_v53  ;;  %v4073_v19 = vpack.c.bf16 %v296_v0, %v286_v62  ;;  %v4075_v4 = vpack.c.bf16 %v317_v14, %v307_v2  ;;  %v426_v53 = vld [vmem:[%s7681_s1 + $0xb80] sm:$0xff]  ;;  %v4417_v62 = vld [vmem:[%s7682_s0 + $0x48] sm:$0xff] }
  0xcb   :  { %v4102_v61 = vpack.c.bf16 %v436_v43, %v426_v53  ;;  %v4418_v0 = vld [vmem:[%s7682_s0 + $0x68] sm:$0xff]  ;;  %v4419_v2 = vld [vmem:[%s7682_s0 + $0x60] sm:$0xff] }
  0xcc   :  { %v4420_v14 = vld [vmem:[%s7682_s0 + $0x80] sm:$0xff] }
  0xcd   :  { %1279 = vmatmul.mubr.f32.gmra.mrb[46].mxu1 %v5232_v24  ;;  %4070 = vmatpush1.bf16.msra.mxu0 %v4069_v5  ;;  %v4415_v5 = vld [vmem:[%s7682_s0 + $0x30] sm:$0xff] }
  0xce   :  { %1349 = vmatprep.mubr.f32.mxu1 %v7692_v3  ;;  %4072 = vmatprep.subr.bf16.mxu0 %v4071_v60  ;;  %v4416_v60 = vld [vmem:[%s7682_s0 + $0x50] sm:$0xff] }
  0xd1   :  { %3629 = vmatmul.mubr.msk.f32.vlgmr.msra.gmra.mrb[32].mxu1 %vm438_vm3, %v5629_v17  ;;  %4074 = vmatpush1.bf16.msra.mxu0 %v4073_v19 }
  0xd2   :  { %1355 = vmatprep.mubr.f32.mxu1 %v7692_v3  ;;  %4076 = vmatprep.subr.bf16.mxu0 %v4075_v4 }
  0xd5   :  { %3630 = vmatmul.mubr.msk.f32.gmra.mrb[34].mxu1 %vm438_vm3, %v5661_v34  ;;  %4078 = vmatpush1.bf16.msra.mxu0 %v4077_v1  ;;  %v4423_v1 = vld [vmem:[%s7682_s0 + $0x90] sm:$0xff] }
  0xd6   :  { %1361 = vmatprep.mubr.f32.mxu1 %v7692_v3  ;;  %4080 = vmatprep.subr.bf16.mxu0 %v4079_v38  ;;  %v4424_v38 = vld [vmem:[%s7682_s0 + $0xb0] sm:$0xff]  ;;  %s4429_s0 = smov 28  }
  0xd9   :  { %3631 = vmatmul.mubr.msk.f32.gmra.mrb[36].mxu1 %vm438_vm3, %v5687_v47  ;;  %4082 = vmatpush1.bf16.msra.mxu0 %v4081_v20 }
  0xda   :  { %1367 = vmatprep.mubr.f32.mxu1 %v7692_v3  ;;  %4084 = vmatprep.subr.bf16.mxu0 %v4083_v21 }
  0xdd   :  { %3632 = vmatmul.mubr.msk.f32.gmra.mrb[38].mxu1 %vm438_vm3, %v5716_v63  ;;  %4086 = vmatpush1.bf16.msra.mxu0 %v4085_v26 }
  0xde   :  { %1373 = vmatprep.mubr.f32.mxu1 %v7692_v3  ;;  %4088 = vmatprep.subr.bf16.mxu0 %v4087_v27 }
  0xe1   :  { %3633 = vmatmul.mubr.msk.f32.gmra.mrb[40].mxu1 %vm438_vm3, %v5750_v40  ;;  %4090 = vmatpush1.bf16.msra.mxu0 %v4089_v35 }
  0xe2   :  { %1379 = vmatprep.mubr.f32.mxu1 %v7692_v3  ;;  %4092 = vmatprep.subr.bf16.mxu0 %v4091_v36 }
  0xe4   :  { %v5961_v45 = vpop.f32.mrb[0].mxu1  ;;  %1463 = vmatmul.mubr.f32.vlgmr.msra.gmra.mrb[32].mxu0 %v4411_v46 }
  0xe5   :  { %3634 = vmatmul.mubr.msk.f32.gmra.mrb[42].mxu1 %vm438_vm3, %v5775_v55  ;;  %v5974_v52 = vpop.f32.mrb[1].mxu1  ;;  %1468 = vmatprep.mubr.f32.mxu0 %v4412_v41 }
  0xe6   :  { %1385 = vmatprep.mubr.f32.mxu1 %v7692_v3  ;;  %4094 = vmatpush1.bf16.msra.mxu0 %v4093_v28 }
  0xe7   :  { %4096 = vmatprep.subr.bf16.mxu0 %v4095_v42 }
  0xe8   :  { %1469 = vmatmul.mubr.f32.gmra.mrb[34].mxu0 %v4413_v56 }
  0xe9   :  { %3635 = vmatmul.mubr.msk.f32.gmra.mrb[44].mxu1 %vm438_vm3, %v5807_v50  ;;  %1474 = vmatprep.mubr.f32.mxu0 %v4414_v59 }
  0xea   :  { %1391 = vmatprep.mubr.f32.mxu1 %v7692_v3  ;;  %4098 = vmatpush1.bf16.msra.mxu0 %v4097_v48 }
  0xeb   :  { %4101 = vmatprep.subr.msk.bf16.mxu0 %vm4553_vm2, %v4099_v54 }
  0xec   :  { %1475 = vmatmul.mubr.f32.gmra.mrb[36].mxu0 %v4415_v5 }
  0xed   :  { %3636 = vmatmul.mubr.msk.f32.gmra.mrb[46].mxu1 %vm438_vm3, %v5829_v44  ;;  %1480 = vmatprep.mubr.f32.mxu0 %v4416_v60 }
  0xee   :  { %4104 = vmatpush1.bf16.msk.msra.mxu0 %vm4553_vm2, %v4102_v61 }
  0xef   :  { %v679_v19 = vpop.f32.mrb[2].mxu1 }
  0xf0   :  { %1481 = vmatmul.mubr.f32.gmra.mrb[38].mxu0 %v4417_v62  ;;  %v681_v4 = vpop.f32.mrb[3].mxu1 }
  0xf1   :  { %1486 = vmatprep.mubr.f32.mxu0 %v4418_v0 }
  0xf3   :  { %v685_v10 = vpop.f32.mrb[4].mxu1 }
  0xf4   :  { %1487 = vmatmul.mubr.f32.gmra.mrb[40].mxu0 %v4419_v2  ;;  %v687_v58 = vpop.f32.mrb[5].mxu1 }
  0xf5   :  { %1492 = vmatprep.mubr.f32.mxu0 %v4420_v14 }
  0xf7   :  { %v691_v11 = vpop.f32.mrb[6].mxu1 }
  0xf8   :  { %1493 = vmatmul.mubr.f32.gmra.mrb[42].mxu0 %v4421_v6  ;;  %v693_v13 = vpop.f32.mrb[7].mxu1 }
  0xf9   :  { %1498 = vmatprep.mubr.f32.mxu0 %v4422_v7 }
  0xfb   :  { %v697_v16 = vpop.f32.mrb[8].mxu1 }
  0xfc   :  { %1499 = vmatmul.mubr.f32.gmra.mrb[44].mxu0 %v4423_v1  ;;  %v699_v18 = vpop.f32.mrb[9].mxu1 }
  0xfd   :  { %1504 = vmatprep.mubr.f32.mxu0 %v4424_v38 }
  0xff   :  { %v703_v20 = vpop.f32.mrb[10].mxu1 }
 0x100   :  { %1505 = vmatmul.mubr.f32.gmra.mrb[46].mxu0 %v5232_v24  ;;  %v705_v21 = vpop.f32.mrb[11].mxu1 }
 0x101   :  { %1575 = vmatprep.mubr.f32.mxu0 %v7692_v3 }
 0x103   :  { %v709_v23 = vpop.f32.mrb[12].mxu1 }
 0x104   :  { %3639 = vmatmul.mubr.msk.f32.vlgmr.msra.gmra.mrb[32].mxu0 %vm438_vm3, %v5629_v17  ;;  %v711_v9 = vpop.f32.mrb[13].mxu1 }
 0x105   :  { %1581 = vmatprep.mubr.f32.mxu0 %v7692_v3 }
 0x107   :  { %v715_v24 = vpop.f32.mrb[14].mxu1 }
 0x108   :  { %3640 = vmatmul.mubr.msk.f32.gmra.mrb[34].mxu0 %vm438_vm3, %v5661_v34  ;;  %v717_v31 = vpop.f32.mrb[15].mxu1 }
 0x109   :  { %1587 = vmatprep.mubr.f32.mxu0 %v7692_v3 }
 0x10c   :  { %3641 = vmatmul.mubr.msk.f32.gmra.mrb[36].mxu0 %vm438_vm3, %v5687_v47 }
 0x10d   :  { %1593 = vmatprep.mubr.f32.mxu0 %v7692_v3 }
 0x110   :  { %3642 = vmatmul.mubr.msk.f32.gmra.mrb[38].mxu0 %vm438_vm3, %v5716_v63 }
 0x111   :  { %1599 = vmatprep.mubr.f32.mxu0 %v7692_v3 }
 0x114   :  { %3643 = vmatmul.mubr.msk.f32.gmra.mrb[40].mxu0 %vm438_vm3, %v5750_v40 }
 0x115   :  { %1605 = vmatprep.mubr.f32.mxu0 %v7692_v3 }
 0x117   :  { %v560_v17 = vpop.f32.mrb[0].mxu0 }
 0x118   :  { %v6049_v34 = vadd.f32 %v5961_v45, %v560_v17  ;;  %3644 = vmatmul.mubr.msk.f32.gmra.mrb[42].mxu0 %vm438_vm3, %v5775_v55  ;;  %v562_v47 = vpop.f32.mrb[1].mxu0 }
 0x119   :  { %v6054_v25 = vadd.f32 %v5974_v52, %v562_v47  ;;  %1611 = vmatprep.mubr.f32.mxu0 %v7692_v3 }
 0x11a   :  { %7732 = vst [vmem:[#allocation3_spill] sm:$0xff] %v6049_v34  ;;  %v1648_v63 = vrot.slane %v6049_v34, 1 }
 0x11b   :  { %7733 = vst [vmem:[#allocation4_spill] sm:$0xff] %v6054_v25  ;;  %v1649_v26 = vrot.slane %v6054_v25, 1  ;;  %v566_v40 = vpop.f32.mrb[2].mxu0 }
 0x11c   :  { %v6059_v27 = vadd.f32 %v679_v19, %v566_v40  ;;  %3645 = vmatmul.mubr.msk.f32.gmra.mrb[44].mxu0 %vm438_vm3, %v5807_v50  ;;  %1664 = vrot.lane.b32.xlu0 %v1648_v63, %s4429_s0  ;;  %v568_v55 = vpop.f32.mrb[3].mxu0 }
 0x11d   :  { %v6064_v57 = vadd.f32 %v681_v4, %v568_v55  ;;  %1666 = vrot.lane.b32.xlu1 %v1649_v26, %s4429_s0  ;;  %1617 = vmatprep.mubr.f32.mxu0 %v7692_v3 }
 0x11f   :  { %v572_v15 = vpop.f32.mrb[4].mxu0 }
 0x120   :  { %v6068_v29 = vadd.f32 %v685_v10, %v572_v15  ;;  %3646 = vmatmul.mubr.msk.f32.gmra.mrb[46].mxu0 %vm438_vm3, %v5829_v44  ;;  %v574_v33 = vpop.f32.mrb[5].mxu0 }
 0x121   :  { %v6072_v35 = vadd.f32 %v687_v58, %v574_v33 }
 0x122   :  { %7734 = vst [vmem:[#allocation5_spill] sm:$0xff] %v6068_v29 }
 0x123   :  { %v578_v50 = vpop.f32.mrb[6].mxu0 }
 0x124   :  { %v6074_v36 = vadd.f32 %v691_v11, %v578_v50  ;;  %v580_v8 = vpop.f32.mrb[7].mxu0 }
 0x125   :  { %v6076_v12 = vadd.f32 %v693_v13, %v580_v8 }
 0x126   :  { %7735 = vst [vmem:[#allocation6_spill] sm:$0xff] %v6074_v36 }
 0x127   :  { %v584_v37 = vpop.f32.mrb[8].mxu0 }
 0x128   :  { %v6078_v39 = vadd.f32 %v697_v16, %v584_v37  ;;  %v586_v28 = vpop.f32.mrb[9].mxu0 }
 0x129   :  { %v6080_v42 = vadd.f32 %v699_v18, %v586_v28 }
 0x12a   :  { %7736 = vst [vmem:[#allocation7_spill] sm:$0xff] %v6078_v39 }
 0x12b   :  { %7737 = vst [vmem:[#allocation8_spill] sm:$0xff] %v6080_v42  ;;  %v590_v22 = vpop.f32.mrb[10].mxu0 }
 0x12c   :  { %v6082_v32 = vadd.f32 %v703_v20, %v590_v22  ;;  %v592_v45 = vpop.f32.mrb[11].mxu0 }
 0x12d   :  { %v6084_v44 = vadd.f32 %v705_v21, %v592_v45 }
 0x12e   :  { %7738 = vst [vmem:[#allocation9_spill] sm:$0xff] %v6082_v32 }
 0x12f   :  { %7739 = vst [vmem:[#allocation10_spill] sm:$0xff] %v6084_v44  ;;  %v596_v46 = vpop.f32.mrb[12].mxu0 }
 0x130   :  { %v6086_v49 = vadd.f32 %v709_v23, %v596_v46  ;;  %v598_v51 = vpop.f32.mrb[13].mxu0 }
 0x131   :  { %v6088_v52 = vadd.f32 %v711_v9, %v598_v51 }
 0x132   :  { %7740 = vst [vmem:[#allocation11_spill] sm:$0xff] %v6086_v49 }
 0x133   :  { %7741 = vst [vmem:[#allocation12_spill] sm:$0xff] %v6088_v52  ;;  %v602_v41 = vpop.f32.mrb[14].mxu0 }
 0x134   :  { %v6090_v48 = vadd.f32 %v715_v24, %v602_v41  ;;  %v604_v54 = vpop.f32.mrb[15].mxu0 }
 0x135   :  { %v6092_v53 = vadd.f32 %v717_v31, %v604_v54 }
 0x136   :  { %7742 = vst [vmem:[#allocation13_spill] sm:$0xff] %v6090_v48 }
 0x137   :  { %7743 = vst [vmem:[#allocation14_spill] sm:$0xff] %v6092_v53 }
 0x144   :  { %v6094_v43 = vpop.f32.mrb[16].mxu1 }
 0x145   :  { %v6096_v56 = vpop.f32.mrb[17].mxu1 }
 0x146   :  { %v1906_v59 = vrot.slane %v6096_v56, 1  ;;  %v1962_v61 = vrot.slane %v6096_v56, 2 }
 0x148   :  { %v6100_v5 = vpop.f32.mrb[18].mxu1  ;;  %1978 = vrot.lane.b32.xlu0 %v1962_v61, %s4430_s30  ;;  %1914 = vrot.lane.b32.xlu1 %v1906_v59, %s4429_s0 }
 0x149   :  { %v6104_v60 = vpop.f32.mrb[19].mxu1 }
 0x14a   :  { %v1907_v62 = vrot.slane %v6104_v60, 1  ;;  %v1964_v0 = vrot.slane %v6104_v60, 2 }
 0x14c   :  { %v6108_v2 = vpop.f32.mrb[20].mxu1  ;;  %1982 = vrot.lane.b32.xlu0 %v1964_v0, %s4430_s30  ;;  %1916 = vrot.lane.b32.xlu1 %v1907_v62, %s4429_s0 }
 0x14d   :  { %v6112_v14 = vpop.f32.mrb[21].mxu1 }
 0x14e   :  { %v1908_v19 = vrot.slane %v6112_v14, 1  ;;  %v1966_v4 = vrot.slane %v6112_v14, 2 }
 0x150   :  { %v6116_v6 = vpop.f32.mrb[22].mxu1  ;;  %1986 = vrot.lane.b32.xlu0 %v1966_v4, %s4430_s30  ;;  %1918 = vrot.lane.b32.xlu1 %v1908_v19, %s4429_s0 }
 0x151   :  { %7744 = vst [vmem:[#allocation15_spill] sm:$0xff] %v6116_v6  ;;  %v6120_v7 = vpop.f32.mrb[23].mxu1 }
 0x152   :  { %v1909_v10 = vrot.slane %v6120_v7, 1  ;;  %v1968_v38 = vrot.slane %v6120_v7, 2 }
 0x154   :  { %v6123_v58 = vpop.f32.mrb[24].mxu1  ;;  %1920 = vrot.lane.b32.xlu1 %v1909_v10, %s4429_s0 }
 0x155   :  { %7745 = vst [vmem:[#allocation16_spill] sm:$0xff] %v6123_v58  ;;  %v6126_v1 = vpop.f32.mrb[25].mxu1 }
 0x156   :  { %v1910_v11 = vrot.slane %v6126_v1, 1  ;;  %v1970_v18 = vrot.slane %v6126_v1, 2 }
 0x158   :  { %v6130_v13 = vpop.f32.mrb[26].mxu1  ;;  %1922 = vrot.lane.b32.xlu0 %v1910_v11, %s4429_s0  ;;  %1990 = vrot.lane.b32.xlu1 %v1968_v38, %s4430_s30 }
 0x159   :  { %7746 = vst [vmem:[#allocation17_spill] sm:$0xff] %v6130_v13  ;;  %v6134_v16 = vpop.f32.mrb[27].mxu1 }
 0x15a   :  { %v1911_v20 = vrot.slane %v6134_v16, 1  ;;  %v1972_v9 = vrot.slane %v6134_v16, 2 }
 0x15c   :  { %v6138_v21 = vpop.f32.mrb[28].mxu1  ;;  %1994 = vrot.lane.b32.xlu0 %v1970_v18, %s4430_s30  ;;  %1924 = vrot.lane.b32.xlu1 %v1911_v20, %s4429_s0 }
 0x15d   :  { %7747 = vst [vmem:[#allocation18_spill] sm:$0xff] %v6138_v21  ;;  %v6142_v23 = vpop.f32.mrb[29].mxu1 }
 0x15e   :  { %v1912_v24 = vrot.slane %v6142_v23, 1  ;;  %v1974_v47 = vrot.slane %v6142_v23, 2 }
 0x160   :  { %v6146_v31 = vpop.f32.mrb[30].mxu1  ;;  %1926 = vrot.lane.b32.xlu0 %v1912_v24, %s4429_s0  ;;  %1998 = vrot.lane.b32.xlu1 %v1972_v9, %s4430_s30 }
 0x161   :  { %7748 = vst [vmem:[#allocation19_spill] sm:$0xff] %v6146_v31  ;;  %v6150_v17 = vpop.f32.mrb[31].mxu1 }
 0x162   :  { %v1913_v63 = vrot.slane %v6150_v17, 1  ;;  %v1976_v26 = vrot.slane %v6150_v17, 2 }
 0x164   :  { %2002 = vrot.lane.b32.xlu0 %v1974_v47, %s4430_s30  ;;  %1928 = vrot.lane.b32.xlu1 %v1913_v63, %s4429_s0 }
 0x168   :  { %2006 = vrot.lane.b32.xlu0 %v1976_v26, %s4430_s30 }
 0x177   :  { %v1125_v40 = vpop.f32.mrb[16].mxu0 }
 0x178   :  { %v1963_v55 = vrot.slane %v1125_v40, 2  ;;  %v6158_v15 = vpop.f32.mrb[17].mxu0  ;;  %v2058_v8 = vrot.slane %v1125_v40, 3 }
 0x179   :  { %v2059_v33 = vrot.slane %v6158_v15, 3 }
 0x17a   :  { %1980 = vrot.lane.b32.xlu1 %v1963_v55, %s4430_s30 }
 0x17b   :  { %2076 = vrot.lane.b32.xlu0 %v2059_v33, %s4431_s3  ;;  %v1131_v50 = vpop.f32.mrb[18].mxu0 }
 0x17c   :  { %v6163_v37 = vpop.f32.mrb[19].mxu0  ;;  %v1965_v45 = vrot.slane %v1131_v50, 2  ;;  %v2060_v54 = vrot.slane %v1131_v50, 3 }
 0x17d   :  { %7749 = vst [vmem:[#allocation20_spill] sm:$0xff] %v6163_v37  ;;  %v2061_v28 = vrot.slane %v6163_v37, 3 }
 0x17e   :  { %2074 = vrot.lane.b32.xlu1 %v2058_v8, %s4431_s3 }
 0x17f   :  { %2080 = vrot.lane.b32.xlu0 %v2061_v28, %s4431_s3  ;;  %v1137_v22 = vpop.f32.mrb[20].mxu0 }
 0x180   :  { %v2062_v46 = vrot.slane %v1137_v22, 3  ;;  %v6168_v51 = vpop.f32.mrb[21].mxu0  ;;  %v1967_v0 = vrot.slane %v1137_v22, 2 }
 0x181   :  { %7750 = vst [vmem:[#allocation21_spill] sm:$0xff] %v6168_v51  ;;  %v2063_v38 = vrot.slane %v6168_v51, 3 }
 0x182   :  { %1984 = vrot.lane.b32.xlu1 %v1965_v45, %s4430_s30 }
 0x183   :  { %2082 = vrot.lane.b32.xlu0 %v2062_v46, %s4431_s3  ;;  %v1143_v41 = vpop.f32.mrb[22].mxu0 }
 0x184   :  { %v1969_v59 = vrot.slane %v1143_v41, 2  ;;  %v6172_v61 = vpop.f32.mrb[23].mxu0  ;;  %v2064_v9 = vrot.slane %v1143_v41, 3 }
 0x185   :  { %7751 = vst [vmem:[#allocation22_spill] sm:$0xff] %v6172_v61  ;;  %v2065_v4 = vrot.slane %v6172_v61, 3 }
 0x186   :  { %2078 = vrot.lane.b32.xlu1 %v2060_v54, %s4431_s3 }
 0x187   :  { %1992 = vrot.lane.b32.xlu0 %v1969_v59, %s4430_s30  ;;  %v1149_v62 = vpop.f32.mrb[24].mxu0 }
 0x188   :  { %v6176_v19 = vpop.f32.mrb[25].mxu0  ;;  %v2066_v18 = vrot.slane %v1149_v62, 3  ;;  %v1971_v26 = vrot.slane %v1149_v62, 2 }
 0x189   :  { %7752 = vst [vmem:[#allocation23_spill] sm:$0xff] %v6176_v19  ;;  %v2067_v33 = vrot.slane %v6176_v19, 3 }
 0x18a   :  { %1988 = vrot.lane.b32.xlu1 %v1967_v0, %s4430_s30 }
 0x18b   :  { %2088 = vrot.lane.b32.xlu0 %v2065_v4, %s4431_s3  ;;  %v1155_v10 = vpop.f32.mrb[26].mxu0 }
 0x18c   :  { %v6182_v11 = vpop.f32.mrb[27].mxu0  ;;  %v1973_v47 = vrot.slane %v1155_v10, 2  ;;  %v2068_v55 = vrot.slane %v1155_v10, 3 }
 0x18d   :  { %7753 = vst [vmem:[#allocation24_spill] sm:$0xff] %v6182_v11  ;;  %v2069_v8 = vrot.slane %v6182_v11, 3 }
 0x18e   :  { %2084 = vrot.lane.b32.xlu1 %v2063_v38, %s4431_s3 }
 0x18f   :  { %2090 = vrot.lane.b32.xlu0 %v2066_v18, %s4431_s3  ;;  %v1161_v20 = vpop.f32.mrb[28].mxu0 }
 0x190   :  { %v6186_v24 = vpop.f32.mrb[29].mxu0  ;;  %v2070_v50 = vrot.slane %v1161_v20, 3  ;;  %v1975_v22 = vrot.slane %v1161_v20, 2 }
 0x191   :  { %7754 = vst [vmem:[#allocation25_spill] sm:$0xff] %v6186_v24  ;;  %v2071_v45 = vrot.slane %v6186_v24, 3 }
 0x192   :  { %2086 = vrot.lane.b32.xlu1 %v2064_v9, %s4431_s3 }
 0x193   :  { %2000 = vrot.lane.b32.xlu0 %v1973_v47, %s4430_s30  ;;  %v1167_v63 = vpop.f32.mrb[30].mxu0 }
 0x194   :  { %v6190_v40 = vpop.f32.mrb[31].mxu0  ;;  %v2072_v28 = vrot.slane %v1167_v63, 3  ;;  %v1977_v59 = vrot.slane %v1167_v63, 2 }
 0x195   :  { %7755 = vst [vmem:[#allocation26_spill] sm:$0xff] %v6190_v40  ;;  %v2073_v10 = vrot.slane %v6190_v40, 3 }
 0x196   :  { %1996 = vrot.lane.b32.xlu1 %v1971_v26, %s4430_s30 }
 0x197   :  { %2094 = vrot.lane.b32.xlu0 %v2068_v55, %s4431_s3  ;;  %v6221_v55 = vpop.permute.xlu1 %2669 }
 0x198   :  { %7760 = vst [vmem:[#allocation31_spill] sm:$0xff] %v6221_v55 }
 0x19a   :  { %2092 = vrot.lane.b32.xlu1 %v2067_v33, %s4431_s3 }
 0x19b   :  { %2098 = vrot.lane.b32.xlu0 %v2070_v50, %s4431_s3 }
 0x19e   :  { %2096 = vrot.lane.b32.xlu1 %v2069_v8, %s4431_s3 }
 0x19f   :  { %2102 = vrot.lane.b32.xlu0 %v2072_v28, %s4431_s3 }
 0x1a2   :  { %2004 = vrot.lane.b32.xlu1 %v1975_v22, %s4430_s30  ;;  %v6226_v22 = vpop.permute.xlu0 %2153 }
 0x1a4   :  { %v6202_v46 = vpop.f32.mrb[32].mxu1 }
 0x1a5   :  { %7756 = vst [vmem:[#allocation27_spill] sm:$0xff] %v6202_v46  ;;  %v2334_v41 = vrot.slane %v6202_v46, 1  ;;  %v1353_v54 = vpop.f32.mrb[33].mxu1 }
 0x1a6   :  { %2100 = vrot.lane.b32.xlu1 %v2071_v45, %s4431_s3  ;;  %v2478_v0 = vrot.slane %v1353_v54, 3  ;;  %v2335_v18 = vrot.slane %v1353_v54, 1  ;;  %v2422_v9 = vrot.slane %v1353_v54, 2 }
 0x1a7   :  { %2350 = vrot.lane.b32.xlu0 %v2334_v41, %s4429_s0 }
 0x1a8   :  { %v6207_v62 = vpop.f32.mrb[34].mxu1 }
 0x1a9   :  { %7757 = vst [vmem:[#allocation28_spill] sm:$0xff] %v6207_v62  ;;  %v1359_v4 = vpop.f32.mrb[35].mxu1  ;;  %v2336_v63 = vrot.slane %v6207_v62, 1 }
 0x1aa   :  { %2008 = vrot.lane.b32.xlu1 %v1977_v59, %s4430_s30  ;;  %v2337_v33 = vrot.slane %v1359_v4, 1  ;;  %v2423_v8 = vrot.slane %v1359_v4, 2  ;;  %v2480_v54 = vrot.slane %v1359_v4, 3 }
 0x1ab   :  { %2494 = vrot.lane.b32.xlu0 %v2478_v0, %s4431_s3  ;;  %v6231_v0 = vpop.permute.xlu1 %1666 }
 0x1ac   :  { %v6212_v38 = vpop.f32.mrb[36].mxu1  ;;  %7763 = vst [vmem:[#allocation34_spill] sm:$0xff] %v6231_v0 }
 0x1ad   :  { %7758 = vst [vmem:[#allocation29_spill] sm:$0xff] %v6212_v38  ;;  %v1365_v20 = vpop.f32.mrb[37].mxu1 }
 0x1ae   :  { %2104 = vrot.lane.b32.xlu1 %v2073_v10, %s4431_s3  ;;  %v2424_v45 = vrot.slane %v1365_v20, 2  ;;  %v2482_v10 = vrot.slane %v1365_v20, 3 }
 0x1af   :  { %2352 = vrot.lane.b32.xlu0 %v2335_v18, %s4429_s0 }
 0x1b0   :  { %v6216_v47 = vpop.f32.mrb[38].mxu1 }
 0x1b1   :  { %7759 = vst [vmem:[#allocation30_spill] sm:$0xff] %v6216_v47  ;;  %v1371_v26 = vpop.f32.mrb[39].mxu1  ;;  %v2340_v0 = vrot.slane %v6216_v47, 1 }
 0x1b2   :  { %2430 = vrot.lane.b32.xlu1 %v2422_v9, %s4430_s30  ;;  %v6237_v9 = vpop.permute.xlu0 %1664  ;;  %v2341_v4 = vrot.slane %v1371_v26, 1 }
 0x1b3   :  { %2354 = vrot.lane.b32.xlu0 %v2336_v63, %s4429_s0  ;;  %7765 = vst [vmem:[#allocation36_spill] sm:$0xff] %v6237_v9  ;;  %v2338_v63 = vrot.slane %v6212_v38, 1 }
 0x1b4   :  { %v6223_v50 = vpop.f32.mrb[40].mxu1 }
 0x1b5   :  { %7761 = vst [vmem:[#allocation32_spill] sm:$0xff] %v6223_v50  ;;  %v1377_v28 = vpop.f32.mrb[41].mxu1 }
 0x1b6   :  { %2356 = vrot.lane.b32.xlu1 %v2337_v33, %s4429_s0  ;;  %v2426_v34 = vrot.slane %v1377_v28, 2 }
 0x1b7   :  { %2432 = vrot.lane.b32.xlu0 %v2423_v8, %s4430_s30 }
 0x1b8   :  { %v6229_v41 = vpop.f32.mrb[42].mxu1 }
 0x1b9   :  { %7762 = vst [vmem:[#allocation33_spill] sm:$0xff] %v6229_v41  ;;  %v1383_v59 = vpop.f32.mrb[43].mxu1 }
 0x1ba   :  { %2434 = vrot.lane.b32.xlu1 %v2424_v45, %s4430_s30  ;;  %v6242_v8 = vpop.permute.xlu1 %1914  ;;  %v2339_v45 = vrot.slane %v1365_v20, 1  ;;  %v2486_v20 = vrot.slane %v1377_v28, 3  ;;  %v2427_v19 = vrot.slane %v1383_v59, 2  ;;  %v2488_v53 = vrot.slane %v1383_v59, 3 }
 0x1bb   :  { %2498 = vrot.lane.b32.xlu0 %v2480_v54, %s4431_s3  ;;  %v6248_v54 = vpop.permute.xlu0 %1978 }
 0x1bc   :  { %v6235_v18 = vpop.f32.mrb[44].mxu1 }
 0x1bd   :  { %7764 = vst [vmem:[#allocation35_spill] sm:$0xff] %v6235_v18  ;;  %v6240_v33 = vpop.f32.mrb[45].mxu1  ;;  %v2346_v49 = vrot.slane %v6235_v18, 1 }
 0x1be   :  { %2502 = vrot.lane.b32.xlu1 %v2482_v10, %s4431_s3  ;;  %v6254_v9 = vpop.permute.xlu1 %1916  ;;  %v2347_v47 = vrot.slane %v6240_v33, 1 }
 0x1bf   :  { %2358 = vrot.lane.b32.xlu0 %v2338_v63, %s4429_s0  ;;  %v6258_v10 = vpop.permute.xlu0 %1982  ;;  %v2425_v63 = vrot.slane %v1371_v26, 2  ;;  %v1941_v39 = vadd.f32 %v6254_v9, %v6104_v60 }
 0x1c0   :  { %v6246_v3 = vpop.f32.mrb[46].mxu1 }
 0x1c1   :  { %7766 = vst [vmem:[#allocation37_spill] sm:$0xff] %v6246_v3  ;;  %v6250_v30 = vpop.f32.mrb[47].mxu1 }
 0x1c2   :  { %2364 = vrot.lane.b32.xlu1 %v2341_v4, %s4429_s0  ;;  %v6261_v40 = vpop.permute.xlu1 %1918  ;;  %v2344_v4 = vrot.slane %v6229_v41, 1  ;;  %v2490_v41 = vrot.slane %v6240_v33, 3  ;;  %v2492_v42 = vrot.slane %v6250_v30, 3 }
 0x1c3   :  { %2360 = vrot.lane.b32.xlu0 %v2339_v45, %s4429_s0  ;;  %v2484_v45 = vrot.slane %v1371_v26, 3  ;;  %v6266_v24 = vpop.permute.xlu0 %1986  ;;  %v2343_v26 = vrot.slane %v1377_v28, 1  ;;  %v2348_v28 = vrot.slane %v6246_v3, 1 }
 0x1c6   :  { %2438 = vrot.lane.b32.xlu1 %v2426_v34, %s4430_s30  ;;  %v2345_v34 = vrot.slane %v1383_v59, 1  ;;  %v6270_v55 = vpop.permute.xlu1 %1920 }
 0x1c7   :  { %2362 = vrot.lane.b32.xlu0 %v2340_v0, %s4429_s0  ;;  %v2342_v0 = vrot.slane %v6223_v50, 1 }
 0x1ca   :  { %2510 = vrot.lane.b32.xlu1 %v2486_v20, %s4431_s3  ;;  %v6273_v48 = vpop.permute.xlu0 %1922  ;;  %v2428_v20 = vrot.slane %v6240_v33, 2  ;;  %v1939_v33 = vadd.f32 %v6242_v8, %v6096_v56 }
 0x1cb   :  { %2436 = vrot.lane.b32.xlu0 %v2425_v63, %s4430_s30  ;;  %v6278_v63 = vpop.permute.xlu1 %1990  ;;  %v6381_v60 = vadd.f32 %v6273_v48, %v6123_v58 }
 0x1ce   :  { %2370 = vrot.lane.b32.xlu1 %v2344_v4, %s4429_s0  ;;  %v6281_v4 = vpop.permute.xlu0 %1994 }
 0x1cf   :  { %2506 = vrot.lane.b32.xlu0 %v2484_v45, %s4431_s3 }
 0x1d2   :  { %2372 = vrot.lane.b32.xlu1 %v2345_v34, %s4429_s0 }
 0x1d3   :  { %2366 = vrot.lane.b32.xlu0 %v2342_v0, %s4429_s0  ;;  %v6292_v0 = vpop.permute.xlu1 %1924 }
 0x1d6   :  { %2442 = vrot.lane.b32.xlu1 %v2428_v20, %s4430_s30 }
 0x1d7   :  { %2368 = vrot.lane.b32.xlu0 %v2343_v26, %s4429_s0  ;;  %v6284_v45 = vpop.f32.mrb[32].mxu0  ;;  %v6296_v26 = vpop.permute.xlu0 %1926 }
 0x1d8   :  { %v1579_v50 = vpop.f32.mrb[33].mxu0  ;;  %v6306_v3 = vpop.permute.xlu1 %1998  ;;  %v2574_v37 = vrot.slane %v6284_v45, 4  ;;  %v6408_v25 = vadd.f32 %v6296_v26, %v6138_v21 }
 0x1da   :  { %2518 = vrot.lane.b32.xlu1 %v2490_v41, %s4431_s3  ;;  %v2349_v41 = vrot.slane %v6250_v30, 1 }
 0x1db   :  { %2440 = vrot.lane.b32.xlu0 %v2427_v19, %s4430_s30  ;;  %v6289_v34 = vpop.f32.mrb[34].mxu0  ;;  %v6309_v52 = vpop.permute.xlu0 %2002 }
 0x1dc   :  { %v6294_v20 = vpop.f32.mrb[35].mxu0  ;;  %v6322_v61 = vpop.permute.xlu1 %1928 }
 0x1de   :  { %2378 = vrot.lane.b32.xlu1 %v2348_v28, %s4429_s0 }
 0x1df   :  { %2514 = vrot.lane.b32.xlu0 %v2488_v53, %s4431_s3  ;;  %v6300_v11 = vpop.f32.mrb[36].mxu0  ;;  %v2479_v53 = vrot.slane %v6284_v45, 3  ;;  %v6327_v38 = vpop.permute.xlu0 %2006  ;;  %v1945_v45 = vadd.f32 %v6270_v55, %v6120_v7 }
 0x1e0   :  { %v6303_v19 = vpop.f32.mrb[37].mxu0 }
 0x1e1   :  { %v2579_v21 = vrot.slane %v6303_v19, 4 }
 0x1e2   :  { %2380 = vrot.lane.b32.xlu1 %v2349_v41, %s4429_s0  ;;  %v2575_v41 = vrot.slane %v1579_v50, 4  ;;  %v2481_v50 = vrot.slane %v6289_v34, 3 }
 0x1e3   :  { %2374 = vrot.lane.b32.xlu0 %v2346_v49, %s4429_s0  ;;  %v6312_v59 = vpop.f32.mrb[38].mxu0  ;;  %v2429_v49 = vrot.slane %v6250_v30, 2 }
 0x1e4   :  { %v6315_v28 = vpop.f32.mrb[39].mxu0 }
 0x1e6   :  { %2496 = vrot.lane.b32.xlu1 %v2479_v53, %s4431_s3  ;;  %v1938_v53 = vadd.f32 %v6242_v8, %v6094_v43 }
 0x1e7   :  { %2376 = vrot.lane.b32.xlu0 %v2347_v47, %s4429_s0  ;;  %v6320_v18 = vpop.f32.mrb[40].mxu0 }
 0x1e8   :  { %v6324_v32 = vpop.f32.mrb[41].mxu0 }
 0x1ea   :  { %2592 = vrot.lane.b32.xlu1 %v2575_v41, %s4432_s11 }
 0x1eb   :  { %2444 = vrot.lane.b32.xlu0 %v2429_v49, %s4430_s30  ;;  %v6333_v47 = vpop.f32.mrb[42].mxu0 }
 0x1ec   :  { %v6337_v44 = vpop.f32.mrb[43].mxu0  ;;  %v1981_v51 = vpop.permute.xlu1 %1980 }
 0x1ed   :  { %v2010_v41 = vsel %vm1777_vm4, %v6248_v54, %v1981_v51  ;;  %v2035_v62 = vadd.f32 %v1981_v51, %v1939_v33  ;;  %v2077_v56 = vpop.permute.xlu0 %2076  ;;  %v2577_v54 = vrot.slane %v6294_v20, 4  ;;  %v6366_v20 = vadd.f32 %v6261_v40, %v6108_v2 }
 0x1ee   :  { %2500 = vrot.lane.b32.xlu1 %v2481_v50, %s4431_s3  ;;  %v2034_v33 = vadd.f32 %v2010_v41, %v1938_v53  ;;  %v1940_v50 = vadd.f32 %v6254_v9, %v6100_v5  ;;  %v6370_v53 = vadd.f32 %v6261_v40, %v6112_v14  ;;  %v6388_v14 = vadd.f32 %v6273_v48, %v6126_v1 }
 0x1ef   :  { %v2132_v46 = vadd.f32 %v2077_v56, %v2035_v62  ;;  %2522 = vrot.lane.b32.xlu0 %v2492_v42, %s4431_s3  ;;  %v6352_v51 = vpop.f32.mrb[44].mxu0  ;;  %v6392_v40 = vadd.f32 %v6292_v0, %v6130_v13 }
 0x1f0   :  { %v6355_v49 = vpop.f32.mrb[45].mxu0  ;;  %v2075_v8 = vpop.permute.xlu1 %2074 }
 0x1f1   :  { %v2157_v30 = vadd.f32 %v6226_v22, %v2132_v46  ;;  %v2107_v62 = vsel %vm2106_vm5, %v2075_v8, %v2077_v56  ;;  %v2081_v42 = vpop.permute.xlu0 %2080  ;;  %v6375_v46 = vadd.f32 %v6270_v55, %v6116_v6 }
 0x1f2   :  { %v2131_v41 = vadd.f32 %v2107_v62, %v2034_v33  ;;  %2596 = vrot.lane.b32.xlu1 %v2577_v54, %s4432_s11  ;;  %v2578_v54 = vrot.slane %v6300_v11, 4  ;;  %v6404_v62 = vadd.f32 %v6292_v0, %v6134_v16  ;;  %v2485_v0 = vrot.slane %v6312_v59, 3 }
 0x1f3   :  { %v2173_v9 = vmax.f32 %v2157_v30, 0.0  ;;  %2590 = vrot.lane.b32.xlu0 %v2574_v37, %s4432_s11  ;;  %v6384_v56 = vpop.f32.mrb[46].mxu0  ;;  %v2576_v30 = vrot.slane %v6289_v34, 4  ;;  %v6413_v34 = vadd.f32 %v6296_v26, %v6142_v23 }
 0x1f4   :  { %v2156_v7 = vadd.f32 %v6226_v22, %v2131_v41  ;;  %v6396_v55 = vpop.f32.mrb[47].mxu0  ;;  %v1985_v33 = vpop.permute.xlu1 %1984 }
 0x1f5   :  { %v2197_v37 = vsel %vm2196_vm6, %v2173_v9, -inf  ;;  %v2011_v8 = vsel %vm1777_vm4, %v6258_v10, %v1985_v33  ;;  %v2037_v48 = vadd.f32 %v1985_v33, %v1941_v39  ;;  %v2083_v1 = vpop.permute.xlu0 %2082  ;;  %v6417_v39 = vadd.f32 %v6322_v61, %v6146_v31 }
 0x1f6   :  { %v2198_v41 = vrot.slane %v2197_v37, 4  ;;  %v2172_v13 = vmax.f32 %v2156_v7, 0.0  ;;  %2598 = vrot.lane.b32.xlu1 %v2578_v54, %s4432_s11  ;;  %v2483_v10 = vrot.slane %v6300_v11, 3  ;;  %v2036_v33 = vadd.f32 %v2011_v8, %v1940_v50 }
 0x1f7   :  { %v2134_v16 = vadd.f32 %v2081_v42, %v2037_v48  ;;  %2594 = vrot.lane.b32.xlu0 %v2576_v30, %s4432_s11  ;;  %v2580_v11 = vrot.slane %v6312_v59, 4  ;;  %v2581_v48 = vrot.slane %v6315_v28, 4 }
 0x1f8   :  { %v2199_v9 = vmax.f32 %v2197_v37, %v2198_v41  ;;  %v2189_v7 = vsel %vm2188_vm7, %v2172_v13, -inf  ;;  %v2079_v54 = vpop.permute.xlu1 %2078  ;;  %v2582_v13 = vrot.slane %v6320_v18, 4 }
 0x1f9   :  { %v2190_v23 = vrot.slane %v2189_v7, 4  ;;  %v2159_v26 = vadd.f32 %v6226_v22, %v2134_v16  ;;  %v2108_v31 = vsel %vm2106_vm5, %v2079_v54, %v2081_v42  ;;  %v1993_v58 = vpop.permute.xlu0 %1992  ;;  %v2489_v42 = vrot.slane %v6333_v47, 3 }
 0x1fa   :  { %v2133_v6 = vadd.f32 %v2108_v31, %v2036_v33  ;;  %2508 = vrot.lane.b32.xlu1 %v2485_v0, %s4431_s3  ;;  %v2200_v50 = vrot.slane %v2199_v9, 2  ;;  %v2041_v0 = vadd.f32 %v1993_v58, %v1945_v45  ;;  %v2013_v8 = vsel %vm1777_vm4, %v6278_v63, %v1993_v58 }
 0x1fb   :  { %v2191_v37 = vmax.f32 %v2189_v7, %v2190_v23  ;;  %v2175_v19 = vmax.f32 %v2159_v26, 0.0  ;;  %2504 = vrot.lane.b32.xlu0 %v2483_v10, %s4431_s3  ;;  %v2587_v58 = vrot.slane %v6355_v49, 4 }
 0x1fc   :  { %v2158_v28 = vadd.f32 %v6226_v22, %v2133_v6  ;;  %v1989_v41 = vpop.permute.xlu1 %1988  ;;  %v2201_v59 = vmax.f32 %v2199_v9, %v2200_v50 }
 0x1fd   :  { %v2192_v16 = vrot.slane %v2191_v37, 2  ;;  %v2211_v31 = vsel %vm2196_vm6, %v2175_v19, -inf  ;;  %v2012_v33 = vsel %vm1777_vm4, %v6266_v24, %v1989_v41  ;;  %v2089_v7 = vpop.permute.xlu0 %2088  ;;  %v2039_v10 = vadd.f32 %v1989_v41, %v6370_v53 }
 0x1fe   :  { %v2212_v23 = vrot.slane %v2211_v31, 4  ;;  %v2174_v26 = vmax.f32 %v2158_v28, 0.0  ;;  %2604 = vrot.lane.b32.xlu1 %v2581_v48, %s4432_s11  ;;  %v2138_v19 = vadd.f32 %v2089_v7, %v2041_v0  ;;  %v2038_v54 = vadd.f32 %v2012_v33, %v6366_v20 }
 0x1ff   :  { %2600 = vrot.lane.b32.xlu0 %v2579_v21, %s4432_s11  ;;  %v2193_v28 = vmax.f32 %v2191_v37, %v2192_v16  ;;  %v2202_v20 = vrot.slane %v2201_v59, 1  ;;  %v2493_v53 = vrot.slane %v6384_v56, 3  ;;  %v2040_v0 = vadd.f32 %v2013_v8, %v6375_v46 }
 0x200   :  { %v2213_v45 = vmax.f32 %v2211_v31, %v2212_v23  ;;  %v2204_v24 = vsel %vm2188_vm7, %v2174_v26, -inf  ;;  %v2085_v30 = vpop.permute.xlu1 %2084  ;;  %v2163_v9 = vadd.f32 %v6226_v22, %v2138_v19  ;;  %v2588_v46 = vrot.slane %v6384_v56, 4 }
 0x201   :  { %v2205_v48 = vrot.slane %v2204_v24, 4  ;;  %v2109_v50 = vsel %vm2106_vm5, %v2083_v1, %v2085_v30  ;;  %v6451_v6 = vpop.permute.xlu0 %2090  ;;  %v2136_v31 = vadd.f32 %v2085_v30, %v2039_v10  ;;  %v2194_v26 = vrot.slane %v2193_v28, 1 }
 0x202   :  { %v2214_v21 = vrot.slane %v2213_v45, 2  ;;  %v2135_v63 = vadd.f32 %v2109_v50, %v2038_v54  ;;  %2606 = vrot.lane.b32.xlu1 %v2582_v13, %s4432_s11  ;;  %v2179_v37 = vmax.f32 %v2163_v9, 0.0  ;;  %v7767_v50 = vrot.slane %v6320_v18, 3 }
 0x203   :  { %v2206_v41 = vmax.f32 %v2204_v24, %v2205_v48  ;;  %2602 = vrot.lane.b32.xlu0 %v2580_v11, %s4432_s11  ;;  %v2161_v33 = vadd.f32 %v6226_v22, %v2136_v31  ;;  %v2203_v11 = vmax.f32 %v2201_v59, %v2202_v20  ;;  %v2195_v20 = vmax.f32 %v2193_v28, %v2194_v26 }
 0x204   :  { %v2215_v16 = vmax.f32 %v2213_v45, %v2214_v21  ;;  %v2160_v1 = vadd.f32 %v6226_v22, %v2135_v63  ;;  %v2087_v23 = vpop.permute.xlu1 %2086  ;;  %v2239_v30 = vsel %vm2196_vm6, %v2179_v37, -inf  ;;  %v1953_v56 = vadd.f32 %v6322_v61, %v6150_v17 }
 0x205   :  { %v2207_v54 = vrot.slane %v2206_v41, 2  ;;  %v2110_v13 = vsel %vm2106_vm5, %v2087_v23, %v2089_v7  ;;  %v2001_v10 = vpop.permute.xlu0 %2000  ;;  %v2240_v24 = vrot.slane %v2239_v30, 4  ;;  %v2177_v9 = vmax.f32 %v2161_v33, 0.0 }
 0x206   :  { %v2216_v19 = vrot.slane %v2215_v16, 1  ;;  %v2176_v48 = vmax.f32 %v2160_v1, 0.0  ;;  %2516 = vrot.lane.b32.xlu1 %v2489_v42, %s4431_s3  ;;  %v2137_v45 = vadd.f32 %v2110_v13, %v2040_v0  ;;  %v2015_v0 = vsel %vm1777_vm4, %v6306_v3, %v2001_v10 }
 0x207   :  { %v2208_v8 = vmax.f32 %v2206_v41, %v2207_v54  ;;  %2512 = vrot.lane.b32.xlu0 %v7767_v50, %s4431_s3  ;;  %v2241_v63 = vmax.f32 %v2239_v30, %v2240_v24  ;;  %v2225_v31 = vsel %vm2196_vm6, %v2177_v9, -inf  ;;  %v7769_v24 = vrot.slane %v6324_v32, 4 }
 0x208   :  { %v2217_v21 = vmax.f32 %v2215_v16, %v2216_v19  ;;  %v2218_v7 = vsel %vm2188_vm7, %v2176_v48, -inf  ;;  %v1997_v37 = vpop.permute.xlu1 %1996  ;;  %v2226_v23 = vrot.slane %v2225_v31, 4  ;;  %v2162_v42 = vadd.f32 %v6226_v22, %v2137_v45 }
 0x209   :  { %v2209_v1 = vrot.slane %v2208_v8, 1  ;;  %v2219_v33 = vrot.slane %v2218_v7, 4  ;;  %v2095_v59 = vpop.permute.xlu0 %2094  ;;  %v2242_v41 = vrot.slane %v2241_v63, 2  ;;  %v2014_v18 = vsel %vm1777_vm4, %v6281_v4, %v1997_v37 }
 0x20a   :  { %v7768_v16 = vrot.slane %v6337_v44, 4  ;;  %v2227_v13 = vmax.f32 %v2225_v31, %v2226_v23  ;;  %v2178_v19 = vmax.f32 %v2162_v42, 0.0  ;;  %v2042_v26 = vadd.f32 %v2014_v18, %v6381_v60 }
 0x20b   :  { %v2210_v54 = vmax.f32 %v2208_v8, %v2209_v1  ;;  %v2220_v30 = vmax.f32 %v2218_v7, %v2219_v33  ;;  %2608 = vrot.lane.b32.xlu0 %v7769_v24, %s4432_s11  ;;  %v2243_v28 = vmax.f32 %v2241_v63, %v2242_v41  ;;  %v2043_v3 = vadd.f32 %v1997_v37, %v6388_v14 }
 0x20c   :  { %2612 = vrot.lane.b32.xlu1 %v7768_v16, %s4432_s11  ;;  %v2093_v48 = vpop.permute.xlu1 %2092  ;;  %v2864_v4 = vsel %vm2826_vm8, %v2217_v21, %v2203_v11  ;;  %v2228_v8 = vrot.slane %v2227_v13, 2  ;;  %v2232_v45 = vsel %vm2188_vm7, %v2178_v19, -inf  ;;  %v2589_v50 = vrot.slane %v6396_v55, 4 }
 0x20d   :  { %v2857_v44 = vsel %vm2826_vm8, %v2210_v54, %v2195_v20  ;;  %v2221_v9 = vrot.slane %v2220_v30, 2  ;;  %v2233_v7 = vrot.slane %v2232_v45, 4  ;;  %v2111_v32 = vsel %vm2106_vm5, %v6451_v6, %v2093_v48  ;;  %v2099_v31 = vpop.permute.xlu0 %2098 }
 0x20e   :  { %v2140_v63 = vadd.f32 %v2093_v48, %v2043_v3  ;;  %v2244_v60 = vrot.slane %v2243_v28, 1  ;;  %v2229_v11 = vmax.f32 %v2227_v13, %v2228_v8  ;;  %v2139_v21 = vadd.f32 %v2111_v32, %v2042_v26 }
 0x20f   :  { %v2222_v14 = vmax.f32 %v2220_v30, %v2221_v9  ;;  %v7770_v37 = vrot.slane %v6333_v47, 4  ;;  %v2234_v1 = vmax.f32 %v2232_v45, %v2233_v7  ;;  %v2044_v55 = vadd.f32 %v2015_v0, %v6392_v40 }
 0x210   :  { %2616 = vrot.lane.b32.xlu1 %v2587_v58, %s4432_s11  ;;  %v2045_v33 = vadd.f32 %v2001_v10, %v6404_v62  ;;  %v2165_v6 = vadd.f32 %v6226_v22, %v2140_v63  ;;  %v2097_v23 = vpop.permute.xlu1 %2096  ;;  %v2230_v58 = vrot.slane %v2229_v11, 1  ;;  %v2164_v42 = vadd.f32 %v6226_v22, %v2139_v21 }
 0x211   :  { %2610 = vrot.lane.b32.xlu0 %v7770_v37, %s4432_s11  ;;  %v2223_v49 = vrot.slane %v2222_v14, 1  ;;  %v2112_v20 = vsel %vm2106_vm5, %v2095_v59, %v2097_v23  ;;  %v2235_v41 = vrot.slane %v2234_v1, 2  ;;  %v2245_v40 = vmax.f32 %v2243_v28, %v2244_v60 }
 0x212   :  { %v2181_v18 = vmax.f32 %v2165_v6, 0.0  ;;  %v2141_v16 = vadd.f32 %v2112_v20, %v2044_v55  ;;  %v2142_v47 = vadd.f32 %v2097_v23, %v2045_v33  ;;  %v2231_v10 = vmax.f32 %v2229_v11, %v2230_v58 }
 0x213   :  { %v2224_v62 = vmax.f32 %v2222_v14, %v2223_v49  ;;  %v2180_v0 = vmax.f32 %v2164_v42, 0.0  ;;  %v7771_v54 = vrot.slane %v6352_v51, 3  ;;  %v2236_v30 = vmax.f32 %v2234_v1, %v2235_v41 }
 0x214   :  { %2524 = vrot.lane.b32.xlu1 %v2493_v53, %s4431_s3  ;;  %v2253_v13 = vsel %vm2196_vm6, %v2181_v18, -inf  ;;  %v2166_v59 = vadd.f32 %v6226_v22, %v2141_v16  ;;  %v2167_v19 = vadd.f32 %v6226_v22, %v2142_v47  ;;  %v2005_v24 = vpop.permute.xlu1 %2004  ;;  %v6509_v53 = vpop.permute.xlu0 %2102  ;;  %v7772_v60 = vrot.slane %v6352_v51, 4 }
 0x215   :  { %2520 = vrot.lane.b32.xlu0 %v7771_v54, %s4431_s3  ;;  %v2246_v26 = vsel %vm2188_vm7, %v2180_v0, -inf  ;;  %v2254_v3 = vrot.slane %v2253_v13, 4  ;;  %v2016_v28 = vsel %vm1777_vm4, %v6309_v52, %v2005_v24  ;;  %v2047_v48 = vadd.f32 %v2005_v24, %v6413_v34 }
 0x216   :  { %v2237_v9 = vrot.slane %v2236_v30, 1  ;;  %v2247_v8 = vrot.slane %v2246_v26, 4  ;;  %v2182_v45 = vmax.f32 %v2166_v59, 0.0  ;;  %v2183_v7 = vmax.f32 %v2167_v19, 0.0 }
 0x217   :  { %v2255_v32 = vmax.f32 %v2253_v13, %v2254_v3  ;;  %v2046_v63 = vadd.f32 %v2016_v28, %v6408_v25  ;;  %v2865_v14 = vsel %vm2828_vm9, %v2231_v10, %v2864_v4  ;;  %v2858_v52 = vsel %vm2828_vm9, %v2224_v62, %v2857_v44 }
 0x218   :  { %2620 = vrot.lane.b32.xlu1 %v2589_v50, %s4432_s11  ;;  %v2238_v11 = vmax.f32 %v2236_v30, %v2237_v9  ;;  %v2248_v34 = vmax.f32 %v2246_v26, %v2247_v8  ;;  %v2260_v21 = vsel %vm2188_vm7, %v2182_v45, -inf  ;;  %v2267_v37 = vsel %vm2196_vm6, %v2183_v7, -inf  ;;  %v2101_v1 = vpop.permute.xlu1 %2100 }
 0x219   :  { %2614 = vrot.lane.b32.xlu0 %v7772_v60, %s4432_s11  ;;  %v2256_v50 = vrot.slane %v2255_v32, 2  ;;  %v2261_v55 = vrot.slane %v2260_v21, 4  ;;  %v2268_v25 = vrot.slane %v2267_v37, 4  ;;  %v2351_v33 = vpop.permute.xlu0 %2350  ;;  %v2113_v51 = vsel %vm2106_vm5, %v2099_v31, %v2101_v1 }
 0x21a   :  { %v2249_v6 = vrot.slane %v2248_v34, 2  ;;  %v2406_v23 = vadd.f32 %v2351_v33, %v6158_v15  ;;  %v2143_v4 = vadd.f32 %v2113_v51, %v2046_v63  ;;  %v2144_v49 = vadd.f32 %v2101_v1, %v2047_v48 }
 0x21b   :  { %v7773_v44 = vrot.slane %v6064_v57, 1  ;;  %v2257_v58 = vmax.f32 %v2255_v32, %v2256_v50  ;;  %v2262_v42 = vmax.f32 %v2260_v21, %v2261_v55  ;;  %v2269_v20 = vmax.f32 %v2267_v37, %v2268_v25  ;;  %v7778_v55 = vld [vmem:[#allocation27_spill] sm:$0xff] }
 0x21c   :  { %v2866_v41 = vsel %vm2830_vm10, %v2245_v40, %v2865_v14  ;;  %v2250_v31 = vmax.f32 %v2248_v34, %v2249_v6  ;;  %v2168_v18 = vadd.f32 %v6226_v22, %v2143_v4  ;;  %v2169_v15 = vadd.f32 %v6226_v22, %v2144_v49  ;;  %v2009_v16 = vpop.permute.xlu1 %2008 }
 0x21d   :  { %1670 = vrot.lane.b32.xlu1 %v7773_v44, %s4429_s0  ;;  %2618 = vrot.lane.b32.xlu0 %v2588_v46, %s4432_s11  ;;  %v2859_v47 = vsel %vm2830_vm10, %v2238_v11, %v2858_v52  ;;  %v2258_v62 = vrot.slane %v2257_v58, 1  ;;  %v2263_v10 = vrot.slane %v2262_v42, 2  ;;  %v2270_v0 = vrot.slane %v2269_v20, 2  ;;  %v6535_v54 = vpop.permute.xlu0 %2494 }
 0x21e   :  { %v2017_v30 = vsel %vm1777_vm4, %v6327_v38, %v2009_v16  ;;  %v2251_v46 = vrot.slane %v2250_v31, 1  ;;  %v2184_v40 = vmax.f32 %v2168_v18, 0.0  ;;  %v2185_v13 = vmax.f32 %v2169_v15, 0.0 }
 0x21f   :  { %v7774_v59 = vrot.slane %v6072_v35, 1  ;;  %v2259_v19 = vmax.f32 %v2257_v58, %v2258_v62  ;;  %v2264_v24 = vmax.f32 %v2262_v42, %v2263_v10  ;;  %v2271_v26 = vmax.f32 %v2269_v20, %v2270_v0  ;;  %v7782_v0 = vld [vmem:[#allocation4_spill] sm:$0xff] }
 0x220   :  { %v2048_v3 = vadd.f32 %v2017_v30, %v6417_v39  ;;  %v7775_v28 = vrot.slane %v6059_v27, 1  ;;  %v2252_v38 = vmax.f32 %v2250_v31, %v2251_v46  ;;  %v2274_v48 = vsel %vm2188_vm7, %v2184_v40, -inf  ;;  %v2105_v9 = vpop.permute.xlu1 %2104  ;;  %v7779_v31 = vld [vmem:[#allocation20_spill] sm:$0xff] }
 0x221   :  { %1674 = vrot.lane.b32.xlu1 %v7774_v59, %s4429_s0  ;;  %v2281_v17 = vsel %vm2196_vm6, %v2185_v13, -inf  ;;  %v2049_v61 = vadd.f32 %v2009_v16, %v1953_v56  ;;  %v2265_v8 = vrot.slane %v2264_v24, 1  ;;  %v2272_v45 = vrot.slane %v2271_v26, 1  ;;  %v2353_v63 = vpop.permute.xlu0 %2352 }
 0x222   :  { %1668 = vrot.lane.b32.xlu0 %v7775_v28, %s4429_s0  ;;  %v2275_v7 = vrot.slane %v2274_v48, 4  ;;  %v2282_v32 = vrot.slane %v2281_v17, 4  ;;  %v2382_v60 = vsel %vm1696_vm12, %v2351_v33, %v2353_v63  ;;  %v2114_v39 = vsel %vm2106_vm5, %v6509_v53, %v2105_v9  ;;  %v7783_v28 = vld [vmem:[#allocation28_spill] sm:$0xff] }
 0x223   :  { %v2146_v14 = vadd.f32 %v2105_v9, %v2049_v61  ;;  %v7776_v52 = vrot.slane %v6076_v12, 1  ;;  %v2867_v11 = vsel %vm2832_vm11, %v2259_v19, %v2866_v41  ;;  %v2266_v34 = vmax.f32 %v2264_v24, %v2265_v8  ;;  %v7784_v8 = vld [vmem:[#allocation8_spill] sm:$0xff] }
 0x224   :  { %v2273_v21 = vmax.f32 %v2271_v26, %v2272_v45  ;;  %v2276_v37 = vmax.f32 %v2274_v48, %v2275_v7  ;;  %v2283_v1 = vmax.f32 %v2281_v17, %v2282_v32  ;;  %v7777_v50 = vrot.slane %v6068_v29, 1  ;;  %v2431_v51 = vpop.permute.xlu1 %2430 }
 0x225   :  { %1678 = vrot.lane.b32.xlu1 %v7776_v52, %s4429_s0  ;;  %v2407_v25 = vadd.f32 %v2382_v60, %v7778_v55  ;;  %v2145_v33 = vadd.f32 %v2114_v39, %v2048_v3  ;;  %v2171_v53 = vadd.f32 %v6226_v22, %v2146_v14  ;;  %v2860_v6 = vsel %vm2832_vm11, %v2252_v38, %v2859_v47  ;;  %v2355_v44 = vpop.permute.xlu0 %2354 }
 0x226   :  { %1672 = vrot.lane.b32.xlu0 %v7777_v50, %s4429_s0  ;;  %v2277_v4 = vrot.slane %v2276_v37, 2  ;;  %v2284_v49 = vrot.slane %v2283_v1, 2  ;;  %v6563_v58 = vadd.f32 %v2431_v51, %v2406_v23  ;;  %v2868_v42 = vsel %vm2834_vm13, %v2273_v21, %v2867_v11 }
 0x227   :  { %v2170_v20 = vadd.f32 %v6226_v22, %v2145_v33  ;;  %v2187_v41 = vmax.f32 %v2171_v53, 0.0  ;;  %v2408_v18 = vadd.f32 %v2355_v44, %v7779_v31  ;;  %v6568_v15 = vadd.f32 %v2431_v51, %v2407_v25  ;;  %v7786_v33 = vld [vmem:[#allocation21_spill] sm:$0xff] }
 0x228   :  { %v7780_v16 = vrot.slane %v6094_v43, 2  ;;  %v2278_v62 = vmax.f32 %v2276_v37, %v2277_v4  ;;  %v2285_v47 = vmax.f32 %v2283_v1, %v2284_v49  ;;  %v7781_v10 = vrot.slane %v6074_v36, 1  ;;  %v2357_v40 = vpop.permute.xlu1 %2356  ;;  %v7785_v37 = vld [vmem:[#allocation7_spill] sm:$0xff]  ;;  %v7787_v4 = vld [vmem:[#allocation10_spill] sm:$0xff] }
 0x229   :  { %v2861_v23 = vsel %vm2834_vm13, %v2266_v34, %v2860_v6  ;;  %v1729_v30 = vrot.slane %v7782_v0, 2  ;;  %v1732_v22 = vrot.slane %v6100_v5, 2  ;;  %v2186_v56 = vmax.f32 %v2170_v20, 0.0  ;;  %v2433_v43 = vpop.permute.xlu0 %2432 }
 0x22a   :  { %1747 = vrot.lane.b32.xlu1 %v7780_v16, %s4430_s30  ;;  %1676 = vrot.lane.b32.xlu0 %v7781_v10, %s4429_s0  ;;  %v2295_v46 = vsel %vm2196_vm6, %v2187_v41, -inf  ;;  %v2286_v13 = vrot.slane %v2285_v47, 1  ;;  %v2383_v19 = vsel %vm1696_vm12, %v2355_v44, %v2357_v40  ;;  %v2279_v24 = vrot.slane %v2278_v62, 1  ;;  %v7788_v16 = vld [vmem:[#allocation29_spill] sm:$0xff]  ;;  %v7789_v10 = vld [vmem:[#allocation15_spill] sm:$0xff]  ;;  %v7791_v40 = vld [vmem:[#allocation22_spill] sm:$0xff] }
 0x22b   :  { %v2296_v59 = vrot.slane %v2295_v46, 4  ;;  %v2288_v26 = vsel %vm2188_vm7, %v2186_v56, -inf  ;;  %v6582_v3 = vadd.f32 %v2433_v43, %v2408_v18  ;;  %v2409_v38 = vadd.f32 %v2383_v19, %v7783_v28  ;;  %v7793_v19 = vld [vmem:[#allocation12_spill] sm:$0xff] }
 0x22c   :  { %v2289_v5 = vrot.slane %v2288_v26, 4  ;;  %v2287_v17 = vmax.f32 %v2285_v47, %v2286_v13  ;;  %v2280_v61 = vmax.f32 %v2278_v62, %v2279_v24  ;;  %v1731_v9 = vrot.slane %v6064_v57, 2  ;;  %v2435_v7 = vpop.permute.xlu1 %2434 }
 0x22d   :  { %v2297_v48 = vmax.f32 %v2295_v46, %v2296_v59  ;;  %v1657_v45 = vrot.slane %v7784_v8, 1  ;;  %v6589_v32 = vadd.f32 %v2433_v43, %v2409_v38  ;;  %v6591_v39 = vpop.permute.xlu0 %2498  ;;  %v1734_v57 = vrot.slane %v6108_v2, 2  ;;  %v7792_v59 = vld [vmem:[#allocation30_spill] sm:$0xff] }
 0x22e   :  { %1751 = vrot.lane.b32.xlu1 %v1732_v22, %s4430_s30  ;;  %1745 = vrot.lane.b32.xlu0 %v1729_v30, %s4430_s30  ;;  %v2290_v63 = vmax.f32 %v2288_v26, %v2289_v5  ;;  %v2869_v14 = vsel %vm2836_vm14, %v2287_v17, %v2868_v42  ;;  %v2862_v52 = vsel %vm2836_vm14, %v2280_v61, %v2861_v23  ;;  %v1656_v1 = vrot.slane %v7785_v37, 1  ;;  %v7794_v17 = vld [vmem:[#allocation16_spill] sm:$0xff] }
 0x22f   :  { %v2298_v60 = vrot.slane %v2297_v48, 2  ;;  %v1659_v49 = vrot.slane %v7787_v4, 1  ;;  %v1733_v42 = vrot.slane %v6072_v35, 2  ;;  %v1736_v23 = vrot.slane %v7789_v10, 2  ;;  %v7790_v35 = vld [vmem:[#allocation9_spill] sm:$0xff] }
 0x230   :  { %v2291_v11 = vrot.slane %v2290_v63, 2  ;;  %v6598_v21 = vpop.permute.xlu1 %2502  ;;  %v1658_v30 = vrot.slane %v7790_v35, 1  ;;  %v1661_v24 = vrot.slane %v7793_v19, 1  ;;  %v1735_v28 = vrot.slane %v6076_v12, 2  ;;  %v7797_v12 = vld [vmem:[#allocation14_spill] sm:$0xff] }
 0x231   :  { %v2299_v34 = vmax.f32 %v2297_v48, %v2298_v60  ;;  %v2359_v50 = vpop.permute.xlu0 %2358  ;;  %v1738_v61 = vrot.slane %v7794_v17, 2  ;;  %v7796_v60 = vld [vmem:[#allocation24_spill] sm:$0xff]  ;;  %vm2704_vm6 = vcmask 1043936   ;;  %vm2916_vm7 = vcmask 818176  }
 0x232   :  { %1682 = vrot.lane.b32.xlu1 %v1657_v45, %s4429_s0  ;;  %1749 = vrot.lane.b32.xlu0 %v1731_v9, %s4430_s30  ;;  %v2292_v25 = vmax.f32 %v2290_v63, %v2291_v11  ;;  %v2410_v53 = vadd.f32 %v2359_v50, %v7786_v33  ;;  %v7795_v45 = vld [vmem:[#allocation11_spill] sm:$0xff] }
 0x233   :  { %v2300_v55 = vrot.slane %v2299_v34, 1 }
 0x234   :  { %v2293_v6 = vrot.slane %v2292_v25, 1  ;;  %v6605_v44 = vadd.f32 %v2435_v7, %v2410_v53  ;;  %v2365_v2 = vpop.permute.xlu1 %2364 }
 0x235   :  { %v2301_v51 = vmax.f32 %v2299_v34, %v2300_v55  ;;  %v2361_v20 = vpop.permute.xlu0 %2360  ;;  %v1737_v34 = vrot.slane %v7784_v8, 2  ;;  %v7799_v55 = vld [vmem:[#allocation17_spill] sm:$0xff]  ;;  %v7801_v8 = vld [vmem:[#allocation32_spill] sm:$0xff] }
 0x236   :  { %1755 = vrot.lane.b32.xlu1 %v1734_v57, %s4430_s30  ;;  %1680 = vrot.lane.b32.xlu0 %v1656_v1, %s4429_s0  ;;  %v2294_v31 = vmax.f32 %v2292_v25, %v2293_v6  ;;  %v2384_v18 = vsel %vm1696_vm12, %v2359_v50, %v2361_v20  ;;  %v7798_v1 = vld [vmem:[#allocation23_spill] sm:$0xff]  ;;  %v1740_v25 = vrot.slane %v7799_v55, 2  ;;  %v7802_v20 = vld [vmem:[#allocation18_spill] sm:$0xff] }
 0x237   :  { %v6609_v41 = vsel %vm2838_vm15, %v2301_v51, %v2869_v14  ;;  %v2411_v62 = vadd.f32 %v2384_v18, %v7788_v16  ;;  %v7800_v51 = vld [vmem:[#allocation13_spill] sm:$0xff]  ;;  %v1739_v16 = vrot.slane %v7787_v4, 2  ;;  %v1743_v4 = vrot.slane %v7797_v12, 2 }
 0x238   :  { %v6616_v47 = vsel %vm2838_vm15, %v2294_v31, %v2862_v52  ;;  %v2439_v0 = vpop.permute.xlu1 %2438  ;;  %v1663_v52 = vrot.slane %v7797_v12, 1  ;;  %v1662_v6 = vrot.slane %v7800_v51, 1  ;;  %v1742_v31 = vrot.slane %v7802_v20, 2  ;;  %v6925_v51 = vld [vmem:[%s7685_s5 + $0x1b8] sm:$0xff] }
 0x239   :  { %v2363_v22 = vpop.permute.xlu0 %2362  ;;  %v6620_v56 = vadd.f32 %v2435_v7, %v2411_v62  ;;  %v1660_v7 = vrot.slane %v7795_v45, 1 }
 0x23a   :  { %1686 = vrot.lane.b32.xlu1 %v1659_v49, %s4429_s0  ;;  %1753 = vrot.lane.b32.xlu0 %v1733_v42, %s4430_s30  ;;  %v2385_v46 = vsel %vm1696_vm12, %v2363_v22, %v2365_v2  ;;  %v2412_v13 = vadd.f32 %v2363_v22, %v7791_v40 }
 0x23b   :  { %v2413_v43 = vadd.f32 %v2385_v46, %v7792_v59  ;;  %v1741_v46 = vrot.slane %v7793_v19, 2 }
 0x23c   :  { %v6628_v26 = vpop.permute.xlu1 %2510 }
 0x23d   :  { %v2437_v38 = vpop.permute.xlu0 %2436 }
 0x23e   :  { %1759 = vrot.lane.b32.xlu1 %v1736_v23, %s4430_s30  ;;  %1684 = vrot.lane.b32.xlu0 %v1658_v30, %s4429_s0  ;;  %v6631_v5 = vadd.f32 %v2437_v38, %v2412_v13  ;;  %v6633_v48 = vadd.f32 %v2437_v38, %v2413_v43  ;;  %v7803_v23 = vld [vmem:[#allocation19_spill] sm:$0xff] }
 0x23f   :  { %v1744_v30 = vrot.slane %v7803_v23, 2  ;;  %v2929_v23 = vld [vmem:[%s7685_s5 + $0x30] sm:$0xff] }
 0x240   :  { %v2371_v9 = vpop.permute.xlu1 %2370 }
 0x241   :  { %v6639_v63 = vpop.permute.xlu0 %2506  ;;  %v6642_v14 = vadd.f32 %v2371_v9, %v7796_v60  ;;  %v7804_v60 = vld [vmem:[#allocation31_spill] sm:$0xff] }
 0x242   :  { %1690 = vrot.lane.b32.xlu1 %v1661_v24, %s4429_s0  ;;  %1757 = vrot.lane.b32.xlu0 %v1735_v28, %s4430_s30 }
 0x244   :  { %v2373_v11 = vpop.permute.xlu1 %2372 }
 0x245   :  { %v2367_v57 = vpop.permute.xlu0 %2366 }
 0x246   :  { %1763 = vrot.lane.b32.xlu1 %v1738_v61, %s4430_s30  ;;  %1688 = vrot.lane.b32.xlu0 %v1660_v7, %s4429_s0  ;;  %v2414_v50 = vadd.f32 %v2367_v57, %v7798_v1  ;;  %v2923_v1 = vld [vmem:[%s7685_s5] sm:$0xff] }
 0x248   :  { %v6652_v33 = vadd.f32 %v2439_v0, %v2414_v50  ;;  %v6654_v53 = vpop.permute.xlu1 %2442  ;;  %v7806_v50 = vld [vmem:[#allocation25_spill] sm:$0xff] }
 0x249   :  { %v2369_v49 = vpop.permute.xlu0 %2368 }
 0x24a   :  { %1694 = vrot.lane.b32.xlu1 %v1663_v52, %s4429_s0  ;;  %1761 = vrot.lane.b32.xlu0 %v1737_v34, %s4430_s30  ;;  %v2386_v2 = vsel %vm1696_vm12, %v2367_v57, %v2369_v49 }
 0x24b   :  { %v2415_v42 = vadd.f32 %v2386_v2, %v7801_v8  ;;  %v2926_v2 = vld [vmem:[%s7685_s5 + $0x18] sm:$0xff] }
 0x24c   :  { %v6662_v18 = vpop.permute.xlu1 %2518  ;;  %v2930_v8 = vld [vmem:[%s7685_s5 + $0x38] sm:$0xff] }
 0x24d   :  { %v2441_v62 = vpop.permute.xlu0 %2440  ;;  %v6665_v10 = vadd.f32 %v2439_v0, %v2415_v42  ;;  %v2933_v42 = vld [vmem:[%s7685_s5 + $0x50] sm:$0xff] }
 0x24e   :  { %1767 = vrot.lane.b32.xlu1 %v1740_v25, %s4430_s30  ;;  %1692 = vrot.lane.b32.xlu0 %v1662_v6, %s4429_s0  ;;  %v7807_v25 = vld [vmem:[#allocation35_spill] sm:$0xff] }
 0x250   :  { %v2379_v22 = vpop.permute.xlu1 %2378 }
 0x251   :  { %v6671_v40 = vpop.permute.xlu0 %2514 }
 0x252   :  { %1771 = vrot.lane.b32.xlu1 %v1742_v31, %s4430_s30  ;;  %1765 = vrot.lane.b32.xlu0 %v1739_v16, %s4430_s30  ;;  %v4107_v16 = vpack.c.bf16 %v2926_v2, %v2923_v1  ;;  %v6782_v1 = vld [vmem:[%s7685_s5 + $0xe0] sm:$0xff]  ;;  %v6799_v2 = vld [vmem:[%s7685_s5 + $0xd8] sm:$0xff] }
 0x254   :  { %v2381_v13 = vpop.permute.xlu1 %2380 }
 0x255   :  { %v2375_v0 = vpop.permute.xlu0 %2374 }
 0x256   :  { %1775 = vrot.lane.b32.xlu1 %v1744_v30, %s4430_s30  ;;  %1769 = vrot.lane.b32.xlu0 %v1741_v46, %s4430_s30  ;;  %v2418_v55 = vadd.f32 %v2375_v0, %v7806_v50  ;;  %v2932_v30 = vld [vmem:[%s7685_s5 + $0x48] sm:$0xff] }
 0x257   :  { %v2936_v46 = vld [vmem:[%s7685_s5 + $0x68] sm:$0xff] }
 0x258   :  { %v2497_v59 = vpop.permute.xlu1 %2496 }
 0x259   :  { %v2377_v43 = vpop.permute.xlu0 %2376  ;;  %v2526_v19 = vsel %vm2106_vm5, %v6535_v54, %v2497_v59  ;;  %v2551_v28 = vadd.f32 %v2497_v59, %v6568_v15  ;;  %v7805_v54 = vld [vmem:[#allocation33_spill] sm:$0xff]  ;;  %v2389_v15 = vsel %vm1696_vm12, %v2379_v22, %v2381_v13  ;;  %v6731_v13 = vadd.f32 %v2441_v62, %v6642_v14  ;;  %v2939_v59 = vld [vmem:[%s7685_s5 + $0x80] sm:$0xff] }
 0x25a   :  { %2873 = vrot.lane.b32.xlu1 %v6609_v41, %s4430_s30  ;;  %1773 = vrot.lane.b32.xlu0 %v1743_v4, %s4430_s30  ;;  %v2550_v24 = vadd.f32 %v2526_v19, %v6563_v58  ;;  %v2387_v41 = vsel %vm1696_vm12, %v2371_v9, %v2373_v11  ;;  %v2388_v7 = vsel %vm1696_vm12, %v2375_v0, %v2377_v43  ;;  %v2924_v9 = vld [vmem:[%s7685_s5 + $0x8] sm:$0xff]  ;;  %v2927_v11 = vld [vmem:[%s7685_s5 + $0x20] sm:$0xff] }
 0x25b   :  { %v2417_v58 = vadd.f32 %v2387_v41, %v7805_v54  ;;  %v2419_v6 = vadd.f32 %v2388_v7, %v7807_v25  ;;  %v6741_v43 = vld [vmem:[%s7685_s5 + $0x60] sm:$0xff]  ;;  %v6746_v14 = vld [vmem:[%s7685_s5 + $0x78] sm:$0xff]  ;;  %v6758_v54 = vld [vmem:[%s7685_s5 + $0xb0] sm:$0xff] }
 0x25c   :  { %v2593_v38 = vpop.permute.xlu1 %2592 }
 0x25d   :  { %v6685_v17 = vpop.permute.xlu0 %2444  ;;  %v2648_v61 = vadd.f32 %v2593_v38, %v2551_v28  ;;  %v6733_v4 = vadd.f32 %v2441_v62, %v2417_v58  ;;  %v7808_v62 = vld [vmem:[#allocation26_spill] sm:$0xff]  ;;  %v7809_v28 = vld [vmem:[#allocation37_spill] sm:$0xff]  ;;  %v6766_v58 = vadd.f32 %v6654_v53, %v2418_v55  ;;  %v6789_v25 = vadd.f32 %v6654_v53, %v2419_v6 }
 0x25e   :  { %2871 = vrot.lane.b32.xlu0 %v6616_v47, %s4430_s30  ;;  %v2420_v19 = vadd.f32 %v2379_v22, %v7808_v62  ;;  %v6763_v22 = vld [vmem:[%s7685_s5 + $0x90] sm:$0xff] }
 0x25f   :  { %v2673_v12 = vadd.f32 %v7804_v60, %v2648_v61  ;;  %v2421_v61 = vadd.f32 %v2389_v15, %v7809_v28 }
 0x260   :  { %v2501_v52 = vpop.permute.xlu1 %2500  ;;  %v6785_v50 = vadd.f32 %v6685_v17, %v2420_v19 }
 0x261   :  { %v2689_v34 = vmax.f32 %v2673_v12, 0.0  ;;  %v6692_v57 = vpop.permute.xlu0 %2522  ;;  %v2527_v47 = vsel %vm2106_vm5, %v6591_v39, %v2501_v52  ;;  %v4105_v39 = vpack.c.bf16 %v2927_v11, %v2924_v9  ;;  %v2553_v31 = vadd.f32 %v2501_v52, %v6589_v32  ;;  %v6753_v52 = vld [vmem:[%s7685_s5 + $0x98] sm:$0xff]  ;;  %v6772_v9 = vld [vmem:[%s7685_s5 + $0xa8] sm:$0xff] }
 0x262   :  { %v6708_v49 = vadd.f32 %v2527_v47, %v6582_v3  ;;  %v4109_v3 = vpack.c.bf16 %v2933_v42, %v2930_v8  ;;  %v4111_v12 = vpack.c.bf16 %v2932_v30, %v2929_v23  ;;  %v4113_v47 = vpack.c.bf16 %v2939_v59, %v2936_v46  ;;  %v6777_v11 = vld [vmem:[%s7685_s5 + $0xc8] sm:$0xff]  ;;  %v6804_v8 = vld [vmem:[%s7685_s5 + $0xf8] sm:$0xff] }
 0x263   :  { %v2713_v20 = vsel %vm2712_vm0, %v2689_v34, -inf  ;;  %4106 = vmatprep.subr.bf16.mxu1 %v4105_v39  ;;  %v6794_v39 = vld [vmem:[%s7685_s5 + $0xc0] sm:$0xff]  ;;  %v4115_v42 = vpack.c.bf16 %v6746_v14, %v6741_v43  ;;  %v4119_v46 = vpack.c.bf16 %v6772_v9, %v6763_v22  ;;  %v6838_v59 = vld [vmem:[%s7685_s5 + $0x128] sm:$0xff] }
 0x264   :  { %v2714_v32 = vrot.slane %v2713_v20, 4  ;;  %v2597_v0 = vpop.permute.xlu1 %2596  ;;  %4108 = vmatpush1.bf16.msra.mxu1 %v4107_v16  ;;  %v6823_v16 = vld [vmem:[%s7685_s5 + $0xf0] sm:$0xff]  ;;  %v6843_v43 = vld [vmem:[%s7685_s5 + $0x140] sm:$0xff] }
 0x265   :  { %v2591_v41 = vpop.permute.xlu0 %2590  ;;  %v2650_v7 = vadd.f32 %v2597_v0, %v2553_v31  ;;  %4110 = vmatprep.subr.bf16.mxu1 %v4109_v3  ;;  %v6818_v31 = vld [vmem:[%s7685_s5 + $0x110] sm:$0xff]  ;;  %v6848_v14 = vld [vmem:[%s7685_s5 + $0x120] sm:$0xff] }
 0x266   :  { %v2715_v15 = vmax.f32 %v2713_v20, %v2714_v32  ;;  %v2623_v34 = vsel %vm2622_vm1, %v2591_v41, %v2593_v38  ;;  %v4117_v20 = vpack.c.bf16 %v6758_v54, %v6753_v52  ;;  %v4121_v32 = vpack.c.bf16 %v6782_v1, %v6777_v11  ;;  %v6858_v41 = vld [vmem:[%s7685_s5 + $0x138] sm:$0xff] }
 0x267   :  { %v2647_v38 = vadd.f32 %v2623_v34, %v2550_v24  ;;  %v2675_v55 = vadd.f32 %v7804_v60, %v2650_v7  ;;  %v6807_v24 = vadd.f32 %v6685_v17, %v2421_v61  ;;  %v6828_v17 = vld [vmem:[%s7685_s5 + $0x108] sm:$0xff]  ;;  %v6863_v7 = vld [vmem:[%s7685_s5 + $0x158] sm:$0xff] }
 0x268   :  { %v2716_v53 = vrot.slane %v2715_v15, 2  ;;  %v6809_v6 = vpop.permute.xlu1 %2598  ;;  %4112 = vmatpush1.bf16.msra.mxu1 %v4111_v12  ;;  %v6882_v34 = vld [vmem:[%s7685_s5 + $0x168] sm:$0xff] }
 0x269   :  { %v2672_v3 = vadd.f32 %v7804_v60, %v2647_v38  ;;  %v2691_v23 = vmax.f32 %v2675_v55, 0.0  ;;  %v2595_v30 = vpop.permute.xlu0 %2594  ;;  %4114 = vmatprep.subr.bf16.mxu1 %v4113_v47 }
 0x26a   :  { %v2717_v62 = vmax.f32 %v2715_v15, %v2716_v53  ;;  %v2624_v19 = vsel %vm2622_vm1, %v2595_v30, %v2597_v0  ;;  %v6868_v0 = vld [vmem:[%s7685_s5 + $0x170] sm:$0xff]  ;;  %v6897_v30 = vld [vmem:[%s7685_s5 + $0x188] sm:$0xff] }
 0x26b   :  { %v2688_v12 = vmax.f32 %v2672_v3, 0.0  ;;  %v2727_v52 = vsel %vm2712_vm0, %v2691_v23, -inf  ;;  %v2649_v54 = vadd.f32 %v2624_v19, %v6708_v49  ;;  %v6877_v15 = vld [vmem:[%s7685_s5 + $0x150] sm:$0xff] }
 0x26c   :  { %v2718_v47 = vrot.slane %v2717_v62, 1  ;;  %v2728_v9 = vrot.slane %v2727_v52, 4  ;;  %v2509_v11 = vpop.permute.xlu1 %2508  ;;  %4116 = vmatpush1.bf16.msra.mxu1 %v4115_v42  ;;  %v6911_v42 = vld [vmem:[%s7685_s5 + $0x180] sm:$0xff] }
 0x26d   :  { %v2705_v38 = vsel %vm2704_vm6, %v2688_v12, -inf  ;;  %v2674_v55 = vadd.f32 %v7804_v60, %v2649_v54  ;;  %v2505_v53 = vpop.permute.xlu0 %2504  ;;  %v2529_v3 = vsel %vm2106_vm5, %v6639_v63, %v2509_v11  ;;  %4118 = vmatprep.subr.bf16.mxu1 %v4117_v20  ;;  %v6906_v63 = vld [vmem:[%s7685_s5 + $0x1a0] sm:$0xff]  ;;  %v2557_v54 = vadd.f32 %v2509_v11, %v6633_v48  ;;  %v6945_v11 = vld [vmem:[%s7685_s5 + $0x1c8] sm:$0xff] }
 0x26e   :  { %v2706_v19 = vrot.slane %v2705_v38, 4  ;;  %v2729_v1 = vmax.f32 %v2727_v52, %v2728_v9  ;;  %v2528_v12 = vsel %vm2106_vm5, %v6598_v21, %v2505_v53  ;;  %v6916_v52 = vld [vmem:[%s7685_s5 + $0x198] sm:$0xff]  ;;  %v2556_v9 = vadd.f32 %v2529_v3, %v6631_v5 }
 0x26f   :  { %v2690_v21 = vmax.f32 %v2674_v55, 0.0  ;;  %v2554_v20 = vadd.f32 %v2528_v12, %v6605_v44  ;;  %v2719_v23 = vmax.f32 %v2717_v62, %v2718_v47  ;;  %v2555_v61 = vadd.f32 %v2505_v53, %v6620_v56  ;;  %v6930_v55 = vld [vmem:[%s7685_s5 + $0x1d0] sm:$0xff]  ;;  %v6957_v12 = vld [vmem:[%s7685_s5 + $0x200] sm:$0xff] }
 0x270   :  { %v2707_v49 = vmax.f32 %v2705_v38, %v2706_v19  ;;  %v2730_v22 = vrot.slane %v2729_v1, 2  ;;  %v2605_v28 = vpop.permute.xlu1 %2604  ;;  %4120 = vmatpush1.bf16.msra.mxu1 %v4119_v46  ;;  %v6940_v47 = vld [vmem:[%s7685_s5 + $0x1b0] sm:$0xff]  ;;  %v6952_v19 = vld [vmem:[%s7685_s5 + $0x1e8] sm:$0xff] }
 0x271   :  { %v2720_v44 = vsel %vm2704_vm6, %v2690_v21, -inf  ;;  %v2601_v5 = vpop.permute.xlu0 %2600  ;;  %v2654_v48 = vadd.f32 %v2605_v28, %v2557_v54  ;;  %4122 = vmatprep.subr.bf16.mxu1 %v4121_v32 }
 0x272   :  { %v2708_v38 = vrot.slane %v2707_v49, 2  ;;  %v2731_v53 = vmax.f32 %v2729_v1, %v2730_v22  ;;  %v2721_v3 = vrot.slane %v2720_v44, 4  ;;  %v2625_v46 = vsel %vm2622_vm1, %v6809_v6, %v2601_v5 }
 0x273   :  { %v2651_v54 = vadd.f32 %v2625_v46, %v2554_v20  ;;  %v2652_v21 = vadd.f32 %v2601_v5, %v2555_v61  ;;  %v2679_v56 = vadd.f32 %v7804_v60, %v2654_v48  ;;  %v4141_v22 = vpack.c.bf16 %v6930_v55, %v6925_v51 }
 0x274   :  { %v2709_v1 = vmax.f32 %v2707_v49, %v2708_v38  ;;  %v2732_v6 = vrot.slane %v2731_v53, 1  ;;  %v2722_v32 = vmax.f32 %v2720_v44, %v2721_v3  ;;  %v2607_v62 = vpop.permute.xlu1 %2606  ;;  %v7810_v61 = vpack.c.bf16 %v6799_v2, %v6794_v39  ;;  %v6974_v49 = vld [vmem:[%s7685_s5 + $0x1e0] sm:$0xff]  ;;  %v6979_v44 = vld [vmem:[%s7685_s5 + $0x1f8] sm:$0xff]  ;;  %v6993_v3 = vld [vmem:[%s7685_s5 + $0x230] sm:$0xff] }
 0x275   :  { %v2676_v35 = vadd.f32 %v7804_v60, %v2651_v54  ;;  %v2677_v37 = vadd.f32 %v7804_v60, %v2652_v21  ;;  %v2695_v36 = vmax.f32 %v2679_v56, 0.0  ;;  %v2603_v29 = vpop.permute.xlu0 %2602  ;;  %v7811_v39 = vpack.c.bf16 %v6818_v31, %v6804_v8  ;;  %v6988_v2 = vld [vmem:[%s7685_s5 + $0x218] sm:$0xff] }
 0x276   :  { %4124 = vmatpush1.bf16.msra.mxu1 %v7810_v61  ;;  %v2710_v5 = vrot.slane %v2709_v1, 1  ;;  %v2733_v48 = vmax.f32 %v2731_v53, %v2732_v6  ;;  %v2723_v56 = vrot.slane %v2722_v32, 2  ;;  %v2626_v38 = vsel %vm2622_vm1, %v2603_v29, %v2605_v28 }
 0x277   :  { %4126 = vmatprep.subr.bf16.mxu1 %v7811_v39  ;;  %v2692_v46 = vmax.f32 %v2676_v35, 0.0  ;;  %v2693_v54 = vmax.f32 %v2677_v37, 0.0  ;;  %v2755_v53 = vsel %vm2712_vm0, %v2695_v36, -inf  ;;  %v2653_v21 = vadd.f32 %v2626_v38, %v2556_v9 }
 0x278   :  { %v6997_v29 = vsel %vm2826_vm8, %v2733_v48, %v2719_v23  ;;  %v2724_v8 = vmax.f32 %v2722_v32, %v2723_v56  ;;  %v2756_v31 = vrot.slane %v2755_v53, 4  ;;  %v2517_v28 = vpop.permute.xlu1 %2516  ;;  %v7812_v36 = vpack.c.bf16 %v6828_v17, %v6823_v16 }
 0x279   :  { %v2734_v61 = vsel %vm2704_vm6, %v2692_v46, -inf  ;;  %v2741_v39 = vsel %vm2712_vm0, %v2693_v54, -inf  ;;  %v2678_v20 = vadd.f32 %v7804_v60, %v2653_v21  ;;  %v2513_v35 = vpop.permute.xlu0 %2512  ;;  %v7813_v56 = vpack.c.bf16 %v6843_v43, %v6838_v59 }
 0x27a   :  { %4128 = vmatpush1.bf16.msra.mxu1 %v7812_v36  ;;  %v2725_v23 = vrot.slane %v2724_v8, 1  ;;  %v2735_v9 = vrot.slane %v2734_v61, 4  ;;  %v2742_v32 = vrot.slane %v2741_v39, 4  ;;  %v2757_v48 = vmax.f32 %v2755_v53, %v2756_v31 }
 0x27b   :  { %4130 = vmatprep.subr.bf16.mxu1 %v7813_v56  ;;  %v2711_v38 = vmax.f32 %v2709_v1, %v2710_v5  ;;  %v2694_v46 = vmax.f32 %v2678_v20, 0.0  ;;  %v2530_v54 = vsel %vm2106_vm5, %v6628_v26, %v2513_v35  ;;  %v2531_v16 = vsel %vm2106_vm5, %v6671_v40, %v2517_v28  ;;  %v7049_v56 = vld [vmem:[%s7685_s5 + $0x248] sm:$0xff] }
 0x27c   :  { %v2726_v17 = vmax.f32 %v2724_v8, %v2725_v23  ;;  %v2736_v21 = vmax.f32 %v2734_v61, %v2735_v9  ;;  %v2743_v36 = vmax.f32 %v2741_v39, %v2742_v32  ;;  %v2758_v37 = vrot.slane %v2757_v48, 2 }
 0x27d   :  { %v2748_v45 = vsel %vm2704_vm6, %v2694_v46, -inf  ;;  %v2558_v53 = vadd.f32 %v2530_v54, %v6652_v33  ;;  %v2559_v59 = vadd.f32 %v2513_v35, %v6665_v10  ;;  %v2561_v43 = vadd.f32 %v2517_v28, %v6733_v4  ;;  %v2609_v1 = vpop.permute.xlu0 %2608 }
 0x27e   :  { %v2613_v6 = vpop.permute.xlu1 %2612  ;;  %v7814_v26 = vpack.c.bf16 %v6858_v41, %v6848_v14  ;;  %v7024_v40 = vsel %vm2826_vm8, %v2726_v17, %v2711_v38  ;;  %v2737_v20 = vrot.slane %v2736_v21, 2  ;;  %v2744_v5 = vrot.slane %v2743_v36, 2  ;;  %v7033_v14 = vld [vmem:[%s7685_s5 + $0x210] sm:$0xff]  ;;  %v7038_v41 = vld [vmem:[%s7685_s5 + $0x228] sm:$0xff] }
 0x27f   :  { %v2759_v8 = vmax.f32 %v2757_v48, %v2758_v37  ;;  %v7815_v31 = vpack.c.bf16 %v6868_v0, %v6863_v7  ;;  %v2749_v33 = vrot.slane %v2748_v45, 4  ;;  %v2627_v10 = vsel %vm2622_vm1, %v2607_v62, %v2609_v1 }
 0x280   :  { %4132 = vmatpush1.bf16.msra.mxu1 %v7814_v26  ;;  %v2656_v61 = vadd.f32 %v2609_v1, %v2559_v59  ;;  %v2658_v4 = vadd.f32 %v2613_v6, %v2561_v43  ;;  %v2738_v28 = vmax.f32 %v2736_v21, %v2737_v20  ;;  %v2745_v39 = vmax.f32 %v2743_v36, %v2744_v5 }
 0x281   :  { %4134 = vmatprep.subr.bf16.mxu1 %v7815_v31  ;;  %v2760_v35 = vrot.slane %v2759_v8, 1  ;;  %v2655_v7 = vadd.f32 %v2627_v10, %v2558_v53  ;;  %v2750_v37 = vmax.f32 %v2748_v45, %v2749_v33  ;;  %v2560_v62 = vadd.f32 %v2531_v16, %v6731_v13  ;;  %v7054_v45 = vld [vmem:[%s7685_s5 + $0x260] sm:$0xff] }
 0x282   :  { %v2617_v0 = vpop.permute.xlu1 %2616  ;;  %v2681_v23 = vadd.f32 %v7804_v60, %v2656_v61  ;;  %v2683_v9 = vadd.f32 %v7804_v60, %v2658_v4  ;;  %v7816_v48 = vpack.c.bf16 %v6882_v34, %v6877_v15  ;;  %v2739_v13 = vrot.slane %v2738_v28, 1 }
 0x283   :  { %v2611_v32 = vpop.permute.xlu0 %2610  ;;  %v2746_v38 = vrot.slane %v2745_v39, 1  ;;  %v2680_v46 = vadd.f32 %v7804_v60, %v2655_v7  ;;  %v7817_v54 = vpack.c.bf16 %v6906_v63, %v6897_v30  ;;  %v4151_v15 = vpack.c.bf16 %v7038_v41, %v7033_v14 }
 0x284   :  { %4136 = vmatpush1.bf16.msra.mxu1 %v7816_v48  ;;  %v2751_v34 = vrot.slane %v2750_v37, 2  ;;  %v2697_v16 = vmax.f32 %v2681_v23, 0.0  ;;  %v2699_v17 = vmax.f32 %v2683_v9, 0.0  ;;  %v2628_v21 = vsel %vm2622_vm1, %v2611_v32, %v2613_v6 }
 0x285   :  { %4138 = vmatprep.subr.bf16.mxu1 %v7817_v54  ;;  %v7063_v36 = vmax.f32 %v2759_v8, %v2760_v35  ;;  %v2696_v53 = vmax.f32 %v2680_v46, 0.0  ;;  %v2657_v59 = vadd.f32 %v2628_v21, %v2560_v62  ;;  %v4153_v1 = vpack.c.bf16 %v7054_v45, %v7049_v56  ;;  %v2995_v45 = vld [vmem:[%s7685_s5 + $0x240] sm:$0xff] }
 0x286   :  { %v2525_v43 = vpop.permute.xlu1 %2524  ;;  %v7067_v26 = vmax.f32 %v2738_v28, %v2739_v13  ;;  %v7069_v30 = vmax.f32 %v2750_v37, %v2751_v34  ;;  %v2769_v63 = vsel %vm2712_vm0, %v2697_v16, -inf  ;;  %v2783_v20 = vsel %vm2712_vm0, %v2699_v17, -inf }
 0x287   :  { %v2521_v5 = vpop.permute.xlu0 %2520  ;;  %v7818_v6 = vpack.c.bf16 %v6916_v52, %v6911_v42  ;;  %v2762_v8 = vsel %vm2704_vm6, %v2696_v53, -inf  ;;  %v2770_v31 = vrot.slane %v2769_v63, 4  ;;  %v2784_v33 = vrot.slane %v2783_v20, 4 }
 0x288   :  { %v2682_v10 = vadd.f32 %v7804_v60, %v2657_v59  ;;  %v2747_v61 = vmax.f32 %v2745_v39, %v2746_v38  ;;  %v2763_v4 = vrot.slane %v2762_v8, 4  ;;  %v2532_v28 = vsel %vm2106_vm5, %v6662_v18, %v2521_v5 }
 0x289   :  { %4140 = vmatpush1.bf16.msra.mxu1 %v7818_v6  ;;  %v2563_v35 = vadd.f32 %v2521_v5, %v6789_v25  ;;  %v2771_v7 = vmax.f32 %v2769_v63, %v2770_v31  ;;  %v2785_v42 = vmax.f32 %v2783_v20, %v2784_v33  ;;  %v2533_v37 = vsel %vm2106_vm5, %v6692_v57, %v2525_v43 }
 0x28a   :  { %4142 = vmatprep.subr.bf16.mxu1 %v4141_v22  ;;  %v2698_v52 = vmax.f32 %v2682_v10, 0.0  ;;  %v2621_v62 = vpop.permute.xlu1 %2620  ;;  %v2753_v23 = vrot.slane %v7069_v30, 1  ;;  %v2764_v9 = vmax.f32 %v2762_v8, %v2763_v4  ;;  %v2562_v51 = vadd.f32 %v2532_v28, %v6766_v58 }
 0x28b   :  { %v2660_v55 = vadd.f32 %v2617_v0, %v2563_v35  ;;  %v2615_v22 = vpop.permute.xlu0 %2614  ;;  %v7819_v39 = vpack.c.bf16 %v6945_v11, %v6940_v47  ;;  %v2772_v18 = vrot.slane %v2771_v7, 2  ;;  %v2786_v25 = vrot.slane %v2785_v42, 2 }
 0x28c   :  { %v2776_v32 = vsel %vm2704_vm6, %v2698_v52, -inf  ;;  %v2565_v48 = vadd.f32 %v2525_v43, %v6807_v24  ;;  %v7820_v57 = vpack.c.bf16 %v6957_v12, %v6952_v19  ;;  %v2765_v13 = vrot.slane %v2764_v9, 2 }
 0x28d   :  { %4144 = vmatpush1.bf16.msra.mxu1 %v7819_v39  ;;  %v2777_v38 = vrot.slane %v2776_v32, 4  ;;  %v2685_v58 = vadd.f32 %v7804_v60, %v2660_v55  ;;  %v2629_v46 = vsel %vm2622_vm1, %v2615_v22, %v2617_v0  ;;  %v2773_v54 = vmax.f32 %v2771_v7, %v2772_v18  ;;  %v2998_v18 = vld [vmem:[%s7685_s5 + $0x258] sm:$0xff] }
 0x28e   :  { %4146 = vmatprep.subr.bf16.mxu1 %v7820_v57  ;;  %v2787_v34 = vmax.f32 %v2785_v42, %v2786_v25  ;;  %v2659_v47 = vadd.f32 %v2629_v46, %v2562_v51  ;;  %v2662_v11 = vadd.f32 %v2621_v62, %v2565_v48  ;;  %v2766_v17 = vmax.f32 %v2764_v9, %v2765_v13  ;;  %v3002_v25 = vld [vmem:[%s7685_s5 + $0x278] sm:$0xff] }
 0x28f   :  { %v7098_v16 = vpop.permute.xlu1 %1670  ;;  %v2778_v21 = vmax.f32 %v2776_v32, %v2777_v38  ;;  %v2701_v53 = vmax.f32 %v2685_v58, 0.0  ;;  %v2619_v24 = vpop.permute.xlu0 %2618  ;;  %v2902_v19 = vsel %vm2828_vm9, %v2747_v61, %v6997_v29  ;;  %v7821_v12 = vpack.c.bf16 %v6979_v44, %v6974_v49  ;;  %v3005_v32 = vld [vmem:[%s7685_s5 + $0x290] sm:$0xff] }
 0x290   :  { %v2774_v59 = vrot.slane %v2773_v54, 1  ;;  %v2788_v43 = vrot.slane %v2787_v34, 1  ;;  %v2684_v0 = vadd.f32 %v7804_v60, %v2659_v47  ;;  %v2687_v63 = vadd.f32 %v7804_v60, %v2662_v11 }
 0x291   :  { %4148 = vmatpush1.bf16.msra.mxu1 %v7821_v12  ;;  %v7822_v20 = vpack.c.bf16 %v6993_v3, %v6988_v2  ;;  %v2779_v5 = vrot.slane %v2778_v21, 2  ;;  %v2797_v6 = vsel %vm2712_vm0, %v2701_v53, -inf  ;;  %v2564_v8 = vadd.f32 %v2533_v37, %v6785_v50 }
 0x292   :  { %v2630_v29 = vsel %vm2622_vm1, %v2619_v24, %v2621_v62  ;;  %v2767_v31 = vrot.slane %v2766_v17, 1  ;;  %v2775_v49 = vmax.f32 %v2773_v54, %v2774_v59  ;;  %v2798_v44 = vrot.slane %v2797_v6, 4  ;;  %v3001_v54 = vld [vmem:[%s7685_s5 + $0x270] sm:$0xff]  ;;  %v3008_v24 = vld [vmem:[%s7685_s5 + $0x2a8] sm:$0xff] }
 0x293   :  { %4150 = vmatprep.subr.bf16.mxu1 %v7822_v20  ;;  %v2700_v33 = vmax.f32 %v2684_v0, 0.0  ;;  %v7113_v10 = vpop.permute.xlu1 %1674  ;;  %v2789_v61 = vmax.f32 %v2787_v34, %v2788_v43  ;;  %v2780_v4 = vmax.f32 %v2778_v21, %v2779_v5  ;;  %v2703_v28 = vmax.f32 %v2687_v63, 0.0  ;;  %v3004_v34 = vld [vmem:[%s7685_s5 + $0x288] sm:$0xff] }
 0x294   :  { %v2661_v35 = vadd.f32 %v2630_v29, %v2564_v8  ;;  %v7115_v7 = vpop.permute.xlu0 %1668  ;;  %v2754_v50 = vmax.f32 %v7069_v30, %v2753_v23  ;;  %v2799_v2 = vmax.f32 %v2797_v6, %v2798_v44  ;;  %v2903_v42 = vsel %vm2830_vm10, %v7063_v36, %v2902_v19  ;;  %v3011_v19 = vld [vmem:[%s7685_s5 + $0x2c0] sm:$0xff] }
 0x295   :  { %4152 = vmatpush1.bf16.msra.mxu1 %v4151_v15  ;;  %v2790_v3 = vsel %vm2704_vm6, %v2700_v33, -inf  ;;  %v2781_v52 = vrot.slane %v2780_v4, 1  ;;  %v2811_v62 = vsel %vm2712_vm0, %v2703_v28, -inf  ;;  %v2768_v14 = vmax.f32 %v2766_v17, %v2767_v31  ;;  %v3007_v31 = vld [vmem:[%s7685_s5 + $0x2a0] sm:$0xff] }
 0x296   :  { %4154 = vmatprep.subr.bf16.mxu1 %v4153_v1  ;;  %v2791_v37 = vrot.slane %v2790_v3, 4  ;;  %v2686_v9 = vadd.f32 %v7804_v60, %v2661_v35  ;;  %v2800_v41 = vrot.slane %v2799_v2, 2  ;;  %v2812_v15 = vrot.slane %v2811_v62, 4 }
 0x297   :  { %v7129_v30 = vpop.permute.xlu1 %1678  ;;  %v2904_v23 = vsel %vm2832_vm11, %v2775_v49, %v2903_v42  ;;  %v2782_v51 = vmax.f32 %v2780_v4, %v2781_v52  ;;  %v2895_v39 = vsel %vm2828_vm9, %v7067_v26, %v7024_v40  ;;  %v4155_v21 = vpack.c.bf16 %v2998_v18, %v2995_v45  ;;  %v3010_v49 = vld [vmem:[%s7685_s5 + $0x2b8] sm:$0xff]  ;;  %v3017_v4 = vld [vmem:[%s7685_s5 + $0x2f0] sm:$0xff] }
 0x298   :  { %v2792_v55 = vmax.f32 %v2790_v3, %v2791_v37  ;;  %v2702_v36 = vmax.f32 %v2686_v9, 0.0  ;;  %v7132_v22 = vpop.permute.xlu0 %1672  ;;  %v2905_v56 = vsel %vm2834_vm13, %v2789_v61, %v2904_v23  ;;  %v2801_v1 = vmax.f32 %v2799_v2, %v2800_v41  ;;  %v3014_v61 = vld [vmem:[%s7685_s5 + $0x2d8] sm:$0xff]  ;;  %v3016_v9 = vld [vmem:[%s7685_s5 + $0x2e8] sm:$0xff] }
 0x299   :  { %v2813_v60 = vmax.f32 %v2811_v62, %v2812_v15  ;;  %v2896_v13 = vsel %vm2830_vm10, %v2754_v50, %v2895_v39  ;;  %v4157_v53 = vpack.c.bf16 %v3005_v32, %v3002_v25  ;;  %4156 = vmatpush1.bf16.msra.mxu1 %v4155_v21  ;;  %v4159_v63 = vpack.c.bf16 %v3004_v34, %v3001_v54  ;;  %v3013_v62 = vld [vmem:[%s7685_s5 + $0x2d0] sm:$0xff]  ;;  %v3020_v41 = vld [vmem:[%s7685_s5 + $0x308] sm:$0xff]  ;;  %v3023_v15 = vld [vmem:[%s7685_s5 + $0x320] sm:$0xff] }
 0x29a   :  { %v2793_v48 = vrot.slane %v2792_v55, 2  ;;  %v2804_v57 = vsel %vm2704_vm6, %v2702_v36, -inf  ;;  %v2802_v26 = vrot.slane %v2801_v1, 1  ;;  %v2897_v46 = vsel %vm2832_vm11, %v2768_v14, %v2896_v13  ;;  %v7824_v13 = vld [vmem:[#allocation36_spill] sm:$0xff]  ;;  %v7826_v34 = vld [vmem:[#allocation3_spill] sm:$0xff] }
 0x29b   :  { %v2814_v38 = vrot.slane %v2813_v60, 2  ;;  %v2805_v58 = vrot.slane %v2804_v57, 4  ;;  %v2898_v17 = vsel %vm2834_vm13, %v2782_v51, %v2897_v46  ;;  %4158 = vmatprep.subr.bf16.mxu1 %v4157_v53  ;;  %v4161_v29 = vpack.c.bf16 %v3011_v19, %v3008_v24 }
 0x29c   :  { %v7152_v40 = vpop.permute.xlu1 %1747  ;;  %v2794_v47 = vmax.f32 %v2792_v55, %v2793_v48  ;;  %v1677_v11 = vpop.permute.xlu0 %1676  ;;  %v2803_v43 = vmax.f32 %v2801_v1, %v2802_v26  ;;  %v4163_v2 = vpack.c.bf16 %v3010_v49, %v3007_v31  ;;  %v4165_v37 = vpack.c.bf16 %v3017_v4, %v3014_v61 }
 0x29d   :  { %v2815_v12 = vmax.f32 %v2813_v60, %v2814_v38  ;;  %v2806_v59 = vmax.f32 %v2804_v57, %v2805_v58  ;;  %4160 = vmatpush1.bf16.msra.mxu1 %v4159_v63  ;;  %v4167_v51 = vpack.c.bf16 %v3016_v9, %v3013_v62  ;;  %v1698_v39 = vsel %vm1696_vm12, %v7115_v7, %v7098_v16  ;;  %v7823_v57 = vld [vmem:[#allocation34_spill] sm:$0xff]  ;;  %v7825_v16 = vld [vmem:[#allocation5_spill] sm:$0xff] }
 0x29e   :  { %v2795_v0 = vrot.slane %v2794_v47, 1  ;;  %v2906_v8 = vsel %vm2836_vm14, %v2803_v43, %v2905_v56  ;;  %4162 = vmatprep.subr.bf16.mxu1 %v4161_v29  ;;  %v4169_v56 = vpack.c.bf16 %v3023_v15, %v3020_v41  ;;  %v1699_v25 = vsel %vm1696_vm12, %v7132_v22, %v7113_v10  ;;  %v7829_v41 = vld [vmem:[#allocation9_spill] sm:$0xff] }
 0x29f   :  { %v2807_v20 = vrot.slane %v2806_v59, 2  ;;  %v2816_v6 = vrot.slane %v2815_v12, 1  ;;  %v1697_v38 = vsel %vm1696_vm12, %v7824_v13, %v7823_v57  ;;  %v1714_v58 = vadd.f32 %v1698_v39, %v6059_v27 }
 0x2a0   :  { %v1752_v5 = vpop.permute.xlu1 %1751  ;;  %v1746_v44 = vpop.permute.xlu0 %1745  ;;  %v2796_v33 = vmax.f32 %v2794_v47, %v2795_v0  ;;  %v1700_v26 = vsel %vm1696_vm12, %v1677_v11, %v7129_v30  ;;  %v1715_v7 = vadd.f32 %v1699_v25, %v7825_v16  ;;  %v1713_v47 = vadd.f32 %v1697_v38, %v7826_v34  ;;  %v7219_v30 = vld [vmem:[%s7686_s2] ss:$0 sm:$0xff]  ;;  %v7831_v34 = vld [vmem:[#allocation13_spill] sm:$0xff] }
 0x2a1   :  { %v2817_v28 = vmax.f32 %v2815_v12, %v2816_v6  ;;  %v2808_v35 = vmax.f32 %v2806_v59, %v2807_v20  ;;  %4164 = vmatpush1.bf16.msra.mxu1 %v4163_v2  ;;  %v1778_v54 = vsel %vm1777_vm4, %v1746_v44, %v7152_v40  ;;  %vm1825_vm5 = vcmask 816128  }
 0x2a2   :  { %v2899_v50 = vsel %vm2836_vm14, %v2796_v33, %v2898_v17  ;;  %4166 = vmatprep.subr.bf16.mxu1 %v4165_v37  ;;  %v7827_v17 = vld [vmem:[#allocation6_spill] sm:$0xff]  ;;  %v1794_v11 = vadd.f32 %v1778_v54, %v1713_v47 }
 0x2a3   :  { %v2907_v3 = vsel %vm2838_vm15, %v2817_v28, %v2906_v8  ;;  %v2809_v52 = vrot.slane %v2808_v35, 1  ;;  %v1716_v21 = vadd.f32 %v1700_v26, %v7827_v17  ;;  %v7828_v8 = vld [vmem:[#allocation7_spill] sm:$0xff] }
 0x2a4   :  { %v1683_v42 = vpop.permute.xlu1 %1682  ;;  %2910 = vrot.lane.b32.xlu1 %v2907_v3, %s4433_s18  ;;  %v1750_v14 = vpop.permute.xlu0 %1749  ;;  %v1809_v63 = vadd.f32 %v7219_v30, %v1794_v11 }
 0x2a5   :  { %v2810_v23 = vmax.f32 %v2808_v35, %v2809_v52  ;;  %4168 = vmatpush1.bf16.msra.mxu1 %v4167_v51  ;;  %v1779_v32 = vsel %vm1777_vm4, %v1750_v14, %v1752_v5 }
 0x2a6   :  { %4170 = vmatprep.subr.bf16.mxu1 %v4169_v56  ;;  %v1795_v10 = vadd.f32 %v1779_v32, %v1714_v58  ;;  %v1817_v33 = vmax.f32 %v1809_v63, 0.0  ;;  %v7830_v32 = vld [vmem:[#allocation11_spill] sm:$0xff] }
 0x2a7   :  { %v2900_v55 = vsel %vm2838_vm15, %v2810_v23, %v2899_v50 }
 0x2a8   :  { %v1756_v36 = vpop.permute.xlu1 %1755  ;;  %2908 = vrot.lane.b32.xlu0 %v2900_v55, %s4433_s18  ;;  %v1681_v45 = vpop.permute.xlu0 %1680  ;;  %v1810_v12 = vadd.f32 %v7219_v30, %v1795_v10  ;;  %v1826_v52 = vsel %vm1825_vm5, %v1817_v33, -inf }
 0x2a9   :  { %v1701_v43 = vsel %vm1696_vm12, %v1681_v45, %v1683_v42  ;;  %v1827_v55 = vrot.slane %v1826_v52, 4 }
 0x2aa   :  { %v1818_v5 = vmax.f32 %v1810_v12, 0.0  ;;  %v1717_v29 = vadd.f32 %v1701_v43, %v7828_v8 }
 0x2ab   :  { %v1828_v38 = vmax.f32 %v1826_v52, %v1827_v55  ;;  %v3349_v55 = vld [vmem:[%s7687_s7 + $0x10] sm:$0xff] }
 0x2ac   :  { %v1687_v1 = vpop.permute.xlu1 %1686  ;;  %v1754_v60 = vpop.permute.xlu0 %1753  ;;  %v1833_v28 = vsel %vm1825_vm5, %v1818_v5, -inf }
 0x2ad   :  { %v1780_v46 = vsel %vm1777_vm4, %v1754_v60, %v1756_v36  ;;  %v1834_v37 = vrot.slane %v1833_v28, 4 }
 0x2ae   :  { %v1796_v24 = vadd.f32 %v1780_v46, %v1715_v7 }
 0x2af   :  { %v1835_v60 = vmax.f32 %v1833_v28, %v1834_v37 }
 0x2b0   :  { %v1760_v18 = vpop.permute.xlu1 %1759  ;;  %v1685_v48 = vpop.permute.xlu0 %1684  ;;  %v1811_v0 = vadd.f32 %v7219_v30, %v1796_v24 }
 0x2b1   :  { %v1702_v42 = vsel %vm1696_vm12, %v1685_v48, %v1687_v1  ;;  %v1836_v16 = vrot.slane %v1835_v60, 2 }
 0x2b2   :  { %v1819_v49 = vmax.f32 %v1811_v0, 0.0  ;;  %v1718_v15 = vadd.f32 %v1702_v42, %v7829_v41 }
 0x2b4   :  { %v1691_v22 = vpop.permute.xlu1 %1690  ;;  %v1758_v53 = vpop.permute.xlu0 %1757  ;;  %v1840_v3 = vsel %vm1825_vm5, %v1819_v49, -inf }
 0x2b5   :  { %v1781_v27 = vsel %vm1777_vm4, %v1758_v53, %v1760_v18  ;;  %v1841_v14 = vrot.slane %v1840_v3, 4 }
 0x2b6   :  { %v1797_v19 = vadd.f32 %v1781_v27, %v1716_v21  ;;  %v1829_v27 = vrot.slane %v1828_v38, 2 }
 0x2b7   :  { %v1842_v25 = vmax.f32 %v1840_v3, %v1841_v14  ;;  %v3347_v14 = vld [vmem:[%s7687_s7] sm:$0xff] }
 0x2b8   :  { %v1764_v40 = vpop.permute.xlu1 %1763  ;;  %v1689_v59 = vpop.permute.xlu0 %1688  ;;  %v1812_v20 = vadd.f32 %v7219_v30, %v1797_v19  ;;  %v1830_v8 = vmax.f32 %v1828_v38, %v1829_v27  ;;  %v3358_v38 = vld [vmem:[%s7687_s7 + $0x58] sm:$0xff] }
 0x2b9   :  { %v1703_v56 = vsel %vm1696_vm12, %v1689_v59, %v1691_v22  ;;  %v1843_v22 = vrot.slane %v1842_v25, 2 }
 0x2ba   :  { %v1820_v61 = vmax.f32 %v1812_v20, 0.0  ;;  %v1719_v48 = vadd.f32 %v1703_v56, %v7830_v32  ;;  %v3354_v56 = vld [vmem:[%s7687_s7 + $0x38] sm:$0xff] }
 0x2bb   :  { %v1844_v20 = vmax.f32 %v1842_v25, %v1843_v22  ;;  %v3356_v25 = vld [vmem:[%s7687_s7 + $0x48] sm:$0xff]  ;;  %v3357_v22 = vld [vmem:[%s7687_s7 + $0x50] sm:$0xff] }
 0x2bc   :  { %v1695_v6 = vpop.permute.xlu1 %1694  ;;  %v1762_v31 = vpop.permute.xlu0 %1761  ;;  %v1847_v62 = vsel %vm1825_vm5, %v1820_v61, -inf }
 0x2bd   :  { %v1782_v44 = vsel %vm1777_vm4, %v1762_v31, %v1764_v40  ;;  %v1848_v36 = vrot.slane %v1847_v62, 4  ;;  %v1837_v40 = vmax.f32 %v1835_v60, %v1836_v16  ;;  %v4227_v60 = vpack.c.bf16 %v3349_v55, %v3347_v14  ;;  %v3382_v55 = vld [vmem:[%s7687_s7 + $0x118] sm:$0xff] }
 0x2be   :  { %v1798_v4 = vadd.f32 %v1782_v44, %v1717_v29 }
 0x2bf   :  { %v1849_v58 = vmax.f32 %v1847_v62, %v1848_v36  ;;  %v1838_v44 = vrot.slane %v1837_v40, 1  ;;  %v3352_v36 = vld [vmem:[%s7687_s7 + $0x28] sm:$0xff] }
 0x2c0   :  { %v1813_v35 = vadd.f32 %v7219_v30, %v1798_v4  ;;  %v1693_v50 = vpop.permute.xlu0 %1692  ;;  %v1768_v2 = vpop.permute.xlu1 %1767 }
 0x2c1   :  { %v1704_v26 = vsel %vm1696_vm12, %v1693_v50, %v1695_v6  ;;  %v1850_v11 = vrot.slane %v1849_v58, 2  ;;  %v1839_v37 = vmax.f32 %v1837_v40, %v1838_v44  ;;  %v3365_v44 = vld [vmem:[%s7687_s7 + $0x90] sm:$0xff] }
 0x2c2   :  { %v1821_v9 = vmax.f32 %v1813_v35, 0.0  ;;  %v1720_v47 = vadd.f32 %v1704_v26, %v7831_v34  ;;  %v1845_v35 = vrot.slane %v1844_v20, 1 }
 0x2c3   :  { %v1851_v29 = vmax.f32 %v1849_v58, %v1850_v11 }
 0x2c4   :  { %v1854_v23 = vsel %vm1825_vm5, %v1821_v9, -inf  ;;  %v1766_v51 = vpop.permute.xlu0 %1765  ;;  %v1772_v18 = vpop.permute.xlu1 %1771  ;;  %v3350_v9 = vld [vmem:[%s7687_s7 + $0x18] sm:$0xff] }
 0x2c5   :  { %v1783_v45 = vsel %vm1777_vm4, %v1766_v51, %v1768_v2  ;;  %v1855_v1 = vrot.slane %v1854_v23, 4  ;;  %v1831_v2 = vrot.slane %v1830_v8, 1  ;;  %v1852_v3 = vrot.slane %v1851_v29, 1 }
 0x2c6   :  { %v1799_v39 = vadd.f32 %v1783_v45, %v1718_v15  ;;  %v1846_v45 = vmax.f32 %v1844_v20, %v1845_v35  ;;  %v3366_v20 = vld [vmem:[%s7687_s7 + $0x98] sm:$0xff]  ;;  %v3367_v35 = vld [vmem:[%s7687_s7 + $0xa0] sm:$0xff] }
 0x2c7   :  { %v1856_v7 = vmax.f32 %v1854_v23, %v1855_v1  ;;  %v4229_v1 = vpack.c.bf16 %v3354_v56, %v3352_v36  ;;  %v1832_v32 = vmax.f32 %v1830_v8, %v1831_v2  ;;  %v3372_v2 = vld [vmem:[%s7687_s7 + $0xc8] sm:$0xff] }
 0x2c8   :  { %v1814_v57 = vadd.f32 %v7219_v30, %v1799_v39  ;;  %v1770_v13 = vpop.permute.xlu0 %1769  ;;  %v1776_v53 = vpop.permute.xlu1 %1775  ;;  %v3351_v39 = vld [vmem:[%s7687_s7 + $0x20] sm:$0xff] }
 0x2c9   :  { %v1784_v46 = vsel %vm1777_vm4, %v1770_v13, %v1772_v18  ;;  %v1857_v59 = vrot.slane %v1856_v7, 2  ;;  %v3353_v18 = vld [vmem:[%s7687_s7 + $0x30] sm:$0xff] }
 0x2ca   :  { %v1822_v54 = vmax.f32 %v1814_v57, 0.0  ;;  %v1800_v10 = vadd.f32 %v1784_v46, %v1719_v48  ;;  %v1853_v48 = vmax.f32 %v1851_v29, %v1852_v3  ;;  %v4231_v26 = vpack.c.bf16 %v3353_v18, %v3351_v39  ;;  %v3374_v3 = vld [vmem:[%s7687_s7 + $0xd8] sm:$0xff] }
 0x2cb   :  { %v1858_v33 = vmax.f32 %v1856_v7, %v1857_v59  ;;  %v2827_v46 = vsel %vm2826_vm8, %v1839_v37, %v1832_v32  ;;  %v3359_v59 = vld [vmem:[%s7687_s7 + $0x60] sm:$0xff]  ;;  %v3386_v39 = vld [vmem:[%s7687_s7 + $0x138] sm:$0xff]  ;;  %vm2912_vm8 = vcmask 97280  }
 0x2cc   :  { %v1861_v17 = vsel %vm1825_vm5, %v1822_v54, -inf  ;;  %v1815_v21 = vadd.f32 %v7219_v30, %v1800_v10  ;;  %v1774_v24 = vpop.permute.xlu0 %1773  ;;  %v4233_v54 = vpack.c.bf16 %v3358_v38, %v3356_v25  ;;  %v3355_v10 = vld [vmem:[%s7687_s7 + $0x40] sm:$0xff]  ;;  %v2829_v34 = vsel %vm2828_vm9, %v1846_v45, %v2827_v46  ;;  %v3389_v46 = vld [vmem:[%s7687_s7 + $0x150] sm:$0xff] }
 0x2cd   :  { %v1862_v19 = vrot.slane %v1861_v17, 4  ;;  %v1785_v12 = vsel %vm1777_vm4, %v1774_v24, %v1776_v53  ;;  %v1859_v62 = vrot.slane %v1858_v33, 1  ;;  %v2831_v53 = vsel %vm2830_vm10, %v1853_v48, %v2829_v34  ;;  %v3371_v37 = vld [vmem:[%s7687_s7 + $0xc0] sm:$0xff]  ;;  %v3385_v48 = vld [vmem:[%s7687_s7 + $0x130] sm:$0xff] }
 0x2ce   :  { %v1823_v43 = vmax.f32 %v1815_v21, 0.0  ;;  %v1801_v0 = vadd.f32 %v1785_v12, %v1720_v47  ;;  %v3362_v21 = vld [vmem:[%s7687_s7 + $0x78] sm:$0xff]  ;;  %v4235_v11 = vpack.c.bf16 %v3357_v22, %v3355_v10  ;;  %v3379_v45 = vld [vmem:[%s7687_s7 + $0x100] sm:$0xff]  ;;  %v3393_v34 = vld [vmem:[%s7687_s7 + $0x170] sm:$0xff]  ;;  %vm2918_vm9 = vcmask 588800  }
 0x2cf   :  { %v1863_v63 = vmax.f32 %v1861_v17, %v1862_v19  ;;  %v1860_v58 = vmax.f32 %v1858_v33, %v1859_v62  ;;  %v3360_v17 = vld [vmem:[%s7687_s7 + $0x68] sm:$0xff]  ;;  %v3373_v62 = vld [vmem:[%s7687_s7 + $0xd0] sm:$0xff]  ;;  %v3383_v32 = vld [vmem:[%s7687_s7 + $0x120] sm:$0xff] }
 0x2d0   :  { %v1868_v5 = vsel %vm1825_vm5, %v1823_v43, -inf  ;;  %v1816_v6 = vadd.f32 %v7219_v30, %v1801_v0  ;;  %v3348_v30 = vld [vmem:[%s7687_s7 + $0x8] sm:$0xff]  ;;  %v4237_v40 = vpack.c.bf16 %v3362_v21, %v3360_v17  ;;  %v3361_v43 = vld [vmem:[%s7687_s7 + $0x70] sm:$0xff]  ;;  %v4251_v14 = vpack.c.bf16 %v3373_v62, %v3371_v37  ;;  %v3391_v22 = vld [vmem:[%s7687_s7 + $0x160] sm:$0xff] }
 0x2d1   :  { %v1864_v31 = vrot.slane %v1863_v63, 2  ;;  %v1869_v49 = vrot.slane %v1868_v5, 4  ;;  %v4225_v51 = vpack.c.bf16 %v3350_v9, %v3348_v30  ;;  %v2833_v27 = vsel %vm2832_vm11, %v1860_v58, %v2831_v53  ;;  %v3368_v33 = vld [vmem:[%s7687_s7 + $0xa8] sm:$0xff]  ;;  %v3378_v9 = vld [vmem:[%s7687_s7 + $0xf8] sm:$0xff]  ;;  %v3025_v62 = vld [vmem:[%s7685_s5 + $0x330] sm:$0xff] }
 0x2d2   :  { %v1824_v61 = vmax.f32 %v1816_v6, 0.0  ;;  %v4239_v29 = vpack.c.bf16 %v3361_v43, %v3359_v59  ;;  %v3376_v30 = vld [vmem:[%s7687_s7 + $0xe8] sm:$0xff]  ;;  %v4263_v38 = vpack.c.bf16 %v3385_v48, %v3383_v32  ;;  %v3398_v17 = vld [vmem:[%s7687_s7 + $0x198] sm:$0xff]  ;;  %v4271_v21 = vpack.c.bf16 %v3393_v34, %v3391_v22  ;;  %v3399_v59 = vld [vmem:[%s7687_s7 + $0x1a0] sm:$0xff] }
 0x2d3   :  { %v1865_v4 = vmax.f32 %v1863_v63, %v1864_v31  ;;  %v1870_v28 = vmax.f32 %v1868_v5, %v1869_v49  ;;  %4226 = vmatprep.subr.bf16.mxu0 %v4225_v51  ;;  %v3364_v63 = vld [vmem:[%s7687_s7 + $0x88] sm:$0xff]  ;;  %v7309_v5 = vpop.permute.xlu0 %2871  ;;  %v3363_v49 = vld [vmem:[%s7687_s7 + $0x80] sm:$0xff]  ;;  %v3401_v43 = vld [vmem:[%s7687_s7 + $0x1b0] sm:$0xff] }
 0x2d4   :  { %v1875_v50 = vsel %vm1825_vm5, %v1824_v61, -inf  ;;  %4228 = vmatpush1.bf16.msra.mxu0 %v4227_v60  ;;  %v4241_v31 = vpack.c.bf16 %v3366_v20, %v3364_v63  ;;  %v3370_v61 = vld [vmem:[%s7687_s7 + $0xb8] sm:$0xff]  ;;  %v3380_v51 = vld [vmem:[%s7687_s7 + $0x108] sm:$0xff]  ;;  %v3381_v60 = vld [vmem:[%s7687_s7 + $0x110] sm:$0xff]  ;;  %v4279_v20 = vpack.c.bf16 %v3401_v43, %v3399_v59 }
 0x2d5   :  { %v1871_v42 = vrot.slane %v1870_v28, 2  ;;  %v1876_v52 = vrot.slane %v1875_v50, 4  ;;  %v1866_v41 = vrot.slane %v1865_v4, 1  ;;  %4230 = vmatprep.subr.bf16.mxu0 %v4229_v1  ;;  %v4257_v56 = vpack.c.bf16 %v3382_v55, %v3380_v51  ;;  %v3384_v1 = vld [vmem:[%s7687_s7 + $0x128] sm:$0xff]  ;;  %v3406_v63 = vld [vmem:[%s7687_s7 + $0x1d8] sm:$0xff]  ;;  %v2973_v55 = vld [vmem:[%s7685_s5 + $0x190] sm:$0xff] }
 0x2d6   :  { %v4259_v18 = vpack.c.bf16 %v3381_v60, %v3379_v45  ;;  %v4261_v25 = vpack.c.bf16 %v3386_v39, %v3384_v1  ;;  %v3034_v51 = vld [vmem:[%s7685_s5 + $0x378] sm:$0xf]  ;;  %v2925_v1 = vld [vmem:[%s7685_s5 + $0x10] sm:$0xff]  ;;  %v2928_v39 = vld [vmem:[%s7685_s5 + $0x28] sm:$0xff] }
 0x2d7   :  { %v1872_v15 = vmax.f32 %v1870_v28, %v1871_v42  ;;  %v1877_v23 = vmax.f32 %v1875_v50, %v1876_v52  ;;  %v1867_v16 = vmax.f32 %v1865_v4, %v1866_v41  ;;  %v4243_v4 = vpack.c.bf16 %v3365_v44, %v3363_v49  ;;  %v3369_v50 = vld [vmem:[%s7687_s7 + $0xb0] sm:$0xff]  ;;  %v2874_v44 = vpop.permute.xlu1 %2873 }
 0x2d8   :  { %4232 = vmatpush1.bf16.msra.mxu0 %v4231_v26  ;;  %v4245_v28 = vpack.c.bf16 %v3370_v61, %v3368_v33  ;;  %v4247_v42 = vpack.c.bf16 %v3369_v50, %v3367_v35  ;;  %v4249_v52 = vpack.c.bf16 %v3374_v3, %v3372_v2  ;;  %v4253_v41 = vpack.c.bf16 %v3378_v9, %v3376_v30  ;;  %v3387_v26 = vld [vmem:[%s7687_s7 + $0x140] sm:$0xff]  ;;  %v3022_v61 = vld [vmem:[%s7685_s5 + $0x318] sm:$0xff]  ;;  %v3028_v30 = vld [vmem:[%s7685_s5 + $0x348] sm:$0xff] }
 0x2d9   :  { %v1873_v57 = vrot.slane %v1872_v15, 1  ;;  %v1878_v13 = vrot.slane %v1877_v23, 2  ;;  %v2835_v12 = vsel %vm2834_vm13, %v1867_v16, %v2833_v27  ;;  %4234 = vmatprep.subr.bf16.mxu0 %v4233_v54  ;;  %v3392_v16 = vld [vmem:[%s7687_s7 + $0x168] sm:$0xff]  ;;  %v4267_v54 = vpack.c.bf16 %v3389_v46, %v3387_v26  ;;  %v3397_v27 = vld [vmem:[%s7687_s7 + $0x190] sm:$0xff]  ;;  %v3019_v33 = vld [vmem:[%s7685_s5 + $0x300] sm:$0xff] }
 0x2da   :  { %v2875_v35 = vsel %vm1777_vm4, %v7309_v5, %v2874_v44  ;;  %v4171_v3 = vpack.c.bf16 %v3022_v61, %v3019_v33  ;;  %v3035_v9 = vld [vmem:[%s7685_s5 + $0x380] sm:$0xf]  ;;  %v4185_v32 = vpack.c.bf16 %v2928_v39, %v2925_v1  ;;  %v2964_v44 = vld [vmem:[%s7685_s5 + $0x148] sm:$0xff]  ;;  %v3018_v61 = vld [vmem:[%s7685_s5 + $0x2f8] sm:$0xff]  ;;  %vm4435_vm4 = vmmov 0  }
 0x2db   :  { %v1879_v7 = vmax.f32 %v1877_v23, %v1878_v13  ;;  %v1874_v47 = vmax.f32 %v1872_v15, %v1873_v57  ;;  %v3375_v15 = vld [vmem:[%s7687_s7 + $0xe0] sm:$0xff]  ;;  %v3377_v23 = vld [vmem:[%s7687_s7 + $0xf0] sm:$0xff]  ;;  %v3388_v57 = vld [vmem:[%s7687_s7 + $0x148] sm:$0xff] }
 0x2dc   :  { %4236 = vmatpush1.bf16.msra.mxu0 %v4235_v11  ;;  %v4255_v36 = vpack.c.bf16 %v3377_v23, %v3375_v15  ;;  %v3390_v13 = vld [vmem:[%s7687_s7 + $0x158] sm:$0xff]  ;;  %v3400_v11 = vld [vmem:[%s7687_s7 + $0x1a8] sm:$0xff]  ;;  %v3031_v23 = vld [vmem:[%s7685_s5 + $0x360] sm:$0xff] }
 0x2dd   :  { %v1880_v24 = vrot.slane %v1879_v7, 1  ;;  %v2837_v0 = vsel %vm2836_vm14, %v1874_v47, %v2835_v12  ;;  %4238 = vmatprep.subr.bf16.mxu0 %v4237_v40  ;;  %v4265_v58 = vpack.c.bf16 %v3390_v13, %v3388_v57  ;;  %v3396_v47 = vld [vmem:[%s7687_s7 + $0x188] sm:$0xff]  ;;  %v2931_v57 = vld [vmem:[%s7685_s5 + $0x40] sm:$0xff]  ;;  %v2934_v13 = vld [vmem:[%s7685_s5 + $0x58] sm:$0xff] }
 0x2de   :  { %v4273_v53 = vpack.c.bf16 %v3398_v17, %v3396_v47  ;;  %v4189_v26 = vpack.c.bf16 %v2934_v13, %v2931_v57  ;;  %v2943_v47 = vld [vmem:[%s7685_s5 + $0xa0] sm:$0xff]  ;;  %v2946_v17 = vld [vmem:[%s7685_s5 + $0xb8] sm:$0xff] }
 0x2df   :  { %v1881_v19 = vmax.f32 %v1879_v7, %v1880_v24  ;;  %v3394_v7 = vld [vmem:[%s7687_s7 + $0x178] sm:$0xff]  ;;  %v3395_v24 = vld [vmem:[%s7687_s7 + $0x180] sm:$0xff] }
 0x2e0   :  { %4240 = vmatpush1.bf16.msra.mxu0 %v4239_v29  ;;  %v4269_v10 = vpack.c.bf16 %v3394_v7, %v3392_v16  ;;  %v4275_v12 = vpack.c.bf16 %v3397_v27, %v3395_v24  ;;  %v3403_v29 = vld [vmem:[%s7687_s7 + $0x1c0] sm:$0xff]  ;;  %v2937_v16 = vld [vmem:[%s7685_s5 + $0x70] sm:$0xff]  ;;  %v2940_v7 = vld [vmem:[%s7685_s5 + $0x88] sm:$0xff]  ;;  %v4197_v24 = vpack.c.bf16 %v2946_v17, %v2943_v47 }
 0x2e1   :  { %v2839_v6 = vsel %vm2838_vm15, %v1881_v19, %v2837_v0  ;;  %4242 = vmatprep.subr.bf16.mxu0 %v4241_v31  ;;  %v3402_v19 = vld [vmem:[%s7687_s7 + $0x1b8] sm:$0xff]  ;;  %v3404_v0 = vld [vmem:[%s7687_s7 + $0x1c8] sm:$0xff]  ;;  %v3405_v31 = vld [vmem:[%s7687_s7 + $0x1d0] sm:$0xff]  ;;  %v4193_v22 = vpack.c.bf16 %v2940_v7, %v2937_v16 }
 0x2e2   :  { %v7313_v8 = vsel %vm2916_vm7, %v2839_v6, %v7309_v5  ;;  %v4277_v40 = vpack.c.bf16 %v3402_v19, %v3400_v11  ;;  %v4281_v6 = vpack.c.bf16 %v3406_v63, %v3404_v0  ;;  %v4283_v49 = vpack.c.bf16 %v3405_v31, %v3403_v29  ;;  %v3032_v5 = vld [vmem:[%s7685_s5 + $0x368] sm:$0xff]  ;;  %v2949_v11 = vld [vmem:[%s7685_s5 + $0xd0] sm:$0xff]  ;;  %v2955_v0 = vld [vmem:[%s7685_s5 + $0x100] sm:$0xff] }
 0x2e3   :  { %2920 = vst [vmem:[%s7688_s9] sm:$0xff] %v7313_v8  ;;  %v4177_v15 = vpack.c.bf16 %v3035_v9, %v3032_v5  ;;  %v2952_v19 = vld [vmem:[%s7685_s5 + $0xe8] sm:$0xff]  ;;  %v2958_v63 = vld [vmem:[%s7685_s5 + $0x118] sm:$0xff]  ;;  %v3015_v33 = vld [vmem:[%s7685_s5 + $0x2e0] sm:$0xff] }
 0x2e4   :  { %4244 = vmatpush1.bf16.msra.mxu0 %v4243_v4  ;;  %v3026_v4 = vld [vmem:[%s7685_s5 + $0x338] sm:$0xff]  ;;  %v4201_v59 = vpack.c.bf16 %v2952_v19, %v2949_v11  ;;  %v4205_v29 = vpack.c.bf16 %v2958_v63, %v2955_v0  ;;  %v3416_v16 = vld [vmem:[%s7687_s7 + $0x228] sm:$0xff]  ;;  %v3415_v17 = vld [vmem:[%s7687_s7 + $0x220] sm:$0xff] }
 0x2e5   :  { %4246 = vmatprep.subr.bf16.mxu0 %v4245_v28  ;;  %v3029_v28 = vld [vmem:[%s7685_s5 + $0x350] sm:$0xff]  ;;  %v3030_v5 = vld [vmem:[%s7685_s5 + $0x358] sm:$0xff]  ;;  %v3419_v19 = vld [vmem:[%s7687_s7 + $0x240] sm:$0xff] }
 0x2e6   :  { %v4173_v37 = vpack.c.bf16 %v3029_v28, %v3026_v4  ;;  %v4211_v28 = vpack.c.bf16 %v3018_v61, %v3015_v33  ;;  %v3414_v1 = vld [vmem:[%s7687_s7 + $0x218] sm:$0xff] }
 0x2e7   :  { %v3418_v7 = vld [vmem:[%s7687_s7 + $0x238] sm:$0xff] }
 0x2e8   :  { %4248 = vmatpush1.bf16.msra.mxu0 %v4247_v42  ;;  %v4293_v47 = vpack.c.bf16 %v3418_v7, %v3416_v16 }
 0x2e9   :  { %4250 = vmatprep.subr.bf16.mxu0 %v4249_v52 }
 0x2ec   :  { %4252 = vmatpush1.bf16.msra.mxu0 %v4251_v14  ;;  %v4175_v14 = vpack.c.bf16 %v3028_v30, %v3025_v62  ;;  %v4434_v62 = vmov 0.0|0.0   ;;  %v3027_v30 = vld [vmem:[%s7685_s5 + $0x340] sm:$0xff] }
 0x2ed   :  { %4254 = vmatprep.subr.bf16.mxu0 %v4253_v41  ;;  %v7832_v41 = vmov 0.0   ;;  %v4219_v9 = vpack.c.bf16 %v3030_v5, %v3027_v30 }
 0x2f0   :  { %4256 = vmatpush1.bf16.msra.mxu0 %v4255_v36  ;;  %v2976_v36 = vld [vmem:[%s7685_s5 + $0x1a8] sm:$0xff] }
 0x2f1   :  { %4258 = vmatprep.subr.bf16.mxu0 %v4257_v56  ;;  %v4180_v56 = vpack.c.bf16 %v3034_v51, %v3031_v23  ;;  %v4183_v60 = vpack.c.bf16 %v2976_v36, %v2973_v55  ;;  %v3410_v51 = vld [vmem:[%s7687_s7 + $0x1f8] sm:$0xff]  ;;  %v3407_v55 = vld [vmem:[%s7687_s7 + $0x1e0] sm:$0xff] }
 0x2f4   :  { %4260 = vmatpush1.bf16.msra.mxu0 %v4259_v18  ;;  %v2979_v18 = vld [vmem:[%s7685_s5 + $0x1c0] sm:$0xff] }
 0x2f5   :  { %4262 = vmatprep.subr.bf16.mxu0 %v4261_v25  ;;  %v2982_v25 = vld [vmem:[%s7685_s5 + $0x1d8] sm:$0xff] }
 0x2f6   :  { %v4187_v48 = vpack.c.bf16 %v2982_v25, %v2979_v18  ;;  %v3039_v18 = vlaneseq }
 0x2f8   :  { %4264 = vmatpush1.bf16.msra.mxu0 %v4263_v38  ;;  %v2985_v38 = vld [vmem:[%s7685_s5 + $0x1f0] sm:$0xff]  ;;  %v3040_v25 = vshrl.u32 %v3039_v18, 7 }
 0x2f9   :  { %4266 = vmatprep.subr.bf16.mxu0 %v4265_v58  ;;  %v2988_v58 = vld [vmem:[%s7685_s5 + $0x208] sm:$0xff] }
 0x2fa   :  { %v4191_v46 = vpack.c.bf16 %v2988_v58, %v2985_v38  ;;  %v3041_v57 = vsub.s32 0, %v3040_v25  ;;  %v3411_v58 = vld [vmem:[%s7687_s7 + $0x200] sm:$0xff]  ;;  %v3049_v0 = vsub.s32 2, %v3040_v25 }
 0x2fc   :  { %4268 = vmatpush1.bf16.msra.mxu0 %v4267_v54  ;;  %v2991_v54 = vld [vmem:[%s7685_s5 + $0x220] sm:$0xff] }
 0x2fd   :  { %4270 = vmatprep.subr.bf16.mxu0 %v4269_v10  ;;  %v2994_v10 = vld [vmem:[%s7685_s5 + $0x238] sm:$0xff] }
 0x2fe   :  { %v4195_v34 = vpack.c.bf16 %v2994_v10, %v2991_v54 }
 0x300   :  { %4272 = vmatpush1.bf16.msra.mxu0 %v4271_v21  ;;  %v2997_v21 = vld [vmem:[%s7685_s5 + $0x250] sm:$0xff] }
 0x301   :  { %4274 = vmatprep.subr.bf16.mxu0 %v4273_v53  ;;  %v3000_v53 = vld [vmem:[%s7685_s5 + $0x268] sm:$0xff] }
 0x302   :  { %v4199_v27 = vpack.c.bf16 %v3000_v53, %v2997_v21  ;;  %v3417_v21 = vld [vmem:[%s7687_s7 + $0x230] sm:$0xff]  ;;  %v3420_v53 = vld [vmem:[%s7687_s7 + $0x248] sm:$0xff] }
 0x304   :  { %4276 = vmatpush1.bf16.msra.mxu0 %v4275_v12  ;;  %v3003_v12 = vld [vmem:[%s7685_s5 + $0x280] sm:$0xff] }
 0x305   :  { %4278 = vmatprep.subr.bf16.mxu0 %v4277_v40  ;;  %v3006_v40 = vld [vmem:[%s7685_s5 + $0x298] sm:$0xff] }
 0x306   :  { %v4203_v43 = vpack.c.bf16 %v3006_v40, %v3003_v12  ;;  %v3421_v12 = vld [vmem:[%s7687_s7 + $0x250] sm:$0xf] }
 0x307   :  { %v4300_v40 = vpack.c.bf16 %v3421_v12, %v3419_v19 }
 0x308   :  { %4280 = vmatpush1.bf16.msra.mxu0 %v4279_v20  ;;  %v3009_v20 = vld [vmem:[%s7685_s5 + $0x2b0] sm:$0xff] }
 0x309   :  { %4282 = vmatprep.subr.bf16.mxu0 %v4281_v6  ;;  %v3012_v6 = vld [vmem:[%s7685_s5 + $0x2c8] sm:$0xff] }
 0x30a   :  { %v4207_v31 = vpack.c.bf16 %v3012_v6, %v3009_v20 }
 0x30c   :  { %4284 = vmatpush1.bf16.msra.mxu0 %v4283_v49  ;;  %v2961_v49 = vld [vmem:[%s7685_s5 + $0x130] sm:$0xff] }
 0x30d   :  { %v4209_v4 = vpack.c.bf16 %v2964_v44, %v2961_v49  ;;  %v3423_v49 = vld [vmem:[%s7690_s8] sm:$0x3] }
 0x30e   :  { %v3428_v44 = vrot.slane %v3423_v49, %v3041_v57 }
 0x316   :  { %v2911_v50 = vpop.permute.xlu1 %2910 }
 0x31a   :  { %v2909_v2 = vpop.permute.xlu0 %2908 }
 0x31b   :  { %v7459_v42 = vsel %vm2912_vm8, %v2909_v2, %v2911_v50  ;;  %v2919_v52 = vsel %vm2918_vm9, %v2875_v35, %v2909_v2  ;;  %v2967_v35 = vld [vmem:[%s7685_s5 + $0x160] sm:$0xff]  ;;  %v2970_v50 = vld [vmem:[%s7685_s5 + $0x178] sm:$0xff] }
 0x31c   :  { %2922 = vst.msk [vmem:[%s7688_s9 + $0x10] sm:$0xff] %vm438_vm3, %v7459_v42  ;;  %2921 = vst [vmem:[%s7688_s9 + $0x8] sm:$0xff] %v2919_v52  ;;  %3129 = vmatprep.mubr.f32.mxu1 %v2919_v52  ;;  %v4213_v2 = vpack.c.bf16 %v2970_v50, %v2967_v35 }
 0x31d   :  { %3130 = vmatmul.mubr.f32.vlgmr.msra.gmra.mrb[48].mxu1 %v7313_v8 }
 0x31e   :  { %4172 = vmatpush1.bf16.msra.mxu1 %v4171_v3  ;;  %3200 = vmatprep.mubr.f32.mxu1 %v7832_v41  ;;  %v3021_v3 = vld [vmem:[%s7685_s5 + $0x310] sm:$0xff] }
 0x31f   :  { %4174 = vmatprep.subr.bf16.mxu1 %v4173_v37 }
 0x322   :  { %4176 = vmatpush1.bf16.msra.mxu1 %v4175_v14  ;;  %v3033_v14 = vld [vmem:[%s7685_s5 + $0x370] sm:$0xff] }
 0x323   :  { %4179 = vmatprep.subr.msk.bf16.mxu1 %vm4553_vm2, %v4177_v15  ;;  %v3036_v15 = vld [vmem:[%s7685_s5 + $0x388] sm:$0xf] }
 0x324   :  { %v4222_v23 = vpack.c.bf16 %v3036_v15, %v3033_v14 }
 0x326   :  { %4182 = vmatpush1.bf16.msk.msra.mxu1 %vm4553_vm2, %v4180_v56  ;;  %v3409_v56 = vld [vmem:[%s7687_s7 + $0x1f0] sm:$0xff] }
 0x327   :  { %4184 = vmatprep.subr.bf16.mxu1 %v4183_v60  ;;  %v4287_v60 = vpack.c.bf16 %v3409_v56, %v3407_v55 }
 0x329   :  { %3652 = vmatmul.mubr.msk.f32.vlgmr.msra.gmra.mrb[48].mxu1 %vm438_vm3, %v7459_v42 }
 0x32a   :  { %4186 = vmatpush3.bf16.msra.mxu1 %v4185_v32  ;;  %3271 = vmatprep.mubr.f32.mxu1 %v2919_v52  ;;  %v3024_v52 = vld [vmem:[%s7685_s5 + $0x328] sm:$0xff]  ;;  %v3045_v32 = vsub.s32 1, %v3040_v25 }
 0x32b   :  { %4188 = vmatprep.subr.bf16.mxu1 %v4187_v48  ;;  %v4216_v37 = vpack.c.bf16 %v3024_v52, %v3021_v3  ;;  %v3037_v48 = vld [vmem:[%s7689_s6] sm:$0x7] }
 0x32c   :  { %v3046_v13 = vrot.slane %v3037_v48, %v3045_v32  ;;  %v3042_v38 = vrot.slane %v3037_v48, %v3041_v57  ;;  %v3050_v63 = vrot.slane %v3037_v48, %v3049_v0  ;;  %v3432_v33 = vrot.slane %v3423_v49, %v3045_v32 }
 0x32e   :  { %4190 = vmatpush3.bf16.msra.mxu1 %v4189_v26  ;;  %v3413_v26 = vld [vmem:[%s7687_s7 + $0x210] sm:$0xff] }
 0x32f   :  { %4192 = vmatprep.subr.bf16.mxu1 %v4191_v46 }
 0x332   :  { %4194 = vmatpush3.bf16.msra.mxu1 %v4193_v22  ;;  %v4291_v22 = vpack.c.bf16 %v3413_v26, %v3411_v58 }
 0x333   :  { %4196 = vmatprep.subr.bf16.mxu1 %v4195_v34 }
 0x336   :  { %4198 = vmatpush3.bf16.msra.mxu1 %v4197_v24  ;;  %v3422_v24 = vld [vmem:[%s7687_s7 + $0x258] sm:$0xf] }
 0x337   :  { %4200 = vmatprep.subr.bf16.mxu1 %v4199_v27  ;;  %v4295_v27 = vpack.c.bf16 %v3417_v21, %v3415_v17  ;;  %v4297_v11 = vpack.c.bf16 %v3422_v24, %v3420_v53 }
 0x33a   :  { %4202 = vmatpush3.bf16.msra.mxu1 %v4201_v59 }
 0x33b   :  { %4204 = vmatprep.subr.bf16.mxu1 %v4203_v43 }
 0x33e   :  { %4206 = vmatpush3.bf16.msra.mxu1 %v4205_v29 }
 0x33f   :  { %4208 = vmatprep.subr.bf16.mxu1 %v4207_v31 }
 0x342   :  { %4210 = vmatpush3.bf16.msra.mxu1 %v4209_v4 }
 0x343   :  { %4212 = vmatprep.subr.bf16.mxu1 %v4211_v28 }
 0x346   :  { %4214 = vmatpush3.bf16.msra.mxu1 %v4213_v2 }
 0x347   :  { %4215 = vmatprep.subr.bf16.mxu1 %v4434_v62 }
 0x349   :  { %3272 = vmatmul.mubr.f32.vlgmr.msra.gmra.mrb[50].mxu1 %v7313_v8  ;;  %v3408_v8 = vld [vmem:[%s7687_s7 + $0x1e8] sm:$0xff] }
 0x34a   :  { %4217 = vmatpush3.bf16.msra.mxu1 %v4216_v37  ;;  %3712 = vmatprep.mubr.msk.f32.mxu1 %vm4435_vm4, %v7832_v41  ;;  %v4285_v36 = vpack.c.bf16 %v3410_v51, %v3408_v8 }
 0x34b   :  { %4218 = vmatprep.subr.bf16.mxu1 %v4434_v62 }
 0x34c   :  { %4286 = vmatprep.subr.bf16.mxu0 %v4285_v36 }
 0x34d   :  { %4288 = vmatpush1.bf16.msra.mxu0 %v4287_v60 }
 0x34e   :  { %4220 = vmatpush3.bf16.msra.mxu1 %v4219_v9 }
 0x34f   :  { %4221 = vmatprep.subr.bf16.mxu1 %v4434_v62 }
 0x352   :  { %4224 = vmatpush3.bf16.msk.msra.mxu1 %vm4553_vm2, %v4222_v23 }
 0x355   :  { %3713 = vmatmul.mubr.msk.f32.vlgmr.msra.gmra.mrb[52].mxu1 %vm438_vm3, %v7459_v42  ;;  %v3412_v42 = vld [vmem:[%s7687_s7 + $0x208] sm:$0xff] }
 0x356   :  { %v4289_v39 = vpack.c.bf16 %v3414_v1, %v3412_v42 }
 0x358   :  { %4290 = vmatprep.subr.bf16.mxu0 %v4289_v39 }
 0x3fc   :  { %v3202_v46 = vpop.f32.mrb[48].mxu1 }
 0x3fd   :  { %v3204_v54 = vpop.f32.mrb[49].mxu1  ;;  %v4319_v34 = vadd.f32 %v3202_v46, %v3042_v38 }
 0x3fe   :  { %v4320_v10 = vadd.f32 %v3204_v54, %v3046_v13 }
 0x400   :  { %3508 = vmatprep.mubr.f32.mxu0 %v4320_v10 }
 0x401   :  { %3509 = vmatmul.mubr.f32.vlgmr.msra.gmra.mrb[48].mxu0 %v4319_v34 }
 0x402   :  { %4292 = vmatpush1.bf16.msra.mxu0 %v4291_v22  ;;  %3579 = vmatprep.mubr.f32.mxu0 %v7832_v41 }
 0x403   :  { %4294 = vmatprep.subr.bf16.mxu0 %v4293_v47 }
 0x406   :  { %4296 = vmatpush1.bf16.msra.mxu0 %v4295_v27 }
 0x407   :  { %4299 = vmatprep.subr.msk.bf16.mxu0 %vm4553_vm2, %v4297_v11 }
 0x40a   :  { %4302 = vmatpush1.bf16.msk.msra.mxu0 %vm4553_vm2, %v4300_v40  ;;  %vm3587_vm2 = vcmask 523264  }
 0x41c   :  { %v3690_v59 = vpop.f32.mrb[50].mxu1 }
 0x41d   :  { %v3691_v41 = vpop.f32.mrb[51].mxu1 }
 0x41e   :  { %v3692_v43 = vadd.f32 %v3691_v41, %v3690_v59 }
 0x420   :  { %v3274_v20 = vadd.f32 %v3692_v43, %v3050_v63 }
 0x428   :  { %v3343_v6 = vpop.f32.mrb[52].mxu1 }
 0x429   :  { %v3344_v29 = vadd.f32 %v3343_v6, %v3274_v20  ;;  %v3714_v31 = vpop.f32.mrb[53].mxu1 }
 0x42b   :  { %3657 = vmatmul.mubr.msk.f32.vlgmr.msra.gmra.mrb[48].mxu0 %vm438_vm3, %v3344_v29 }
 0x4fe   :  { %v3581_v61 = vpop.f32.mrb[48].mxu0 }
 0x4ff   :  { %v4321_v45 = vadd.f32 %v3581_v61, %v3428_v44  ;;  %v3583_v4 = vpop.f32.mrb[49].mxu0 }
 0x500   :  { %v4322_v28 = vadd.f32 %v3583_v4, %v3432_v33 }
 0x501   :  { %3586 = vst [vmem:[%s7691_s10] sm:$0xff] %v4321_v45 }
 0x502   :  { %3588 = vst.msk [vmem:[%s7691_s10 + $0x8] sm:$0xff] %vm3587_vm2, %v4322_v28 }

</bundles_post_ra>
